<compile_context>
chip_gen: v6e
topology: v6e:2x2x1
jax: 0.10.0
libtpu: 0.0.40
codegen_flags: <defaults>
</compile_context>

<pallas_src>
import functools

import jax
import jax.numpy as jnp
from jax import lax
from jax.experimental import pallas as pl
from jax.experimental.pallas import tpu as pltpu


# ----------------------------------------------------------------------------
# Fused CBAM kernel (one batch element per grid step)
# ----------------------------------------------------------------------------
def cbam_kernel(x_ref, w1_ref, w2_ref, wconv_ref, out_ref, pad_ref, *, H, W, K):
    # x_ref:     (1, C, HW)          input, spatially flattened (lane-dense)
    # w1_ref:    (Cr, C)             1x1 conv #1 weight  (C -> C//r)
    # w2_ref:    (C, Cr)             1x1 conv #2 weight  (C//r -> C)
    # wconv_ref: (2*K*K,)  in SMEM   flattened 7x7 conv weight (OIHW, O=1)
    # out_ref:   (1, C, HW)          final output
    # pad_ref:   (2, HW + 2*PADF)    VMEM scratch: zero-padded flat pooled map
    HW = H * W
    p = K // 2
    PADF = p * W + p                      # max |flat tap offset|

    xb = x_ref[0]                                           # (C, HW)

    # ---- channel attention (global max/avg pool + shared MLP + sigmoid) ----
    maxv = jnp.max(xb, axis=1, keepdims=True)               # (C, 1)
    avgv = jnp.mean(xb, axis=1, keepdims=True)              # (C, 1)
    pooled2 = jnp.concatenate([maxv, avgv], axis=1)         # (C, 2)

    h = jnp.maximum(
        jnp.dot(w1_ref[...], pooled2, preferred_element_type=jnp.float32),
        0.0)                                                # (Cr, 2)
    o = jnp.dot(w2_ref[...], h, preferred_element_type=jnp.float32)  # (C, 2)
    att = jax.nn.sigmoid(o[:, 0:1] + o[:, 1:2])             # (C, 1)
    gated = att * xb                                        # (C, HW) stays in VMEM

    # ---- channel-wise max / mean pooling of the gated tensor ----------------
    cmax = jnp.max(gated, axis=0, keepdims=True)            # (1, HW)
    cavg = jnp.mean(gated, axis=0, keepdims=True)           # (1, HW)

    # Zero-padded flat pooled map held in VMEM scratch (padding done in-kernel).
    pad_ref[...] = jnp.zeros((2, HW + 2 * PADF), jnp.float32)
    pad_ref[0:1, PADF:PADF + HW] = cmax
    pad_ref[1:2, PADF:PADF + HW] = cavg

    # ---- 7x7 spatial conv, computed in flattened coordinates ----------------
    # out[i,j] = sum_{c,dh,dw} w[c,dh+p,dw+p] * pooled[c, i+dh, j+dw]  (zero pad)
    # In flat coords a (dh, dw) tap is a shift by d = dh*W + dw; reads that fall
    # off the top/bottom hit the zero pad of pad_ref, horizontal wrap-around is
    # killed by a per-dw column mask.
    col = lax.broadcasted_iota(jnp.int32, (1, HW), 1) % W   # column index j
    acc = jnp.zeros((1, HW), jnp.float32)
    for dw in range(-p, p + 1):
        valid = jnp.logical_and(col + dw >= 0, col + dw < W)   # (1, HW)
        pm = jnp.zeros((1, HW), jnp.float32)                   # max-channel acc
        pa = jnp.zeros((1, HW), jnp.float32)                   # avg-channel acc
        for dh in range(-p, p + 1):
            d = dh * W + dw
            sl = pad_ref[:, PADF + d:PADF + d + HW]            # (2, HW)
            w_m = wconv_ref[(dh + p) * K + (dw + p)]           # scalar (SMEM)
            w_a = wconv_ref[K * K + (dh + p) * K + (dw + p)]
            pm = pm + w_m * sl[0:1, :]
            pa = pa + w_a * sl[1:2, :]
        acc = acc + jnp.where(valid, pm + pa, 0.0)

    s_att = jax.nn.sigmoid(acc)                              # (1, HW)
    out_ref[0] = (s_att * gated).astype(out_ref.dtype)       # lane-dense store


# ----------------------------------------------------------------------------
# Wrapper
# ----------------------------------------------------------------------------
def cbam_pallas(x, w1, w2, wconv, spatial_kernel_size=7):
    """x: (B, C, H, W) f32; w1: (Cr, C); w2: (C, Cr); wconv: (1, 2, K, K)."""
    B, C, H, W = x.shape
    HW = H * W
    K = spatial_kernel_size
    p = K // 2
    Cr = w1.shape[0]
    PADF = p * W + p

    x_flat = x.reshape(B, C, HW)
    w_flat = wconv.reshape(-1).astype(jnp.float32)           # (2*K*K,)

    out_flat = pl.pallas_call(
        functools.partial(cbam_kernel, H=H, W=W, K=K),
        out_shape=jax.ShapeDtypeStruct((B, C, HW), jnp.float32),
        grid=(B,),
        in_specs=[
            pl.BlockSpec((1, C, HW), lambda b: (b, 0, 0)),
            pl.BlockSpec((Cr, C), lambda b: (0, 0)),
            pl.BlockSpec((C, Cr), lambda b: (0, 0)),
            pl.BlockSpec(memory_space=pltpu.MemorySpace.SMEM),
        ],
        out_specs=pl.BlockSpec((1, C, HW), lambda b: (b, 0, 0)),
        scratch_shapes=[pltpu.VMEM((2, HW + 2 * PADF), jnp.float32)],
        compiler_params=pltpu.CompilerParams(
            dimension_semantics=("parallel",)),
    )(x_flat, w1, w2, w_flat)
    return out_flat.reshape(B, C, H, W)


# ----------------------------------------------------------------------------
# Pure-JAX reference (mirrors the PyTorch forward)
# ----------------------------------------------------------------------------
def cbam_ref(x, w1, w2, wconv):
    maxp = jnp.max(x, axis=(2, 3), keepdims=True)            # (B, C, 1, 1)
    avgp = jnp.mean(x, axis=(2, 3), keepdims=True)

    def mlp(v):
        h = jnp.maximum(jnp.einsum('rc,bcij->brij', w1, v), 0.0)
        return jnp.einsum('cr,brij->bcij', w2, h)

    att = jax.nn.sigmoid(mlp(maxp) + mlp(avgp))
    xg = att * x
    cmax = jnp.max(xg, axis=1, keepdims=True)
    cavg = jnp.mean(xg, axis=1, keepdims=True)
    cat = jnp.concatenate([cmax, cavg], axis=1)              # (B, 2, H, W)
    K = wconv.shape[-1]
    p = K // 2
    conv = lax.conv_general_dilated(
        cat, wconv, window_strides=(1, 1), padding=((p, p), (p, p)),
        dimension_numbers=('NCHW', 'OIHW', 'NCHW'))
    satt = jax.nn.sigmoid(conv)
    return satt * xg


if __name__ == "__main__":
    key = jax.random.PRNGKey(0)
    kx, k1, k2, k3 = jax.random.split(key, 4)

    B, C, H, W = 2, 32, 16, 16
    reduction, K = 16, 7
    Cr = C // reduction                                      # = 2

    x = jax.random.normal(kx, (B, C, H, W), jnp.float32)
    # Deterministic synthetic parameters (shapes from CBAMLayer.__init__):
    w1 = jax.random.normal(k1, (Cr, C), jnp.float32) * 0.3   # Conv2d(C, C//r, 1)
    w2 = jax.random.normal(k2, (C, Cr), jnp.float32) * 0.3   # Conv2d(C//r, C, 1)
    wconv = jax.random.normal(k3, (1, 2, K, K), jnp.float32) * 0.1  # Conv2d(2,1,7)

    out = cbam_pallas(x, w1, w2, wconv, spatial_kernel_size=K)
    out = jax.block_until_ready(out)

    ref = cbam_ref(x, w1, w2, wconv)
    assert out.shape == x.shape
    err = float(jnp.max(jnp.abs(out - ref)))
    assert jnp.allclose(out, ref, rtol=1e-4, atol=1e-4), f"max abs err = {err}"

    print("KERNEL_OK")
</pallas_src>

<mosaic_0001>
module attributes {stable_mosaic.version = 11 : i64} {
  func.func @cbam_kernel(%arg0: i32, %arg1: memref<1x32x256xf32, #tpu.memory_space<vmem>>, %arg2: memref<2x32xf32, #tpu.memory_space<vmem>>, %arg3: memref<32x2xf32, #tpu.memory_space<vmem>>, %arg4: memref<98xf32, #tpu.memory_space<smem>>, %arg5: memref<1x32x256xf32, #tpu.memory_space<vmem>>, %arg6: memref<2x358xf32, #tpu.memory_space<vmem>>) attributes {dimension_semantics = [#tpu.dimension_semantics<parallel>], iteration_bounds = array<i64: 2>, scalar_prefetch = 0 : i64, scratch_operands = 1 : i64, tpu.core_type = #tpu.core_type<tc>, window_params = [{transform_indices = @transform_0, window_bounds = array<i64: 1, 32, 256>}, {pipeline_mode = #tpu.pipeline_mode<synchronous>, transform_indices = @transform_1, window_bounds = array<i64: 2, 32>}, {pipeline_mode = #tpu.pipeline_mode<synchronous>, transform_indices = @transform_2, window_bounds = array<i64: 32, 2>}, {transform_indices = @transform_3, window_bounds = array<i64: 98>}, {transform_indices = @transform_4, window_bounds = array<i64: 1, 32, 256>}]} {
    %c0 = arith.constant 0 : index
    %c0_0 = arith.constant 0 : index
    %c0_1 = arith.constant 0 : index
    %0 = vector.load %arg1[%c0, %c0_0, %c0_1] : memref<1x32x256xf32, #tpu.memory_space<vmem>>, vector<1x32x256xf32>
    %1 = vector.shape_cast %0 : vector<1x32x256xf32> to vector<32x256xf32>
    %cst = arith.constant dense<0xFF800000> : vector<32xf32>
    %2 = vector.multi_reduction <maximumf>, %1, %cst [1] : vector<32x256xf32> to vector<32xf32>
    %3 = vector.shape_cast %2 : vector<32xf32> to vector<32x1xf32>
    %cst_2 = arith.constant dense<0.000000e+00> : vector<32xf32>
    %4 = vector.multi_reduction <add>, %1, %cst_2 [1] : vector<32x256xf32> to vector<32xf32>
    %5 = vector.shape_cast %4 : vector<32xf32> to vector<32x1xf32>
    %cst_3 = arith.constant 2.560000e+02 : f32
    %6 = vector.broadcast %cst_3 : f32 to vector<32x1xf32>
    %7 = arith.divf %5, %6 : vector<32x1xf32>
    %8 = tpu.concatenate %3, %7 in 1 : vector<32x1xf32>, vector<32x1xf32> -> vector<32x2xf32>
    %c0_4 = arith.constant 0 : index
    %c0_5 = arith.constant 0 : index
    %9 = vector.load %arg2[%c0_4, %c0_5] : memref<2x32xf32, #tpu.memory_space<vmem>>, vector<2x32xf32>
    %cst_6 = arith.constant dense<0.000000e+00> : vector<2x2xf32>
    %10 = tpu.matmul %9, %8, %cst_6 {dimension_numbers = #tpu.dot_dimension_numbers<[1], [0], [0], [1], [0, 0, 1, 1], [], []>} : vector<2x32xf32>, vector<32x2xf32>, vector<2x2xf32> -> vector<2x2xf32>
    %cst_7 = arith.constant 0.000000e+00 : f32
    %11 = vector.broadcast %cst_7 : f32 to vector<2x2xf32>
    %12 = arith.maximumf %10, %11 : vector<2x2xf32>
    %c0_8 = arith.constant 0 : index
    %c0_9 = arith.constant 0 : index
    %13 = vector.load %arg3[%c0_8, %c0_9] : memref<32x2xf32, #tpu.memory_space<vmem>>, vector<32x2xf32>
    %cst_10 = arith.constant dense<0.000000e+00> : vector<32x2xf32>
    %14 = tpu.matmul %13, %12, %cst_10 {dimension_numbers = #tpu.dot_dimension_numbers<[1], [0], [0], [1], [0, 0, 1, 1], [], []>} : vector<32x2xf32>, vector<2x2xf32>, vector<32x2xf32> -> vector<32x2xf32>
    %15 = vector.extract_strided_slice %14 {offsets = [0, 0], sizes = [32, 1], strides = [1, 1]} : vector<32x2xf32> to vector<32x1xf32>
    %16 = vector.extract_strided_slice %14 {offsets = [0, 1], sizes = [32, 1], strides = [1, 1]} : vector<32x2xf32> to vector<32x1xf32>
    %17 = arith.addf %15, %16 : vector<32x1xf32>
    %18 = arith.negf %17 : vector<32x1xf32>
    %19 = math.exp %18 : vector<32x1xf32>
    %cst_11 = arith.constant 1.000000e+00 : f32
    %20 = vector.broadcast %cst_11 : f32 to vector<32x1xf32>
    %21 = arith.addf %20, %19 : vector<32x1xf32>
    %22 = arith.divf %20, %21 : vector<32x1xf32>
    %23 = vector.broadcast %22 : vector<32x1xf32> to vector<32x256xf32>
    %24 = arith.mulf %23, %1 : vector<32x256xf32>
    %cst_12 = arith.constant dense<0xFF800000> : vector<256xf32>
    %25 = vector.multi_reduction <maximumf>, %24, %cst_12 [0] : vector<32x256xf32> to vector<256xf32>
    %26 = vector.shape_cast %25 : vector<256xf32> to vector<1x256xf32>
    %cst_13 = arith.constant dense<0.000000e+00> : vector<256xf32>
    %27 = vector.multi_reduction <add>, %24, %cst_13 [0] : vector<32x256xf32> to vector<256xf32>
    %28 = vector.shape_cast %27 : vector<256xf32> to vector<1x256xf32>
    %cst_14 = arith.constant 3.200000e+01 : f32
    %29 = vector.broadcast %cst_14 : f32 to vector<1x256xf32>
    %30 = arith.divf %28, %29 : vector<1x256xf32>
    %cst_15 = arith.constant 0.000000e+00 : f32
    %31 = vector.broadcast %cst_15 : f32 to vector<2x358xf32>
    %c0_16 = arith.constant 0 : index
    %c0_17 = arith.constant 0 : index
    %32 = vector.load %arg6[%c0_16, %c0_17] : memref<2x358xf32, #tpu.memory_space<vmem>>, vector<2x358xf32>
    tpu.vector_store %arg6[%c0_16, %c0_17], %31 {strides = array<i32>} : memref<2x358xf32, #tpu.memory_space<vmem>>, vector<2x358xf32>,
    %c0_18 = arith.constant 0 : index
    %c51 = arith.constant 51 : index
    %33 = vector.load %arg6[%c0_18, %c51] : memref<2x358xf32, #tpu.memory_space<vmem>>, vector<1x256xf32>
    tpu.vector_store %arg6[%c0_18, %c51], %26 {strides = array<i32>} : memref<2x358xf32, #tpu.memory_space<vmem>>, vector<1x256xf32>,
    %c1 = arith.constant 1 : index
    %c51_19 = arith.constant 51 : index
    %34 = vector.load %arg6[%c1, %c51_19] : memref<2x358xf32, #tpu.memory_space<vmem>>, vector<1x256xf32>
    tpu.vector_store %arg6[%c1, %c51_19], %30 {strides = array<i32>} : memref<2x358xf32, #tpu.memory_space<vmem>>, vector<1x256xf32>,
    %35 = tpu.iota {dimensions = array<i32: 1>} : vector<1x256xi32>
    %c16_i32 = arith.constant 16 : i32
    %c0_i32 = arith.constant 0 : i32
    %36 = arith.cmpi eq, %c16_i32, %c0_i32 : i32
    %c1_i32 = arith.constant 1 : i32
    %37 = arith.select %36, %c1_i32, %c16_i32 : i32
    %38 = vector.broadcast %37 : i32 to vector<1x256xi32>
    %39 = arith.remsi %35, %38 : vector<1x256xi32>
    %c0_i32_20 = arith.constant 0 : i32
    %40 = vector.broadcast %c0_i32_20 : i32 to vector<1x256xi32>
    %41 = arith.cmpi ne, %39, %40 : vector<1x256xi32>
    %c0_i32_21 = arith.constant 0 : i32
    %42 = vector.broadcast %c0_i32_21 : i32 to vector<1x256xi32>
    %43 = arith.cmpi slt, %39, %42 : vector<1x256xi32>
    %c0_i32_22 = arith.constant 0 : i32
    %44 = arith.cmpi slt, %37, %c0_i32_22 : i32
    %45 = vector.broadcast %44 : i1 to vector<1x256xi1>
    %46 = vector.broadcast %45 : vector<1x256xi1> to vector<1x256xi1>
    %47 = arith.xori %43, %46 : vector<1x256xi1>
    %48 = arith.andi %47, %41 : vector<1x256xi1>
    %49 = vector.broadcast %37 : i32 to vector<1x256xi32>
    %50 = arith.addi %39, %49 : vector<1x256xi32>
    %51 = arith.select %48, %50, %39 : vector<1x256xi1>, vector<1x256xi32>
    %cst_23 = arith.constant 0.000000e+00 : f32
    %52 = vector.broadcast %cst_23 : f32 to vector<1x256xf32>
    %c-3_i32 = arith.constant -3 : i32
    %53 = vector.broadcast %c-3_i32 : i32 to vector<1x256xi32>
    %54 = arith.addi %51, %53 : vector<1x256xi32>
    %c0_i32_24 = arith.constant 0 : i32
    %55 = vector.broadcast %c0_i32_24 : i32 to vector<1x256xi32>
    %56 = arith.cmpi sge, %54, %55 : vector<1x256xi32>
    %c-3_i32_25 = arith.constant -3 : i32
    %57 = vector.broadcast %c-3_i32_25 : i32 to vector<1x256xi32>
    %58 = arith.addi %51, %57 : vector<1x256xi32>
    %c16_i32_26 = arith.constant 16 : i32
    %59 = vector.broadcast %c16_i32_26 : i32 to vector<1x256xi32>
    %60 = arith.cmpi slt, %58, %59 : vector<1x256xi32>
    %61 = arith.andi %56, %60 : vector<1x256xi1>
    %cst_27 = arith.constant 0.000000e+00 : f32
    %62 = vector.broadcast %cst_27 : f32 to vector<1x256xf32>
    %cst_28 = arith.constant 0.000000e+00 : f32
    %63 = vector.broadcast %cst_28 : f32 to vector<1x256xf32>
    %c0_29 = arith.constant 0 : index
    %c0_30 = arith.constant 0 : index
    %64 = vector.load %arg6[%c0_29, %c0_30] : memref<2x358xf32, #tpu.memory_space<vmem>>, vector<2x256xf32>
    %c0_31 = arith.constant 0 : index
    %65 = memref.load %arg4[%c0_31] : memref<98xf32, #tpu.memory_space<smem>>
    %c49 = arith.constant 49 : index
    %66 = memref.load %arg4[%c49] : memref<98xf32, #tpu.memory_space<smem>>
    %67 = vector.extract_strided_slice %64 {offsets = [0, 0], sizes = [1, 256], strides = [1, 1]} : vector<2x256xf32> to vector<1x256xf32>
    %68 = vector.broadcast %65 : f32 to vector<1x256xf32>
    %69 = arith.mulf %68, %67 : vector<1x256xf32>
    %70 = arith.addf %62, %69 : vector<1x256xf32>
    %71 = vector.extract_strided_slice %64 {offsets = [1, 0], sizes = [1, 256], strides = [1, 1]} : vector<2x256xf32> to vector<1x256xf32>
    %72 = vector.broadcast %66 : f32 to vector<1x256xf32>
    %73 = arith.mulf %72, %71 : vector<1x256xf32>
    %74 = arith.addf %63, %73 : vector<1x256xf32>
    %c0_32 = arith.constant 0 : index
    %c16 = arith.constant 16 : index
    %75 = vector.load %arg6[%c0_32, %c16] : memref<2x358xf32, #tpu.memory_space<vmem>>, vector<2x256xf32>
    %c7 = arith.constant 7 : index
    %76 = memref.load %arg4[%c7] : memref<98xf32, #tpu.memory_space<smem>>
    %c56 = arith.constant 56 : index
    %77 = memref.load %arg4[%c56] : memref<98xf32, #tpu.memory_space<smem>>
    %78 = vector.extract_strided_slice %75 {offsets = [0, 0], sizes = [1, 256], strides = [1, 1]} : vector<2x256xf32> to vector<1x256xf32>
    %79 = vector.broadcast %76 : f32 to vector<1x256xf32>
    %80 = arith.mulf %79, %78 : vector<1x256xf32>
    %81 = arith.addf %70, %80 : vector<1x256xf32>
    %82 = vector.extract_strided_slice %75 {offsets = [1, 0], sizes = [1, 256], strides = [1, 1]} : vector<2x256xf32> to vector<1x256xf32>
    %83 = vector.broadcast %77 : f32 to vector<1x256xf32>
    %84 = arith.mulf %83, %82 : vector<1x256xf32>
    %85 = arith.addf %74, %84 : vector<1x256xf32>
    %c0_33 = arith.constant 0 : index
    %c32 = arith.constant 32 : index
    %86 = vector.load %arg6[%c0_33, %c32] : memref<2x358xf32, #tpu.memory_space<vmem>>, vector<2x256xf32>
    %c14 = arith.constant 14 : index
    %87 = memref.load %arg4[%c14] : memref<98xf32, #tpu.memory_space<smem>>
    %c63 = arith.constant 63 : index
    %88 = memref.load %arg4[%c63] : memref<98xf32, #tpu.memory_space<smem>>
    %89 = vector.extract_strided_slice %86 {offsets = [0, 0], sizes = [1, 256], strides = [1, 1]} : vector<2x256xf32> to vector<1x256xf32>
    %90 = vector.broadcast %87 : f32 to vector<1x256xf32>
    %91 = arith.mulf %90, %89 : vector<1x256xf32>
    %92 = arith.addf %81, %91 : vector<1x256xf32>
    %93 = vector.extract_strided_slice %86 {offsets = [1, 0], sizes = [1, 256], strides = [1, 1]} : vector<2x256xf32> to vector<1x256xf32>
    %94 = vector.broadcast %88 : f32 to vector<1x256xf32>
    %95 = arith.mulf %94, %93 : vector<1x256xf32>
    %96 = arith.addf %85, %95 : vector<1x256xf32>
    %c0_34 = arith.constant 0 : index
    %c48 = arith.constant 48 : index
    %97 = vector.load %arg6[%c0_34, %c48] : memref<2x358xf32, #tpu.memory_space<vmem>>, vector<2x256xf32>
    %c21 = arith.constant 21 : index
    %98 = memref.load %arg4[%c21] : memref<98xf32, #tpu.memory_space<smem>>
    %c70 = arith.constant 70 : index
    %99 = memref.load %arg4[%c70] : memref<98xf32, #tpu.memory_space<smem>>
    %100 = vector.extract_strided_slice %97 {offsets = [0, 0], sizes = [1, 256], strides = [1, 1]} : vector<2x256xf32> to vector<1x256xf32>
    %101 = vector.broadcast %98 : f32 to vector<1x256xf32>
    %102 = arith.mulf %101, %100 : vector<1x256xf32>
    %103 = arith.addf %92, %102 : vector<1x256xf32>
    %104 = vector.extract_strided_slice %97 {offsets = [1, 0], sizes = [1, 256], strides = [1, 1]} : vector<2x256xf32> to vector<1x256xf32>
    %105 = vector.broadcast %99 : f32 to vector<1x256xf32>
    %106 = arith.mulf %105, %104 : vector<1x256xf32>
    %107 = arith.addf %96, %106 : vector<1x256xf32>
    %c0_35 = arith.constant 0 : index
    %c64 = arith.constant 64 : index
    %108 = vector.load %arg6[%c0_35, %c64] : memref<2x358xf32, #tpu.memory_space<vmem>>, vector<2x256xf32>
    %c28 = arith.constant 28 : index
    %109 = memref.load %arg4[%c28] : memref<98xf32, #tpu.memory_space<smem>>
    %c77 = arith.constant 77 : index
    %110 = memref.load %arg4[%c77] : memref<98xf32, #tpu.memory_space<smem>>
    %111 = vector.extract_strided_slice %108 {offsets = [0, 0], sizes = [1, 256], strides = [1, 1]} : vector<2x256xf32> to vector<1x256xf32>
    %112 = vector.broadcast %109 : f32 to vector<1x256xf32>
    %113 = arith.mulf %112, %111 : vector<1x256xf32>
    %114 = arith.addf %103, %113 : vector<1x256xf32>
    %115 = vector.extract_strided_slice %108 {offsets = [1, 0], sizes = [1, 256], strides = [1, 1]} : vector<2x256xf32> to vector<1x256xf32>
    %116 = vector.broadcast %110 : f32 to vector<1x256xf32>
    %117 = arith.mulf %116, %115 : vector<1x256xf32>
    %118 = arith.addf %107, %117 : vector<1x256xf32>
    %c0_36 = arith.constant 0 : index
    %c80 = arith.constant 80 : index
    %119 = vector.load %arg6[%c0_36, %c80] : memref<2x358xf32, #tpu.memory_space<vmem>>, vector<2x256xf32>
    %c35 = arith.constant 35 : index
    %120 = memref.load %arg4[%c35] : memref<98xf32, #tpu.memory_space<smem>>
    %c84 = arith.constant 84 : index
    %121 = memref.load %arg4[%c84] : memref<98xf32, #tpu.memory_space<smem>>
    %122 = vector.extract_strided_slice %119 {offsets = [0, 0], sizes = [1, 256], strides = [1, 1]} : vector<2x256xf32> to vector<1x256xf32>
    %123 = vector.broadcast %120 : f32 to vector<1x256xf32>
    %124 = arith.mulf %123, %122 : vector<1x256xf32>
    %125 = arith.addf %114, %124 : vector<1x256xf32>
    %126 = vector.extract_strided_slice %119 {offsets = [1, 0], sizes = [1, 256], strides = [1, 1]} : vector<2x256xf32> to vector<1x256xf32>
    %127 = vector.broadcast %121 : f32 to vector<1x256xf32>
    %128 = arith.mulf %127, %126 : vector<1x256xf32>
    %129 = arith.addf %118, %128 : vector<1x256xf32>
    %c0_37 = arith.constant 0 : index
    %c96 = arith.constant 96 : index
    %130 = vector.load %arg6[%c0_37, %c96] : memref<2x358xf32, #tpu.memory_space<vmem>>, vector<2x256xf32>
    %c42 = arith.constant 42 : index
    %131 = memref.load %arg4[%c42] : memref<98xf32, #tpu.memory_space<smem>>
    %c91 = arith.constant 91 : index
    %132 = memref.load %arg4[%c91] : memref<98xf32, #tpu.memory_space<smem>>
    %133 = vector.extract_strided_slice %130 {offsets = [0, 0], sizes = [1, 256], strides = [1, 1]} : vector<2x256xf32> to vector<1x256xf32>
    %134 = vector.broadcast %131 : f32 to vector<1x256xf32>
    %135 = arith.mulf %134, %133 : vector<1x256xf32>
    %136 = arith.addf %125, %135 : vector<1x256xf32>
    %137 = vector.extract_strided_slice %130 {offsets = [1, 0], sizes = [1, 256], strides = [1, 1]} : vector<2x256xf32> to vector<1x256xf32>
    %138 = vector.broadcast %132 : f32 to vector<1x256xf32>
    %139 = arith.mulf %138, %137 : vector<1x256xf32>
    %140 = arith.addf %129, %139 : vector<1x256xf32>
    %141 = arith.addf %136, %140 : vector<1x256xf32>
    %cst_38 = arith.constant 0.000000e+00 : f32
    %142 = vector.broadcast %cst_38 : f32 to vector<1x256xf32>
    %143 = arith.select %61, %141, %142 : vector<1x256xi1>, vector<1x256xf32>
    %144 = arith.addf %52, %143 : vector<1x256xf32>
    %c-2_i32 = arith.constant -2 : i32
    %145 = vector.broadcast %c-2_i32 : i32 to vector<1x256xi32>
    %146 = arith.addi %51, %145 : vector<1x256xi32>
    %c0_i32_39 = arith.constant 0 : i32
    %147 = vector.broadcast %c0_i32_39 : i32 to vector<1x256xi32>
    %148 = arith.cmpi sge, %146, %147 : vector<1x256xi32>
    %c-2_i32_40 = arith.constant -2 : i32
    %149 = vector.broadcast %c-2_i32_40 : i32 to vector<1x256xi32>
    %150 = arith.addi %51, %149 : vector<1x256xi32>
    %c16_i32_41 = arith.constant 16 : i32
    %151 = vector.broadcast %c16_i32_41 : i32 to vector<1x256xi32>
    %152 = arith.cmpi slt, %150, %151 : vector<1x256xi32>
    %153 = arith.andi %148, %152 : vector<1x256xi1>
    %cst_42 = arith.constant 0.000000e+00 : f32
    %154 = vector.broadcast %cst_42 : f32 to vector<1x256xf32>
    %cst_43 = arith.constant 0.000000e+00 : f32
    %155 = vector.broadcast %cst_43 : f32 to vector<1x256xf32>
    %c0_44 = arith.constant 0 : index
    %c1_45 = arith.constant 1 : index
    %156 = vector.load %arg6[%c0_44, %c1_45] : memref<2x358xf32, #tpu.memory_space<vmem>>, vector<2x256xf32>
    %c1_46 = arith.constant 1 : index
    %157 = memref.load %arg4[%c1_46] : memref<98xf32, #tpu.memory_space<smem>>
    %c50 = arith.constant 50 : index
    %158 = memref.load %arg4[%c50] : memref<98xf32, #tpu.memory_space<smem>>
    %159 = vector.extract_strided_slice %156 {offsets = [0, 0], sizes = [1, 256], strides = [1, 1]} : vector<2x256xf32> to vector<1x256xf32>
    %160 = vector.broadcast %157 : f32 to vector<1x256xf32>
    %161 = arith.mulf %160, %159 : vector<1x256xf32>
    %162 = arith.addf %154, %161 : vector<1x256xf32>
    %163 = vector.extract_strided_slice %156 {offsets = [1, 0], sizes = [1, 256], strides = [1, 1]} : vector<2x256xf32> to vector<1x256xf32>
    %164 = vector.broadcast %158 : f32 to vector<1x256xf32>
    %165 = arith.mulf %164, %163 : vector<1x256xf32>
    %166 = arith.addf %155, %165 : vector<1x256xf32>
    %c0_47 = arith.constant 0 : index
    %c17 = arith.constant 17 : index
    %167 = vector.load %arg6[%c0_47, %c17] : memref<2x358xf32, #tpu.memory_space<vmem>>, vector<2x256xf32>
    %c8 = arith.constant 8 : index
    %168 = memref.load %arg4[%c8] : memref<98xf32, #tpu.memory_space<smem>>
    %c57 = arith.constant 57 : index
    %169 = memref.load %arg4[%c57] : memref<98xf32, #tpu.memory_space<smem>>
    %170 = vector.extract_strided_slice %167 {offsets = [0, 0], sizes = [1, 256], strides = [1, 1]} : vector<2x256xf32> to vector<1x256xf32>
    %171 = vector.broadcast %168 : f32 to vector<1x256xf32>
    %172 = arith.mulf %171, %170 : vector<1x256xf32>
    %173 = arith.addf %162, %172 : vector<1x256xf32>
    %174 = vector.extract_strided_slice %167 {offsets = [1, 0], sizes = [1, 256], strides = [1, 1]} : vector<2x256xf32> to vector<1x256xf32>
    %175 = vector.broadcast %169 : f32 to vector<1x256xf32>
    %176 = arith.mulf %175, %174 : vector<1x256xf32>
    %177 = arith.addf %166, %176 : vector<1x256xf32>
    %c0_48 = arith.constant 0 : index
    %c33 = arith.constant 33 : index
    %178 = vector.load %arg6[%c0_48, %c33] : memref<2x358xf32, #tpu.memory_space<vmem>>, vector<2x256xf32>
    %c15 = arith.constant 15 : index
    %179 = memref.load %arg4[%c15] : memref<98xf32, #tpu.memory_space<smem>>
    %c64_49 = arith.constant 64 : index
    %180 = memref.load %arg4[%c64_49] : memref<98xf32, #tpu.memory_space<smem>>
    %181 = vector.extract_strided_slice %178 {offsets = [0, 0], sizes = [1, 256], strides = [1, 1]} : vector<2x256xf32> to vector<1x256xf32>
    %182 = vector.broadcast %179 : f32 to vector<1x256xf32>
    %183 = arith.mulf %182, %181 : vector<1x256xf32>
    %184 = arith.addf %173, %183 : vector<1x256xf32>
    %185 = vector.extract_strided_slice %178 {offsets = [1, 0], sizes = [1, 256], strides = [1, 1]} : vector<2x256xf32> to vector<1x256xf32>
    %186 = vector.broadcast %180 : f32 to vector<1x256xf32>
    %187 = arith.mulf %186, %185 : vector<1x256xf32>
    %188 = arith.addf %177, %187 : vector<1x256xf32>
    %c0_50 = arith.constant 0 : index
    %c49_51 = arith.constant 49 : index
    %189 = vector.load %arg6[%c0_50, %c49_51] : memref<2x358xf32, #tpu.memory_space<vmem>>, vector<2x256xf32>
    %c22 = arith.constant 22 : index
    %190 = memref.load %arg4[%c22] : memref<98xf32, #tpu.memory_space<smem>>
    %c71 = arith.constant 71 : index
    %191 = memref.load %arg4[%c71] : memref<98xf32, #tpu.memory_space<smem>>
    %192 = vector.extract_strided_slice %189 {offsets = [0, 0], sizes = [1, 256], strides = [1, 1]} : vector<2x256xf32> to vector<1x256xf32>
    %193 = vector.broadcast %190 : f32 to vector<1x256xf32>
    %194 = arith.mulf %193, %192 : vector<1x256xf32>
    %195 = arith.addf %184, %194 : vector<1x256xf32>
    %196 = vector.extract_strided_slice %189 {offsets = [1, 0], sizes = [1, 256], strides = [1, 1]} : vector<2x256xf32> to vector<1x256xf32>
    %197 = vector.broadcast %191 : f32 to vector<1x256xf32>
    %198 = arith.mulf %197, %196 : vector<1x256xf32>
    %199 = arith.addf %188, %198 : vector<1x256xf32>
    %c0_52 = arith.constant 0 : index
    %c65 = arith.constant 65 : index
    %200 = vector.load %arg6[%c0_52, %c65] : memref<2x358xf32, #tpu.memory_space<vmem>>, vector<2x256xf32>
    %c29 = arith.constant 29 : index
    %201 = memref.load %arg4[%c29] : memref<98xf32, #tpu.memory_space<smem>>
    %c78 = arith.constant 78 : index
    %202 = memref.load %arg4[%c78] : memref<98xf32, #tpu.memory_space<smem>>
    %203 = vector.extract_strided_slice %200 {offsets = [0, 0], sizes = [1, 256], strides = [1, 1]} : vector<2x256xf32> to vector<1x256xf32>
    %204 = vector.broadcast %201 : f32 to vector<1x256xf32>
    %205 = arith.mulf %204, %203 : vector<1x256xf32>
    %206 = arith.addf %195, %205 : vector<1x256xf32>
    %207 = vector.extract_strided_slice %200 {offsets = [1, 0], sizes = [1, 256], strides = [1, 1]} : vector<2x256xf32> to vector<1x256xf32>
    %208 = vector.broadcast %202 : f32 to vector<1x256xf32>
    %209 = arith.mulf %208, %207 : vector<1x256xf32>
    %210 = arith.addf %199, %209 : vector<1x256xf32>
    %c0_53 = arith.constant 0 : index
    %c81 = arith.constant 81 : index
    %211 = vector.load %arg6[%c0_53, %c81] : memref<2x358xf32, #tpu.memory_space<vmem>>, vector<2x256xf32>
    %c36 = arith.constant 36 : index
    %212 = memref.load %arg4[%c36] : memref<98xf32, #tpu.memory_space<smem>>
    %c85 = arith.constant 85 : index
    %213 = memref.load %arg4[%c85] : memref<98xf32, #tpu.memory_space<smem>>
    %214 = vector.extract_strided_slice %211 {offsets = [0, 0], sizes = [1, 256], strides = [1, 1]} : vector<2x256xf32> to vector<1x256xf32>
    %215 = vector.broadcast %212 : f32 to vector<1x256xf32>
    %216 = arith.mulf %215, %214 : vector<1x256xf32>
    %217 = arith.addf %206, %216 : vector<1x256xf32>
    %218 = vector.extract_strided_slice %211 {offsets = [1, 0], sizes = [1, 256], strides = [1, 1]} : vector<2x256xf32> to vector<1x256xf32>
    %219 = vector.broadcast %213 : f32 to vector<1x256xf32>
    %220 = arith.mulf %219, %218 : vector<1x256xf32>
    %221 = arith.addf %210, %220 : vector<1x256xf32>
    %c0_54 = arith.constant 0 : index
    %c97 = arith.constant 97 : index
    %222 = vector.load %arg6[%c0_54, %c97] : memref<2x358xf32, #tpu.memory_space<vmem>>, vector<2x256xf32>
    %c43 = arith.constant 43 : index
    %223 = memref.load %arg4[%c43] : memref<98xf32, #tpu.memory_space<smem>>
    %c92 = arith.constant 92 : index
    %224 = memref.load %arg4[%c92] : memref<98xf32, #tpu.memory_space<smem>>
    %225 = vector.extract_strided_slice %222 {offsets = [0, 0], sizes = [1, 256], strides = [1, 1]} : vector<2x256xf32> to vector<1x256xf32>
    %226 = vector.broadcast %223 : f32 to vector<1x256xf32>
    %227 = arith.mulf %226, %225 : vector<1x256xf32>
    %228 = arith.addf %217, %227 : vector<1x256xf32>
    %229 = vector.extract_strided_slice %222 {offsets = [1, 0], sizes = [1, 256], strides = [1, 1]} : vector<2x256xf32> to vector<1x256xf32>
    %230 = vector.broadcast %224 : f32 to vector<1x256xf32>
    %231 = arith.mulf %230, %229 : vector<1x256xf32>
    %232 = arith.addf %221, %231 : vector<1x256xf32>
    %233 = arith.addf %228, %232 : vector<1x256xf32>
    %cst_55 = arith.constant 0.000000e+00 : f32
    %234 = vector.broadcast %cst_55 : f32 to vector<1x256xf32>
    %235 = arith.select %153, %233, %234 : vector<1x256xi1>, vector<1x256xf32>
    %236 = arith.addf %144, %235 : vector<1x256xf32>
    %c-1_i32 = arith.constant -1 : i32
    %237 = vector.broadcast %c-1_i32 : i32 to vector<1x256xi32>
    %238 = arith.addi %51, %237 : vector<1x256xi32>
    %c0_i32_56 = arith.constant 0 : i32
    %239 = vector.broadcast %c0_i32_56 : i32 to vector<1x256xi32>
    %240 = arith.cmpi sge, %238, %239 : vector<1x256xi32>
    %c-1_i32_57 = arith.constant -1 : i32
    %241 = vector.broadcast %c-1_i32_57 : i32 to vector<1x256xi32>
    %242 = arith.addi %51, %241 : vector<1x256xi32>
    %c16_i32_58 = arith.constant 16 : i32
    %243 = vector.broadcast %c16_i32_58 : i32 to vector<1x256xi32>
    %244 = arith.cmpi slt, %242, %243 : vector<1x256xi32>
    %245 = arith.andi %240, %244 : vector<1x256xi1>
    %cst_59 = arith.constant 0.000000e+00 : f32
    %246 = vector.broadcast %cst_59 : f32 to vector<1x256xf32>
    %cst_60 = arith.constant 0.000000e+00 : f32
    %247 = vector.broadcast %cst_60 : f32 to vector<1x256xf32>
    %c0_61 = arith.constant 0 : index
    %c2 = arith.constant 2 : index
    %248 = vector.load %arg6[%c0_61, %c2] : memref<2x358xf32, #tpu.memory_space<vmem>>, vector<2x256xf32>
    %c2_62 = arith.constant 2 : index
    %249 = memref.load %arg4[%c2_62] : memref<98xf32, #tpu.memory_space<smem>>
    %c51_63 = arith.constant 51 : index
    %250 = memref.load %arg4[%c51_63] : memref<98xf32, #tpu.memory_space<smem>>
    %251 = vector.extract_strided_slice %248 {offsets = [0, 0], sizes = [1, 256], strides = [1, 1]} : vector<2x256xf32> to vector<1x256xf32>
    %252 = vector.broadcast %249 : f32 to vector<1x256xf32>
    %253 = arith.mulf %252, %251 : vector<1x256xf32>
    %254 = arith.addf %246, %253 : vector<1x256xf32>
    %255 = vector.extract_strided_slice %248 {offsets = [1, 0], sizes = [1, 256], strides = [1, 1]} : vector<2x256xf32> to vector<1x256xf32>
    %256 = vector.broadcast %250 : f32 to vector<1x256xf32>
    %257 = arith.mulf %256, %255 : vector<1x256xf32>
    %258 = arith.addf %247, %257 : vector<1x256xf32>
    %c0_64 = arith.constant 0 : index
    %c18 = arith.constant 18 : index
    %259 = vector.load %arg6[%c0_64, %c18] : memref<2x358xf32, #tpu.memory_space<vmem>>, vector<2x256xf32>
    %c9 = arith.constant 9 : index
    %260 = memref.load %arg4[%c9] : memref<98xf32, #tpu.memory_space<smem>>
    %c58 = arith.constant 58 : index
    %261 = memref.load %arg4[%c58] : memref<98xf32, #tpu.memory_space<smem>>
    %262 = vector.extract_strided_slice %259 {offsets = [0, 0], sizes = [1, 256], strides = [1, 1]} : vector<2x256xf32> to vector<1x256xf32>
    %263 = vector.broadcast %260 : f32 to vector<1x256xf32>
    %264 = arith.mulf %263, %262 : vector<1x256xf32>
    %265 = arith.addf %254, %264 : vector<1x256xf32>
    %266 = vector.extract_strided_slice %259 {offsets = [1, 0], sizes = [1, 256], strides = [1, 1]} : vector<2x256xf32> to vector<1x256xf32>
    %267 = vector.broadcast %261 : f32 to vector<1x256xf32>
    %268 = arith.mulf %267, %266 : vector<1x256xf32>
    %269 = arith.addf %258, %268 : vector<1x256xf32>
    %c0_65 = arith.constant 0 : index
    %c34 = arith.constant 34 : index
    %270 = vector.load %arg6[%c0_65, %c34] : memref<2x358xf32, #tpu.memory_space<vmem>>, vector<2x256xf32>
    %c16_66 = arith.constant 16 : index
    %271 = memref.load %arg4[%c16_66] : memref<98xf32, #tpu.memory_space<smem>>
    %c65_67 = arith.constant 65 : index
    %272 = memref.load %arg4[%c65_67] : memref<98xf32, #tpu.memory_space<smem>>
    %273 = vector.extract_strided_slice %270 {offsets = [0, 0], sizes = [1, 256], strides = [1, 1]} : vector<2x256xf32> to vector<1x256xf32>
    %274 = vector.broadcast %271 : f32 to vector<1x256xf32>
    %275 = arith.mulf %274, %273 : vector<1x256xf32>
    %276 = arith.addf %265, %275 : vector<1x256xf32>
    %277 = vector.extract_strided_slice %270 {offsets = [1, 0], sizes = [1, 256], strides = [1, 1]} : vector<2x256xf32> to vector<1x256xf32>
    %278 = vector.broadcast %272 : f32 to vector<1x256xf32>
    %279 = arith.mulf %278, %277 : vector<1x256xf32>
    %280 = arith.addf %269, %279 : vector<1x256xf32>
    %c0_68 = arith.constant 0 : index
    %c50_69 = arith.constant 50 : index
    %281 = vector.load %arg6[%c0_68, %c50_69] : memref<2x358xf32, #tpu.memory_space<vmem>>, vector<2x256xf32>
    %c23 = arith.constant 23 : index
    %282 = memref.load %arg4[%c23] : memref<98xf32, #tpu.memory_space<smem>>
    %c72 = arith.constant 72 : index
    %283 = memref.load %arg4[%c72] : memref<98xf32, #tpu.memory_space<smem>>
    %284 = vector.extract_strided_slice %281 {offsets = [0, 0], sizes = [1, 256], strides = [1, 1]} : vector<2x256xf32> to vector<1x256xf32>
    %285 = vector.broadcast %282 : f32 to vector<1x256xf32>
    %286 = arith.mulf %285, %284 : vector<1x256xf32>
    %287 = arith.addf %276, %286 : vector<1x256xf32>
    %288 = vector.extract_strided_slice %281 {offsets = [1, 0], sizes = [1, 256], strides = [1, 1]} : vector<2x256xf32> to vector<1x256xf32>
    %289 = vector.broadcast %283 : f32 to vector<1x256xf32>
    %290 = arith.mulf %289, %288 : vector<1x256xf32>
    %291 = arith.addf %280, %290 : vector<1x256xf32>
    %c0_70 = arith.constant 0 : index
    %c66 = arith.constant 66 : index
    %292 = vector.load %arg6[%c0_70, %c66] : memref<2x358xf32, #tpu.memory_space<vmem>>, vector<2x256xf32>
    %c30 = arith.constant 30 : index
    %293 = memref.load %arg4[%c30] : memref<98xf32, #tpu.memory_space<smem>>
    %c79 = arith.constant 79 : index
    %294 = memref.load %arg4[%c79] : memref<98xf32, #tpu.memory_space<smem>>
    %295 = vector.extract_strided_slice %292 {offsets = [0, 0], sizes = [1, 256], strides = [1, 1]} : vector<2x256xf32> to vector<1x256xf32>
    %296 = vector.broadcast %293 : f32 to vector<1x256xf32>
    %297 = arith.mulf %296, %295 : vector<1x256xf32>
    %298 = arith.addf %287, %297 : vector<1x256xf32>
    %299 = vector.extract_strided_slice %292 {offsets = [1, 0], sizes = [1, 256], strides = [1, 1]} : vector<2x256xf32> to vector<1x256xf32>
    %300 = vector.broadcast %294 : f32 to vector<1x256xf32>
    %301 = arith.mulf %300, %299 : vector<1x256xf32>
    %302 = arith.addf %291, %301 : vector<1x256xf32>
    %c0_71 = arith.constant 0 : index
    %c82 = arith.constant 82 : index
    %303 = vector.load %arg6[%c0_71, %c82] : memref<2x358xf32, #tpu.memory_space<vmem>>, vector<2x256xf32>
    %c37 = arith.constant 37 : index
    %304 = memref.load %arg4[%c37] : memref<98xf32, #tpu.memory_space<smem>>
    %c86 = arith.constant 86 : index
    %305 = memref.load %arg4[%c86] : memref<98xf32, #tpu.memory_space<smem>>
    %306 = vector.extract_strided_slice %303 {offsets = [0, 0], sizes = [1, 256], strides = [1, 1]} : vector<2x256xf32> to vector<1x256xf32>
    %307 = vector.broadcast %304 : f32 to vector<1x256xf32>
    %308 = arith.mulf %307, %306 : vector<1x256xf32>
    %309 = arith.addf %298, %308 : vector<1x256xf32>
    %310 = vector.extract_strided_slice %303 {offsets = [1, 0], sizes = [1, 256], strides = [1, 1]} : vector<2x256xf32> to vector<1x256xf32>
    %311 = vector.broadcast %305 : f32 to vector<1x256xf32>
    %312 = arith.mulf %311, %310 : vector<1x256xf32>
    %313 = arith.addf %302, %312 : vector<1x256xf32>
    %c0_72 = arith.constant 0 : index
    %c98 = arith.constant 98 : index
    %314 = vector.load %arg6[%c0_72, %c98] : memref<2x358xf32, #tpu.memory_space<vmem>>, vector<2x256xf32>
    %c44 = arith.constant 44 : index
    %315 = memref.load %arg4[%c44] : memref<98xf32, #tpu.memory_space<smem>>
    %c93 = arith.constant 93 : index
    %316 = memref.load %arg4[%c93] : memref<98xf32, #tpu.memory_space<smem>>
    %317 = vector.extract_strided_slice %314 {offsets = [0, 0], sizes = [1, 256], strides = [1, 1]} : vector<2x256xf32> to vector<1x256xf32>
    %318 = vector.broadcast %315 : f32 to vector<1x256xf32>
    %319 = arith.mulf %318, %317 : vector<1x256xf32>
    %320 = arith.addf %309, %319 : vector<1x256xf32>
    %321 = vector.extract_strided_slice %314 {offsets = [1, 0], sizes = [1, 256], strides = [1, 1]} : vector<2x256xf32> to vector<1x256xf32>
    %322 = vector.broadcast %316 : f32 to vector<1x256xf32>
    %323 = arith.mulf %322, %321 : vector<1x256xf32>
    %324 = arith.addf %313, %323 : vector<1x256xf32>
    %325 = arith.addf %320, %324 : vector<1x256xf32>
    %cst_73 = arith.constant 0.000000e+00 : f32
    %326 = vector.broadcast %cst_73 : f32 to vector<1x256xf32>
    %327 = arith.select %245, %325, %326 : vector<1x256xi1>, vector<1x256xf32>
    %328 = arith.addf %236, %327 : vector<1x256xf32>
    %c0_i32_74 = arith.constant 0 : i32
    %329 = vector.broadcast %c0_i32_74 : i32 to vector<1x256xi32>
    %330 = arith.addi %51, %329 : vector<1x256xi32>
    %c0_i32_75 = arith.constant 0 : i32
    %331 = vector.broadcast %c0_i32_75 : i32 to vector<1x256xi32>
    %332 = arith.cmpi sge, %330, %331 : vector<1x256xi32>
    %c0_i32_76 = arith.constant 0 : i32
    %333 = vector.broadcast %c0_i32_76 : i32 to vector<1x256xi32>
    %334 = arith.addi %51, %333 : vector<1x256xi32>
    %c16_i32_77 = arith.constant 16 : i32
    %335 = vector.broadcast %c16_i32_77 : i32 to vector<1x256xi32>
    %336 = arith.cmpi slt, %334, %335 : vector<1x256xi32>
    %337 = arith.andi %332, %336 : vector<1x256xi1>
    %cst_78 = arith.constant 0.000000e+00 : f32
    %338 = vector.broadcast %cst_78 : f32 to vector<1x256xf32>
    %cst_79 = arith.constant 0.000000e+00 : f32
    %339 = vector.broadcast %cst_79 : f32 to vector<1x256xf32>
    %c0_80 = arith.constant 0 : index
    %c3 = arith.constant 3 : index
    %340 = vector.load %arg6[%c0_80, %c3] : memref<2x358xf32, #tpu.memory_space<vmem>>, vector<2x256xf32>
    %c3_81 = arith.constant 3 : index
    %341 = memref.load %arg4[%c3_81] : memref<98xf32, #tpu.memory_space<smem>>
    %c52 = arith.constant 52 : index
    %342 = memref.load %arg4[%c52] : memref<98xf32, #tpu.memory_space<smem>>
    %343 = vector.extract_strided_slice %340 {offsets = [0, 0], sizes = [1, 256], strides = [1, 1]} : vector<2x256xf32> to vector<1x256xf32>
    %344 = vector.broadcast %341 : f32 to vector<1x256xf32>
    %345 = arith.mulf %344, %343 : vector<1x256xf32>
    %346 = arith.addf %338, %345 : vector<1x256xf32>
    %347 = vector.extract_strided_slice %340 {offsets = [1, 0], sizes = [1, 256], strides = [1, 1]} : vector<2x256xf32> to vector<1x256xf32>
    %348 = vector.broadcast %342 : f32 to vector<1x256xf32>
    %349 = arith.mulf %348, %347 : vector<1x256xf32>
    %350 = arith.addf %339, %349 : vector<1x256xf32>
    %c0_82 = arith.constant 0 : index
    %c19 = arith.constant 19 : index
    %351 = vector.load %arg6[%c0_82, %c19] : memref<2x358xf32, #tpu.memory_space<vmem>>, vector<2x256xf32>
    %c10 = arith.constant 10 : index
    %352 = memref.load %arg4[%c10] : memref<98xf32, #tpu.memory_space<smem>>
    %c59 = arith.constant 59 : index
    %353 = memref.load %arg4[%c59] : memref<98xf32, #tpu.memory_space<smem>>
    %354 = vector.extract_strided_slice %351 {offsets = [0, 0], sizes = [1, 256], strides = [1, 1]} : vector<2x256xf32> to vector<1x256xf32>
    %355 = vector.broadcast %352 : f32 to vector<1x256xf32>
    %356 = arith.mulf %355, %354 : vector<1x256xf32>
    %357 = arith.addf %346, %356 : vector<1x256xf32>
    %358 = vector.extract_strided_slice %351 {offsets = [1, 0], sizes = [1, 256], strides = [1, 1]} : vector<2x256xf32> to vector<1x256xf32>
    %359 = vector.broadcast %353 : f32 to vector<1x256xf32>
    %360 = arith.mulf %359, %358 : vector<1x256xf32>
    %361 = arith.addf %350, %360 : vector<1x256xf32>
    %c0_83 = arith.constant 0 : index
    %c35_84 = arith.constant 35 : index
    %362 = vector.load %arg6[%c0_83, %c35_84] : memref<2x358xf32, #tpu.memory_space<vmem>>, vector<2x256xf32>
    %c17_85 = arith.constant 17 : index
    %363 = memref.load %arg4[%c17_85] : memref<98xf32, #tpu.memory_space<smem>>
    %c66_86 = arith.constant 66 : index
    %364 = memref.load %arg4[%c66_86] : memref<98xf32, #tpu.memory_space<smem>>
    %365 = vector.extract_strided_slice %362 {offsets = [0, 0], sizes = [1, 256], strides = [1, 1]} : vector<2x256xf32> to vector<1x256xf32>
    %366 = vector.broadcast %363 : f32 to vector<1x256xf32>
    %367 = arith.mulf %366, %365 : vector<1x256xf32>
    %368 = arith.addf %357, %367 : vector<1x256xf32>
    %369 = vector.extract_strided_slice %362 {offsets = [1, 0], sizes = [1, 256], strides = [1, 1]} : vector<2x256xf32> to vector<1x256xf32>
    %370 = vector.broadcast %364 : f32 to vector<1x256xf32>
    %371 = arith.mulf %370, %369 : vector<1x256xf32>
    %372 = arith.addf %361, %371 : vector<1x256xf32>
    %c0_87 = arith.constant 0 : index
    %c51_88 = arith.constant 51 : index
    %373 = vector.load %arg6[%c0_87, %c51_88] : memref<2x358xf32, #tpu.memory_space<vmem>>, vector<2x256xf32>
    %c24 = arith.constant 24 : index
    %374 = memref.load %arg4[%c24] : memref<98xf32, #tpu.memory_space<smem>>
    %c73 = arith.constant 73 : index
    %375 = memref.load %arg4[%c73] : memref<98xf32, #tpu.memory_space<smem>>
    %376 = vector.extract_strided_slice %373 {offsets = [0, 0], sizes = [1, 256], strides = [1, 1]} : vector<2x256xf32> to vector<1x256xf32>
    %377 = vector.broadcast %374 : f32 to vector<1x256xf32>
    %378 = arith.mulf %377, %376 : vector<1x256xf32>
    %379 = arith.addf %368, %378 : vector<1x256xf32>
    %380 = vector.extract_strided_slice %373 {offsets = [1, 0], sizes = [1, 256], strides = [1, 1]} : vector<2x256xf32> to vector<1x256xf32>
    %381 = vector.broadcast %375 : f32 to vector<1x256xf32>
    %382 = arith.mulf %381, %380 : vector<1x256xf32>
    %383 = arith.addf %372, %382 : vector<1x256xf32>
    %c0_89 = arith.constant 0 : index
    %c67 = arith.constant 67 : index
    %384 = vector.load %arg6[%c0_89, %c67] : memref<2x358xf32, #tpu.memory_space<vmem>>, vector<2x256xf32>
    %c31 = arith.constant 31 : index
    %385 = memref.load %arg4[%c31] : memref<98xf32, #tpu.memory_space<smem>>
    %c80_90 = arith.constant 80 : index
    %386 = memref.load %arg4[%c80_90] : memref<98xf32, #tpu.memory_space<smem>>
    %387 = vector.extract_strided_slice %384 {offsets = [0, 0], sizes = [1, 256], strides = [1, 1]} : vector<2x256xf32> to vector<1x256xf32>
    %388 = vector.broadcast %385 : f32 to vector<1x256xf32>
    %389 = arith.mulf %388, %387 : vector<1x256xf32>
    %390 = arith.addf %379, %389 : vector<1x256xf32>
    %391 = vector.extract_strided_slice %384 {offsets = [1, 0], sizes = [1, 256], strides = [1, 1]} : vector<2x256xf32> to vector<1x256xf32>
    %392 = vector.broadcast %386 : f32 to vector<1x256xf32>
    %393 = arith.mulf %392, %391 : vector<1x256xf32>
    %394 = arith.addf %383, %393 : vector<1x256xf32>
    %c0_91 = arith.constant 0 : index
    %c83 = arith.constant 83 : index
    %395 = vector.load %arg6[%c0_91, %c83] : memref<2x358xf32, #tpu.memory_space<vmem>>, vector<2x256xf32>
    %c38 = arith.constant 38 : index
    %396 = memref.load %arg4[%c38] : memref<98xf32, #tpu.memory_space<smem>>
    %c87 = arith.constant 87 : index
    %397 = memref.load %arg4[%c87] : memref<98xf32, #tpu.memory_space<smem>>
    %398 = vector.extract_strided_slice %395 {offsets = [0, 0], sizes = [1, 256], strides = [1, 1]} : vector<2x256xf32> to vector<1x256xf32>
    %399 = vector.broadcast %396 : f32 to vector<1x256xf32>
    %400 = arith.mulf %399, %398 : vector<1x256xf32>
    %401 = arith.addf %390, %400 : vector<1x256xf32>
    %402 = vector.extract_strided_slice %395 {offsets = [1, 0], sizes = [1, 256], strides = [1, 1]} : vector<2x256xf32> to vector<1x256xf32>
    %403 = vector.broadcast %397 : f32 to vector<1x256xf32>
    %404 = arith.mulf %403, %402 : vector<1x256xf32>
    %405 = arith.addf %394, %404 : vector<1x256xf32>
    %c0_92 = arith.constant 0 : index
    %c99 = arith.constant 99 : index
    %406 = vector.load %arg6[%c0_92, %c99] : memref<2x358xf32, #tpu.memory_space<vmem>>, vector<2x256xf32>
    %c45 = arith.constant 45 : index
    %407 = memref.load %arg4[%c45] : memref<98xf32, #tpu.memory_space<smem>>
    %c94 = arith.constant 94 : index
    %408 = memref.load %arg4[%c94] : memref<98xf32, #tpu.memory_space<smem>>
    %409 = vector.extract_strided_slice %406 {offsets = [0, 0], sizes = [1, 256], strides = [1, 1]} : vector<2x256xf32> to vector<1x256xf32>
    %410 = vector.broadcast %407 : f32 to vector<1x256xf32>
    %411 = arith.mulf %410, %409 : vector<1x256xf32>
    %412 = arith.addf %401, %411 : vector<1x256xf32>
    %413 = vector.extract_strided_slice %406 {offsets = [1, 0], sizes = [1, 256], strides = [1, 1]} : vector<2x256xf32> to vector<1x256xf32>
    %414 = vector.broadcast %408 : f32 to vector<1x256xf32>
    %415 = arith.mulf %414, %413 : vector<1x256xf32>
    %416 = arith.addf %405, %415 : vector<1x256xf32>
    %417 = arith.addf %412, %416 : vector<1x256xf32>
    %cst_93 = arith.constant 0.000000e+00 : f32
    %418 = vector.broadcast %cst_93 : f32 to vector<1x256xf32>
    %419 = arith.select %337, %417, %418 : vector<1x256xi1>, vector<1x256xf32>
    %420 = arith.addf %328, %419 : vector<1x256xf32>
    %c1_i32_94 = arith.constant 1 : i32
    %421 = vector.broadcast %c1_i32_94 : i32 to vector<1x256xi32>
    %422 = arith.addi %51, %421 : vector<1x256xi32>
    %c0_i32_95 = arith.constant 0 : i32
    %423 = vector.broadcast %c0_i32_95 : i32 to vector<1x256xi32>
    %424 = arith.cmpi sge, %422, %423 : vector<1x256xi32>
    %c1_i32_96 = arith.constant 1 : i32
    %425 = vector.broadcast %c1_i32_96 : i32 to vector<1x256xi32>
    %426 = arith.addi %51, %425 : vector<1x256xi32>
    %c16_i32_97 = arith.constant 16 : i32
    %427 = vector.broadcast %c16_i32_97 : i32 to vector<1x256xi32>
    %428 = arith.cmpi slt, %426, %427 : vector<1x256xi32>
    %429 = arith.andi %424, %428 : vector<1x256xi1>
    %cst_98 = arith.constant 0.000000e+00 : f32
    %430 = vector.broadcast %cst_98 : f32 to vector<1x256xf32>
    %cst_99 = arith.constant 0.000000e+00 : f32
    %431 = vector.broadcast %cst_99 : f32 to vector<1x256xf32>
    %c0_100 = arith.constant 0 : index
    %c4 = arith.constant 4 : index
    %432 = vector.load %arg6[%c0_100, %c4] : memref<2x358xf32, #tpu.memory_space<vmem>>, vector<2x256xf32>
    %c4_101 = arith.constant 4 : index
    %433 = memref.load %arg4[%c4_101] : memref<98xf32, #tpu.memory_space<smem>>
    %c53 = arith.constant 53 : index
    %434 = memref.load %arg4[%c53] : memref<98xf32, #tpu.memory_space<smem>>
    %435 = vector.extract_strided_slice %432 {offsets = [0, 0], sizes = [1, 256], strides = [1, 1]} : vector<2x256xf32> to vector<1x256xf32>
    %436 = vector.broadcast %433 : f32 to vector<1x256xf32>
    %437 = arith.mulf %436, %435 : vector<1x256xf32>
    %438 = arith.addf %430, %437 : vector<1x256xf32>
    %439 = vector.extract_strided_slice %432 {offsets = [1, 0], sizes = [1, 256], strides = [1, 1]} : vector<2x256xf32> to vector<1x256xf32>
    %440 = vector.broadcast %434 : f32 to vector<1x256xf32>
    %441 = arith.mulf %440, %439 : vector<1x256xf32>
    %442 = arith.addf %431, %441 : vector<1x256xf32>
    %c0_102 = arith.constant 0 : index
    %c20 = arith.constant 20 : index
    %443 = vector.load %arg6[%c0_102, %c20] : memref<2x358xf32, #tpu.memory_space<vmem>>, vector<2x256xf32>
    %c11 = arith.constant 11 : index
    %444 = memref.load %arg4[%c11] : memref<98xf32, #tpu.memory_space<smem>>
    %c60 = arith.constant 60 : index
    %445 = memref.load %arg4[%c60] : memref<98xf32, #tpu.memory_space<smem>>
    %446 = vector.extract_strided_slice %443 {offsets = [0, 0], sizes = [1, 256], strides = [1, 1]} : vector<2x256xf32> to vector<1x256xf32>
    %447 = vector.broadcast %444 : f32 to vector<1x256xf32>
    %448 = arith.mulf %447, %446 : vector<1x256xf32>
    %449 = arith.addf %438, %448 : vector<1x256xf32>
    %450 = vector.extract_strided_slice %443 {offsets = [1, 0], sizes = [1, 256], strides = [1, 1]} : vector<2x256xf32> to vector<1x256xf32>
    %451 = vector.broadcast %445 : f32 to vector<1x256xf32>
    %452 = arith.mulf %451, %450 : vector<1x256xf32>
    %453 = arith.addf %442, %452 : vector<1x256xf32>
    %c0_103 = arith.constant 0 : index
    %c36_104 = arith.constant 36 : index
    %454 = vector.load %arg6[%c0_103, %c36_104] : memref<2x358xf32, #tpu.memory_space<vmem>>, vector<2x256xf32>
    %c18_105 = arith.constant 18 : index
    %455 = memref.load %arg4[%c18_105] : memref<98xf32, #tpu.memory_space<smem>>
    %c67_106 = arith.constant 67 : index
    %456 = memref.load %arg4[%c67_106] : memref<98xf32, #tpu.memory_space<smem>>
    %457 = vector.extract_strided_slice %454 {offsets = [0, 0], sizes = [1, 256], strides = [1, 1]} : vector<2x256xf32> to vector<1x256xf32>
    %458 = vector.broadcast %455 : f32 to vector<1x256xf32>
    %459 = arith.mulf %458, %457 : vector<1x256xf32>
    %460 = arith.addf %449, %459 : vector<1x256xf32>
    %461 = vector.extract_strided_slice %454 {offsets = [1, 0], sizes = [1, 256], strides = [1, 1]} : vector<2x256xf32> to vector<1x256xf32>
    %462 = vector.broadcast %456 : f32 to vector<1x256xf32>
    %463 = arith.mulf %462, %461 : vector<1x256xf32>
    %464 = arith.addf %453, %463 : vector<1x256xf32>
    %c0_107 = arith.constant 0 : index
    %c52_108 = arith.constant 52 : index
    %465 = vector.load %arg6[%c0_107, %c52_108] : memref<2x358xf32, #tpu.memory_space<vmem>>, vector<2x256xf32>
    %c25 = arith.constant 25 : index
    %466 = memref.load %arg4[%c25] : memref<98xf32, #tpu.memory_space<smem>>
    %c74 = arith.constant 74 : index
    %467 = memref.load %arg4[%c74] : memref<98xf32, #tpu.memory_space<smem>>
    %468 = vector.extract_strided_slice %465 {offsets = [0, 0], sizes = [1, 256], strides = [1, 1]} : vector<2x256xf32> to vector<1x256xf32>
    %469 = vector.broadcast %466 : f32 to vector<1x256xf32>
    %470 = arith.mulf %469, %468 : vector<1x256xf32>
    %471 = arith.addf %460, %470 : vector<1x256xf32>
    %472 = vector.extract_strided_slice %465 {offsets = [1, 0], sizes = [1, 256], strides = [1, 1]} : vector<2x256xf32> to vector<1x256xf32>
    %473 = vector.broadcast %467 : f32 to vector<1x256xf32>
    %474 = arith.mulf %473, %472 : vector<1x256xf32>
    %475 = arith.addf %464, %474 : vector<1x256xf32>
    %c0_109 = arith.constant 0 : index
    %c68 = arith.constant 68 : index
    %476 = vector.load %arg6[%c0_109, %c68] : memref<2x358xf32, #tpu.memory_space<vmem>>, vector<2x256xf32>
    %c32_110 = arith.constant 32 : index
    %477 = memref.load %arg4[%c32_110] : memref<98xf32, #tpu.memory_space<smem>>
    %c81_111 = arith.constant 81 : index
    %478 = memref.load %arg4[%c81_111] : memref<98xf32, #tpu.memory_space<smem>>
    %479 = vector.extract_strided_slice %476 {offsets = [0, 0], sizes = [1, 256], strides = [1, 1]} : vector<2x256xf32> to vector<1x256xf32>
    %480 = vector.broadcast %477 : f32 to vector<1x256xf32>
    %481 = arith.mulf %480, %479 : vector<1x256xf32>
    %482 = arith.addf %471, %481 : vector<1x256xf32>
    %483 = vector.extract_strided_slice %476 {offsets = [1, 0], sizes = [1, 256], strides = [1, 1]} : vector<2x256xf32> to vector<1x256xf32>
    %484 = vector.broadcast %478 : f32 to vector<1x256xf32>
    %485 = arith.mulf %484, %483 : vector<1x256xf32>
    %486 = arith.addf %475, %485 : vector<1x256xf32>
    %c0_112 = arith.constant 0 : index
    %c84_113 = arith.constant 84 : index
    %487 = vector.load %arg6[%c0_112, %c84_113] : memref<2x358xf32, #tpu.memory_space<vmem>>, vector<2x256xf32>
    %c39 = arith.constant 39 : index
    %488 = memref.load %arg4[%c39] : memref<98xf32, #tpu.memory_space<smem>>
    %c88 = arith.constant 88 : index
    %489 = memref.load %arg4[%c88] : memref<98xf32, #tpu.memory_space<smem>>
    %490 = vector.extract_strided_slice %487 {offsets = [0, 0], sizes = [1, 256], strides = [1, 1]} : vector<2x256xf32> to vector<1x256xf32>
    %491 = vector.broadcast %488 : f32 to vector<1x256xf32>
    %492 = arith.mulf %491, %490 : vector<1x256xf32>
    %493 = arith.addf %482, %492 : vector<1x256xf32>
    %494 = vector.extract_strided_slice %487 {offsets = [1, 0], sizes = [1, 256], strides = [1, 1]} : vector<2x256xf32> to vector<1x256xf32>
    %495 = vector.broadcast %489 : f32 to vector<1x256xf32>
    %496 = arith.mulf %495, %494 : vector<1x256xf32>
    %497 = arith.addf %486, %496 : vector<1x256xf32>
    %c0_114 = arith.constant 0 : index
    %c100 = arith.constant 100 : index
    %498 = vector.load %arg6[%c0_114, %c100] : memref<2x358xf32, #tpu.memory_space<vmem>>, vector<2x256xf32>
    %c46 = arith.constant 46 : index
    %499 = memref.load %arg4[%c46] : memref<98xf32, #tpu.memory_space<smem>>
    %c95 = arith.constant 95 : index
    %500 = memref.load %arg4[%c95] : memref<98xf32, #tpu.memory_space<smem>>
    %501 = vector.extract_strided_slice %498 {offsets = [0, 0], sizes = [1, 256], strides = [1, 1]} : vector<2x256xf32> to vector<1x256xf32>
    %502 = vector.broadcast %499 : f32 to vector<1x256xf32>
    %503 = arith.mulf %502, %501 : vector<1x256xf32>
    %504 = arith.addf %493, %503 : vector<1x256xf32>
    %505 = vector.extract_strided_slice %498 {offsets = [1, 0], sizes = [1, 256], strides = [1, 1]} : vector<2x256xf32> to vector<1x256xf32>
    %506 = vector.broadcast %500 : f32 to vector<1x256xf32>
    %507 = arith.mulf %506, %505 : vector<1x256xf32>
    %508 = arith.addf %497, %507 : vector<1x256xf32>
    %509 = arith.addf %504, %508 : vector<1x256xf32>
    %cst_115 = arith.constant 0.000000e+00 : f32
    %510 = vector.broadcast %cst_115 : f32 to vector<1x256xf32>
    %511 = arith.select %429, %509, %510 : vector<1x256xi1>, vector<1x256xf32>
    %512 = arith.addf %420, %511 : vector<1x256xf32>
    %c2_i32 = arith.constant 2 : i32
    %513 = vector.broadcast %c2_i32 : i32 to vector<1x256xi32>
    %514 = arith.addi %51, %513 : vector<1x256xi32>
    %c0_i32_116 = arith.constant 0 : i32
    %515 = vector.broadcast %c0_i32_116 : i32 to vector<1x256xi32>
    %516 = arith.cmpi sge, %514, %515 : vector<1x256xi32>
    %c2_i32_117 = arith.constant 2 : i32
    %517 = vector.broadcast %c2_i32_117 : i32 to vector<1x256xi32>
    %518 = arith.addi %51, %517 : vector<1x256xi32>
    %c16_i32_118 = arith.constant 16 : i32
    %519 = vector.broadcast %c16_i32_118 : i32 to vector<1x256xi32>
    %520 = arith.cmpi slt, %518, %519 : vector<1x256xi32>
    %521 = arith.andi %516, %520 : vector<1x256xi1>
    %cst_119 = arith.constant 0.000000e+00 : f32
    %522 = vector.broadcast %cst_119 : f32 to vector<1x256xf32>
    %cst_120 = arith.constant 0.000000e+00 : f32
    %523 = vector.broadcast %cst_120 : f32 to vector<1x256xf32>
    %c0_121 = arith.constant 0 : index
    %c5 = arith.constant 5 : index
    %524 = vector.load %arg6[%c0_121, %c5] : memref<2x358xf32, #tpu.memory_space<vmem>>, vector<2x256xf32>
    %c5_122 = arith.constant 5 : index
    %525 = memref.load %arg4[%c5_122] : memref<98xf32, #tpu.memory_space<smem>>
    %c54 = arith.constant 54 : index
    %526 = memref.load %arg4[%c54] : memref<98xf32, #tpu.memory_space<smem>>
    %527 = vector.extract_strided_slice %524 {offsets = [0, 0], sizes = [1, 256], strides = [1, 1]} : vector<2x256xf32> to vector<1x256xf32>
    %528 = vector.broadcast %525 : f32 to vector<1x256xf32>
    %529 = arith.mulf %528, %527 : vector<1x256xf32>
    %530 = arith.addf %522, %529 : vector<1x256xf32>
    %531 = vector.extract_strided_slice %524 {offsets = [1, 0], sizes = [1, 256], strides = [1, 1]} : vector<2x256xf32> to vector<1x256xf32>
    %532 = vector.broadcast %526 : f32 to vector<1x256xf32>
    %533 = arith.mulf %532, %531 : vector<1x256xf32>
    %534 = arith.addf %523, %533 : vector<1x256xf32>
    %c0_123 = arith.constant 0 : index
    %c21_124 = arith.constant 21 : index
    %535 = vector.load %arg6[%c0_123, %c21_124] : memref<2x358xf32, #tpu.memory_space<vmem>>, vector<2x256xf32>
    %c12 = arith.constant 12 : index
    %536 = memref.load %arg4[%c12] : memref<98xf32, #tpu.memory_space<smem>>
    %c61 = arith.constant 61 : index
    %537 = memref.load %arg4[%c61] : memref<98xf32, #tpu.memory_space<smem>>
    %538 = vector.extract_strided_slice %535 {offsets = [0, 0], sizes = [1, 256], strides = [1, 1]} : vector<2x256xf32> to vector<1x256xf32>
    %539 = vector.broadcast %536 : f32 to vector<1x256xf32>
    %540 = arith.mulf %539, %538 : vector<1x256xf32>
    %541 = arith.addf %530, %540 : vector<1x256xf32>
    %542 = vector.extract_strided_slice %535 {offsets = [1, 0], sizes = [1, 256], strides = [1, 1]} : vector<2x256xf32> to vector<1x256xf32>
    %543 = vector.broadcast %537 : f32 to vector<1x256xf32>
    %544 = arith.mulf %543, %542 : vector<1x256xf32>
    %545 = arith.addf %534, %544 : vector<1x256xf32>
    %c0_125 = arith.constant 0 : index
    %c37_126 = arith.constant 37 : index
    %546 = vector.load %arg6[%c0_125, %c37_126] : memref<2x358xf32, #tpu.memory_space<vmem>>, vector<2x256xf32>
    %c19_127 = arith.constant 19 : index
    %547 = memref.load %arg4[%c19_127] : memref<98xf32, #tpu.memory_space<smem>>
    %c68_128 = arith.constant 68 : index
    %548 = memref.load %arg4[%c68_128] : memref<98xf32, #tpu.memory_space<smem>>
    %549 = vector.extract_strided_slice %546 {offsets = [0, 0], sizes = [1, 256], strides = [1, 1]} : vector<2x256xf32> to vector<1x256xf32>
    %550 = vector.broadcast %547 : f32 to vector<1x256xf32>
    %551 = arith.mulf %550, %549 : vector<1x256xf32>
    %552 = arith.addf %541, %551 : vector<1x256xf32>
    %553 = vector.extract_strided_slice %546 {offsets = [1, 0], sizes = [1, 256], strides = [1, 1]} : vector<2x256xf32> to vector<1x256xf32>
    %554 = vector.broadcast %548 : f32 to vector<1x256xf32>
    %555 = arith.mulf %554, %553 : vector<1x256xf32>
    %556 = arith.addf %545, %555 : vector<1x256xf32>
    %c0_129 = arith.constant 0 : index
    %c53_130 = arith.constant 53 : index
    %557 = vector.load %arg6[%c0_129, %c53_130] : memref<2x358xf32, #tpu.memory_space<vmem>>, vector<2x256xf32>
    %c26 = arith.constant 26 : index
    %558 = memref.load %arg4[%c26] : memref<98xf32, #tpu.memory_space<smem>>
    %c75 = arith.constant 75 : index
    %559 = memref.load %arg4[%c75] : memref<98xf32, #tpu.memory_space<smem>>
    %560 = vector.extract_strided_slice %557 {offsets = [0, 0], sizes = [1, 256], strides = [1, 1]} : vector<2x256xf32> to vector<1x256xf32>
    %561 = vector.broadcast %558 : f32 to vector<1x256xf32>
    %562 = arith.mulf %561, %560 : vector<1x256xf32>
    %563 = arith.addf %552, %562 : vector<1x256xf32>
    %564 = vector.extract_strided_slice %557 {offsets = [1, 0], sizes = [1, 256], strides = [1, 1]} : vector<2x256xf32> to vector<1x256xf32>
    %565 = vector.broadcast %559 : f32 to vector<1x256xf32>
    %566 = arith.mulf %565, %564 : vector<1x256xf32>
    %567 = arith.addf %556, %566 : vector<1x256xf32>
    %c0_131 = arith.constant 0 : index
    %c69 = arith.constant 69 : index
    %568 = vector.load %arg6[%c0_131, %c69] : memref<2x358xf32, #tpu.memory_space<vmem>>, vector<2x256xf32>
    %c33_132 = arith.constant 33 : index
    %569 = memref.load %arg4[%c33_132] : memref<98xf32, #tpu.memory_space<smem>>
    %c82_133 = arith.constant 82 : index
    %570 = memref.load %arg4[%c82_133] : memref<98xf32, #tpu.memory_space<smem>>
    %571 = vector.extract_strided_slice %568 {offsets = [0, 0], sizes = [1, 256], strides = [1, 1]} : vector<2x256xf32> to vector<1x256xf32>
    %572 = vector.broadcast %569 : f32 to vector<1x256xf32>
    %573 = arith.mulf %572, %571 : vector<1x256xf32>
    %574 = arith.addf %563, %573 : vector<1x256xf32>
    %575 = vector.extract_strided_slice %568 {offsets = [1, 0], sizes = [1, 256], strides = [1, 1]} : vector<2x256xf32> to vector<1x256xf32>
    %576 = vector.broadcast %570 : f32 to vector<1x256xf32>
    %577 = arith.mulf %576, %575 : vector<1x256xf32>
    %578 = arith.addf %567, %577 : vector<1x256xf32>
    %c0_134 = arith.constant 0 : index
    %c85_135 = arith.constant 85 : index
    %579 = vector.load %arg6[%c0_134, %c85_135] : memref<2x358xf32, #tpu.memory_space<vmem>>, vector<2x256xf32>
    %c40 = arith.constant 40 : index
    %580 = memref.load %arg4[%c40] : memref<98xf32, #tpu.memory_space<smem>>
    %c89 = arith.constant 89 : index
    %581 = memref.load %arg4[%c89] : memref<98xf32, #tpu.memory_space<smem>>
    %582 = vector.extract_strided_slice %579 {offsets = [0, 0], sizes = [1, 256], strides = [1, 1]} : vector<2x256xf32> to vector<1x256xf32>
    %583 = vector.broadcast %580 : f32 to vector<1x256xf32>
    %584 = arith.mulf %583, %582 : vector<1x256xf32>
    %585 = arith.addf %574, %584 : vector<1x256xf32>
    %586 = vector.extract_strided_slice %579 {offsets = [1, 0], sizes = [1, 256], strides = [1, 1]} : vector<2x256xf32> to vector<1x256xf32>
    %587 = vector.broadcast %581 : f32 to vector<1x256xf32>
    %588 = arith.mulf %587, %586 : vector<1x256xf32>
    %589 = arith.addf %578, %588 : vector<1x256xf32>
    %c0_136 = arith.constant 0 : index
    %c101 = arith.constant 101 : index
    %590 = vector.load %arg6[%c0_136, %c101] : memref<2x358xf32, #tpu.memory_space<vmem>>, vector<2x256xf32>
    %c47 = arith.constant 47 : index
    %591 = memref.load %arg4[%c47] : memref<98xf32, #tpu.memory_space<smem>>
    %c96_137 = arith.constant 96 : index
    %592 = memref.load %arg4[%c96_137] : memref<98xf32, #tpu.memory_space<smem>>
    %593 = vector.extract_strided_slice %590 {offsets = [0, 0], sizes = [1, 256], strides = [1, 1]} : vector<2x256xf32> to vector<1x256xf32>
    %594 = vector.broadcast %591 : f32 to vector<1x256xf32>
    %595 = arith.mulf %594, %593 : vector<1x256xf32>
    %596 = arith.addf %585, %595 : vector<1x256xf32>
    %597 = vector.extract_strided_slice %590 {offsets = [1, 0], sizes = [1, 256], strides = [1, 1]} : vector<2x256xf32> to vector<1x256xf32>
    %598 = vector.broadcast %592 : f32 to vector<1x256xf32>
    %599 = arith.mulf %598, %597 : vector<1x256xf32>
    %600 = arith.addf %589, %599 : vector<1x256xf32>
    %601 = arith.addf %596, %600 : vector<1x256xf32>
    %cst_138 = arith.constant 0.000000e+00 : f32
    %602 = vector.broadcast %cst_138 : f32 to vector<1x256xf32>
    %603 = arith.select %521, %601, %602 : vector<1x256xi1>, vector<1x256xf32>
    %604 = arith.addf %512, %603 : vector<1x256xf32>
    %c3_i32 = arith.constant 3 : i32
    %605 = vector.broadcast %c3_i32 : i32 to vector<1x256xi32>
    %606 = arith.addi %51, %605 : vector<1x256xi32>
    %c0_i32_139 = arith.constant 0 : i32
    %607 = vector.broadcast %c0_i32_139 : i32 to vector<1x256xi32>
    %608 = arith.cmpi sge, %606, %607 : vector<1x256xi32>
    %c3_i32_140 = arith.constant 3 : i32
    %609 = vector.broadcast %c3_i32_140 : i32 to vector<1x256xi32>
    %610 = arith.addi %51, %609 : vector<1x256xi32>
    %c16_i32_141 = arith.constant 16 : i32
    %611 = vector.broadcast %c16_i32_141 : i32 to vector<1x256xi32>
    %612 = arith.cmpi slt, %610, %611 : vector<1x256xi32>
    %613 = arith.andi %608, %612 : vector<1x256xi1>
    %cst_142 = arith.constant 0.000000e+00 : f32
    %614 = vector.broadcast %cst_142 : f32 to vector<1x256xf32>
    %cst_143 = arith.constant 0.000000e+00 : f32
    %615 = vector.broadcast %cst_143 : f32 to vector<1x256xf32>
    %c0_144 = arith.constant 0 : index
    %c6 = arith.constant 6 : index
    %616 = vector.load %arg6[%c0_144, %c6] : memref<2x358xf32, #tpu.memory_space<vmem>>, vector<2x256xf32>
    %c6_145 = arith.constant 6 : index
    %617 = memref.load %arg4[%c6_145] : memref<98xf32, #tpu.memory_space<smem>>
    %c55 = arith.constant 55 : index
    %618 = memref.load %arg4[%c55] : memref<98xf32, #tpu.memory_space<smem>>
    %619 = vector.extract_strided_slice %616 {offsets = [0, 0], sizes = [1, 256], strides = [1, 1]} : vector<2x256xf32> to vector<1x256xf32>
    %620 = vector.broadcast %617 : f32 to vector<1x256xf32>
    %621 = arith.mulf %620, %619 : vector<1x256xf32>
    %622 = arith.addf %614, %621 : vector<1x256xf32>
    %623 = vector.extract_strided_slice %616 {offsets = [1, 0], sizes = [1, 256], strides = [1, 1]} : vector<2x256xf32> to vector<1x256xf32>
    %624 = vector.broadcast %618 : f32 to vector<1x256xf32>
    %625 = arith.mulf %624, %623 : vector<1x256xf32>
    %626 = arith.addf %615, %625 : vector<1x256xf32>
    %c0_146 = arith.constant 0 : index
    %c22_147 = arith.constant 22 : index
    %627 = vector.load %arg6[%c0_146, %c22_147] : memref<2x358xf32, #tpu.memory_space<vmem>>, vector<2x256xf32>
    %c13 = arith.constant 13 : index
    %628 = memref.load %arg4[%c13] : memref<98xf32, #tpu.memory_space<smem>>
    %c62 = arith.constant 62 : index
    %629 = memref.load %arg4[%c62] : memref<98xf32, #tpu.memory_space<smem>>
    %630 = vector.extract_strided_slice %627 {offsets = [0, 0], sizes = [1, 256], strides = [1, 1]} : vector<2x256xf32> to vector<1x256xf32>
    %631 = vector.broadcast %628 : f32 to vector<1x256xf32>
    %632 = arith.mulf %631, %630 : vector<1x256xf32>
    %633 = arith.addf %622, %632 : vector<1x256xf32>
    %634 = vector.extract_strided_slice %627 {offsets = [1, 0], sizes = [1, 256], strides = [1, 1]} : vector<2x256xf32> to vector<1x256xf32>
    %635 = vector.broadcast %629 : f32 to vector<1x256xf32>
    %636 = arith.mulf %635, %634 : vector<1x256xf32>
    %637 = arith.addf %626, %636 : vector<1x256xf32>
    %c0_148 = arith.constant 0 : index
    %c38_149 = arith.constant 38 : index
    %638 = vector.load %arg6[%c0_148, %c38_149] : memref<2x358xf32, #tpu.memory_space<vmem>>, vector<2x256xf32>
    %c20_150 = arith.constant 20 : index
    %639 = memref.load %arg4[%c20_150] : memref<98xf32, #tpu.memory_space<smem>>
    %c69_151 = arith.constant 69 : index
    %640 = memref.load %arg4[%c69_151] : memref<98xf32, #tpu.memory_space<smem>>
    %641 = vector.extract_strided_slice %638 {offsets = [0, 0], sizes = [1, 256], strides = [1, 1]} : vector<2x256xf32> to vector<1x256xf32>
    %642 = vector.broadcast %639 : f32 to vector<1x256xf32>
    %643 = arith.mulf %642, %641 : vector<1x256xf32>
    %644 = arith.addf %633, %643 : vector<1x256xf32>
    %645 = vector.extract_strided_slice %638 {offsets = [1, 0], sizes = [1, 256], strides = [1, 1]} : vector<2x256xf32> to vector<1x256xf32>
    %646 = vector.broadcast %640 : f32 to vector<1x256xf32>
    %647 = arith.mulf %646, %645 : vector<1x256xf32>
    %648 = arith.addf %637, %647 : vector<1x256xf32>
    %c0_152 = arith.constant 0 : index
    %c54_153 = arith.constant 54 : index
    %649 = vector.load %arg6[%c0_152, %c54_153] : memref<2x358xf32, #tpu.memory_space<vmem>>, vector<2x256xf32>
    %c27 = arith.constant 27 : index
    %650 = memref.load %arg4[%c27] : memref<98xf32, #tpu.memory_space<smem>>
    %c76 = arith.constant 76 : index
    %651 = memref.load %arg4[%c76] : memref<98xf32, #tpu.memory_space<smem>>
    %652 = vector.extract_strided_slice %649 {offsets = [0, 0], sizes = [1, 256], strides = [1, 1]} : vector<2x256xf32> to vector<1x256xf32>
    %653 = vector.broadcast %650 : f32 to vector<1x256xf32>
    %654 = arith.mulf %653, %652 : vector<1x256xf32>
    %655 = arith.addf %644, %654 : vector<1x256xf32>
    %656 = vector.extract_strided_slice %649 {offsets = [1, 0], sizes = [1, 256], strides = [1, 1]} : vector<2x256xf32> to vector<1x256xf32>
    %657 = vector.broadcast %651 : f32 to vector<1x256xf32>
    %658 = arith.mulf %657, %656 : vector<1x256xf32>
    %659 = arith.addf %648, %658 : vector<1x256xf32>
    %c0_154 = arith.constant 0 : index
    %c70_155 = arith.constant 70 : index
    %660 = vector.load %arg6[%c0_154, %c70_155] : memref<2x358xf32, #tpu.memory_space<vmem>>, vector<2x256xf32>
    %c34_156 = arith.constant 34 : index
    %661 = memref.load %arg4[%c34_156] : memref<98xf32, #tpu.memory_space<smem>>
    %c83_157 = arith.constant 83 : index
    %662 = memref.load %arg4[%c83_157] : memref<98xf32, #tpu.memory_space<smem>>
    %663 = vector.extract_strided_slice %660 {offsets = [0, 0], sizes = [1, 256], strides = [1, 1]} : vector<2x256xf32> to vector<1x256xf32>
    %664 = vector.broadcast %661 : f32 to vector<1x256xf32>
    %665 = arith.mulf %664, %663 : vector<1x256xf32>
    %666 = arith.addf %655, %665 : vector<1x256xf32>
    %667 = vector.extract_strided_slice %660 {offsets = [1, 0], sizes = [1, 256], strides = [1, 1]} : vector<2x256xf32> to vector<1x256xf32>
    %668 = vector.broadcast %662 : f32 to vector<1x256xf32>
    %669 = arith.mulf %668, %667 : vector<1x256xf32>
    %670 = arith.addf %659, %669 : vector<1x256xf32>
    %c0_158 = arith.constant 0 : index
    %c86_159 = arith.constant 86 : index
    %671 = vector.load %arg6[%c0_158, %c86_159] : memref<2x358xf32, #tpu.memory_space<vmem>>, vector<2x256xf32>
    %c41 = arith.constant 41 : index
    %672 = memref.load %arg4[%c41] : memref<98xf32, #tpu.memory_space<smem>>
    %c90 = arith.constant 90 : index
    %673 = memref.load %arg4[%c90] : memref<98xf32, #tpu.memory_space<smem>>
    %674 = vector.extract_strided_slice %671 {offsets = [0, 0], sizes = [1, 256], strides = [1, 1]} : vector<2x256xf32> to vector<1x256xf32>
    %675 = vector.broadcast %672 : f32 to vector<1x256xf32>
    %676 = arith.mulf %675, %674 : vector<1x256xf32>
    %677 = arith.addf %666, %676 : vector<1x256xf32>
    %678 = vector.extract_strided_slice %671 {offsets = [1, 0], sizes = [1, 256], strides = [1, 1]} : vector<2x256xf32> to vector<1x256xf32>
    %679 = vector.broadcast %673 : f32 to vector<1x256xf32>
    %680 = arith.mulf %679, %678 : vector<1x256xf32>
    %681 = arith.addf %670, %680 : vector<1x256xf32>
    %c0_160 = arith.constant 0 : index
    %c102 = arith.constant 102 : index
    %682 = vector.load %arg6[%c0_160, %c102] : memref<2x358xf32, #tpu.memory_space<vmem>>, vector<2x256xf32>
    %c48_161 = arith.constant 48 : index
    %683 = memref.load %arg4[%c48_161] : memref<98xf32, #tpu.memory_space<smem>>
    %c97_162 = arith.constant 97 : index
    %684 = memref.load %arg4[%c97_162] : memref<98xf32, #tpu.memory_space<smem>>
    %685 = vector.extract_strided_slice %682 {offsets = [0, 0], sizes = [1, 256], strides = [1, 1]} : vector<2x256xf32> to vector<1x256xf32>
    %686 = vector.broadcast %683 : f32 to vector<1x256xf32>
    %687 = arith.mulf %686, %685 : vector<1x256xf32>
    %688 = arith.addf %677, %687 : vector<1x256xf32>
    %689 = vector.extract_strided_slice %682 {offsets = [1, 0], sizes = [1, 256], strides = [1, 1]} : vector<2x256xf32> to vector<1x256xf32>
    %690 = vector.broadcast %684 : f32 to vector<1x256xf32>
    %691 = arith.mulf %690, %689 : vector<1x256xf32>
    %692 = arith.addf %681, %691 : vector<1x256xf32>
    %693 = arith.addf %688, %692 : vector<1x256xf32>
    %cst_163 = arith.constant 0.000000e+00 : f32
    %694 = vector.broadcast %cst_163 : f32 to vector<1x256xf32>
    %695 = arith.select %613, %693, %694 : vector<1x256xi1>, vector<1x256xf32>
    %696 = arith.addf %604, %695 : vector<1x256xf32>
    %697 = arith.negf %696 : vector<1x256xf32>
    %698 = math.exp %697 : vector<1x256xf32>
    %cst_164 = arith.constant 1.000000e+00 : f32
    %699 = vector.broadcast %cst_164 : f32 to vector<1x256xf32>
    %700 = arith.addf %699, %698 : vector<1x256xf32>
    %701 = arith.divf %699, %700 : vector<1x256xf32>
    %702 = vector.broadcast %701 : vector<1x256xf32> to vector<32x256xf32>
    %703 = arith.mulf %702, %24 : vector<32x256xf32>
    %c0_165 = arith.constant 0 : index
    %c0_166 = arith.constant 0 : index
    %c0_167 = arith.constant 0 : index
    %704 = vector.load %arg5[%c0_165, %c0_166, %c0_167] : memref<1x32x256xf32, #tpu.memory_space<vmem>>, vector<1x32x256xf32>
    %705 = vector.shape_cast %704 : vector<1x32x256xf32> to vector<32x256xf32>
    %706 = vector.shape_cast %703 : vector<32x256xf32> to vector<1x32x256xf32>
    tpu.vector_store %arg5[%c0_165, %c0_166, %c0_167], %706 {strides = array<i32>} : memref<1x32x256xf32, #tpu.memory_space<vmem>>, vector<1x32x256xf32>,
    return
  }
  func.func @transform_0(%arg0: i32) -> (i32, i32, i32) {
    %c0_i32 = arith.constant 0 : i32
    %c0_i32_0 = arith.constant 0 : i32
    %c0_i32_1 = arith.constant 0 : i32
    return %arg0, %c0_i32, %c0_i32_0 : i32, i32, i32
  }
  func.func @transform_1(%arg0: i32) -> (i32, i32) {
    %c0_i32 = arith.constant 0 : i32
    %c0_i32_0 = arith.constant 0 : i32
    %c0_i32_1 = arith.constant 0 : i32
    return %c0_i32, %c0_i32_0 : i32, i32
  }
  func.func @transform_2(%arg0: i32) -> (i32, i32) {
    %c0_i32 = arith.constant 0 : i32
    %c0_i32_0 = arith.constant 0 : i32
    %c0_i32_1 = arith.constant 0 : i32
    return %c0_i32, %c0_i32_0 : i32, i32
  }
  func.func @transform_3(%arg0: i32) -> i32 {
    %c0_i32 = arith.constant 0 : i32
    %c0_i32_0 = arith.constant 0 : i32
    return %c0_i32 : i32
  }
  func.func @transform_4(%arg0: i32) -> (i32, i32, i32) {
    %c0_i32 = arith.constant 0 : i32
    %c0_i32_0 = arith.constant 0 : i32
    %c0_i32_1 = arith.constant 0 : i32
    return %arg0, %c0_i32, %c0_i32_0 : i32, i32, i32
  }
}

</mosaic_0001>

<bundles_post_ra>
// kernel: tpu_custom_call.1
= control target key start
LH: loop header
LB: loop body
LE: loop exit
PB: predicated region body
PF: predicated region fallthrough
CT: control target
= control target key end

     0   :  { %9 = vsyncpa [#allocation4], 0  ;;  %s3271_s0 = inlined_call_operand.hbm [shape: f32[2,32,256], index: 0, kind: input, shape index: {}]   ;;  %s3272_s1 = inlined_call_operand.vmem [shape: f32[2,32], index: 1, kind: input, shape index: {}]   ;;  %s3273_s2 = inlined_call_operand.vmem [shape: f32[32,2], index: 2, kind: input, shape index: {}]   ;;  %s3274_s3 = inlined_call_operand.vmem [shape: f32[98], index: 3, kind: input, shape index: {}]   ;;  %s3275_s4 = inlined_call_operand.hbm [shape: f32[2,32,256], index: 4, kind: output, shape index: {}]  }
   0x1   :  { %11 = vsyncpa [#allocation4 + $0x1], 0 }
   0x2   :  { %12 = vsyncpa [#allocation6], 0 }
   0x3   :  { %13 = vsyncpa [#allocation5], 0 }
   0x4   :  { %15 = vsyncpa [#allocation5 + $0x1], 0  ;;  %s2389_s15 = smov 0   ;;  %s2391_s16 = smov 0  }
   0x5   :  { %s2393_s17 = smov 0   ;;  %s2395_s18 = smov 0  }
   0x6 LB: > { %s2410_s19 = sadd.s32 4294967295, %s2338_s18   ;;  %s1959_s20 = sadd.s32 4294967294, %s2338_s18   ;;  %s2338_s18 = sphi %s2395_s18, %s3299_s18   ;;  %s2334_s17 = sphi %s2393_s17, %s3298_s17   ;;  %s2330_s16 = sphi %s2391_s16, %s3297_s16   ;;  %s2326_s15 = sphi %s2389_s15, %s3296_s15  }
   0x7   : > { %s2414_s21 = sadd.s32 1, %s2338_s18   ;;  %s28_s22 = sadd.s32 1, %s2334_s17 }
   0x8   : > { %s25_s23 = ssub.s32 %s2338_s18, %s2414_s21  ;;  %p35_p0 = scmp.ne.s32.totalorder %s2334_s17, %s2330_s16 }
   0x9   : > { %p26_p1 = scmp.eq.s32.totalorder %s25_s23, 0  ;;  %p36_p2 = scmp.eq.s32.totalorder %s2338_s18, 0 }
   0xa   : > { %p41_p3 = scmp.ne.s32.totalorder %s2330_s16, %s2326_s15  ;;  %p3277_p4 = scmp.eq.s32.totalorder %s2410_s19, 0 }
   0xb   : > { %s2426_s24 = scalar_select %p26_p1, %s2334_s17, %s28_s22  }
   0xc   : > { %p2428_p5 = por %p36_p2, %p35_p0  ;;  %p2434_p6 = por %p3277_p4, %p41_p3 }
   0xd   : > { %p128_p7 = scmp.eq.s32.totalorder %s2410_s19, 1  ;;  %p134_p8 = scmp.eq.s32.totalorder %s1959_s20, 1 }
   0xe   : > { %s3282_s26 = scalar_select %p2434_p6, 1, 0 }
   0xf   : > { %p1960_p9 = scmp.ge.s32.totalorder %s2338_s18, 1  ;;  %p141_p10 = scmp.lt.s32.totalorder %s2338_s18, 3 }
  0x10   : > { %p2441_p11 = por %p128_p7, %p35_p0  ;;  %p2445_p12 = por %p134_p8, %p41_p3 }
  0x11   : > { %p2449_p13 = pnand %p1960_p9, %p141_p10  ;;  %s160_s6 = sshll.u32 %s3274_s3, 4  ;;  %s161_s6 = int_to_ptr.vmem [resolvable:$true] %s160_s6 }
  0x12   : > { %s3283_s27 = scalar_select %p2441_p11, 1, 0 }
  0x13   : > { %s3284_s28 = scalar_select %p2445_p12, 1, 0 }
  0x14   : > { %s3285_s29 = scalar_select %p2449_p13, 1, 0 }
  0x15   : > { %p2130_p1 = pneg %p2449_p13  ;;  %p2143_p2 = scmp.lt.s32.totalorder %s2338_s18, 2 }
  0x16   : > { %s171_s8 = sand.u32 1, %s2334_s17   ;;  %s2227_s11 = scalar_lea.vmem %s161_s6, 16 }
  0x17   : > { %p2462_p7 = pnand %p2130_p1, %p3277_p4  ;;  %p2469_p3 = pnand %p2143_p2, %p2428_p5 }
  0x18   : > { %s1963_s10 = sshll.u32 %s171_s8, 6  ;;  %p2228_p8 = scmp.ne.s32.totalorder %s161_s6, %s2227_s11 }
  0x19   : > { %p2229_p9 = pneg %p2462_p7  ;;  %p2235_p12 = scmp.lt.s32.totalorder %s161_s6, %s161_s6 }
  0x1a   : > { %p2236_p11 = scmp.lt.s32.totalorder %s2227_s11, %s2227_s11 }
  0x1b   : > { %p2230_p10 = pnand %p2229_p9, %p2228_p8 }
  0x1c   : > { %p2237_p1 = por %p2236_p11, %p2235_p12 }
  0x1d   : > { %p2231_p0 = pneg %p2230_p10 }
  0x1f   : > { %p2238_p4 = pnand %p2237_p1, %p2231_p0 }
  0x21   : > { %2241 = shalt.err (!%p2238_p4)
}
  0x22   : > { %s2340_s12 = smov [#allocation7]   ;;  %s2091_s13 = sshll.u32 %s2338_s18, 10 }
  0x23   : > { %2133 = dma.vmem_to_smem (!%p2462_p7), %s161_s6, 16, %s2340_s12, [#allocation6]  }
  0x24   : > { %s175_s14 = scalar_lea.vmem [#allocation3], %s1963_s10  ;;  %s2481_s25 = scalar_lea.hbm %s3271_s0, %s2091_s13 }
  0x25   : > { %s182_s20 = sshll.u32 %s175_s14, 4  ;;  %s2485_s30 = scalar_lea.sflag [#allocation4], %s171_s8  ;;  %s2483_s20 = int_to_ptr.vmem [resolvable:$true] %s182_s20 }
  0x26   : > { %s2242_s5 = scalar_lea.hbm %s2481_s25, 1024  ;;  %p2244_p5 = pneg %p2469_p3 }
  0x27   : > { %p2243_p4 = scmp.ne.s32.totalorder %s2481_s25, %s2242_s5  ;;  %s2247_s10 = scalar_lea.hbm %s3271_s0, 2048 }
  0x28   : > { %p2248_p0 = scmp.lt.s32.totalorder %s2481_s25, %s3271_s0  ;;  %p2249_p2 = scmp.lt.s32.totalorder %s2247_s10, %s2242_s5 }
  0x29   : > { %p2245_p11 = pnand %p2244_p5, %p2243_p4 }
  0x2a   : > { %p2250_p7 = por %p2249_p2, %p2248_p0 }
  0x2b   : > { %p2246_p12 = pneg %p2245_p11 }
  0x2d   : > { %p2251_p8 = pnand %p2250_p7, %p2246_p12 }
  0x2f   : > { %2254 = shalt.err (!%p2251_p8)
}
  0x30   : > { %s2255_s8 = scalar_lea.vmem %s2483_s20, 1024  ;;  %s2341_s13 = smov [#allocation3]  }
  0x31   : > { %p2256_p9 = scmp.ne.s32.totalorder %s2483_s20, %s2255_s8  ;;  %s2260_s14 = sshll.u32 %s2341_s13, 4  ;;  %s2261_s14 = int_to_ptr.vmem [resolvable:$false] %s2260_s14 }
  0x32   : > { %s2262_s22 = scalar_lea.vmem %s2261_s14, 2048  ;;  %p2263_p4 = scmp.lt.s32.totalorder %s2483_s20, %s2261_s14 }
  0x33   : > { %p2258_p10 = pnand %p2256_p9, %p2244_p5  ;;  %p2264_p11 = scmp.lt.s32.totalorder %s2262_s22, %s2255_s8 }
  0x35   : > { %p2259_p1 = pneg %p2258_p10  ;;  %p2265_p6 = por %p2264_p11, %p2263_p4 }
  0x37   : > { %p2266_p13 = pnand %p2265_p6, %p2259_p1 }
  0x39   : > { %2269 = shalt.err (!%p2266_p13)
}
  0x3a   : > { %s2342_s23 = smov 256   ;;  %s2343_s5 = smov 16  }
  0x3b   : > { %2137 = dma.hbm_to_vmem [thread:$0]  (!%p2469_p3), %s2481_s25, 1024, %s2483_s20, %s2485_s30, %s2342_s23, %s2342_s23, %s2343_s5  }
  0x3c   : > { %p3288_p5 = scmp.ne.s32.totalorder %s3285_s29, 0 }
  0x3d   : > { %s2509_s6 = sand.u32 (!%p3288_p5), 1, %s2330_s16   ;;  %p3289_p6 = scmp.ne.s32.totalorder (!%p3288_p5), %s3282_s26, 0 }
  0x3e   : > { %194 = sbr.rel (%p3288_p5) target bundleno = 1513 (0x5e9), region = 36  ;;  %s3280_s7 = sshll.u32 (!%p3288_p5), %s2509_s6, 6 }
  0x3f   : > { %s197_s10 = scalar_lea.sflag (!%p3288_p5), [#allocation4], %s2509_s6  ;;  %s200_s11 = scalar_lea.vmem (!%p3288_p5), [#allocation3], %s3280_s7 }
  0x43   : > { %2313 = dma.done.wait (%p3289_p6), %s197_s10, 1024  }
  0x44   : > { %2315 = vsyncadd (%p3289_p6), %s197_s10, 4294966272  ;;  %p3290_p13 = scmp.eq.s32.totalorder %s2410_s19, 0 }
  0x46   : > { %2317 = dma.done.wait (%p3290_p13), [#allocation6], 16   ;;  %p3291_p3 = pmov %p3290_p13 }
  0x48   : > { %2319 = vsyncadd (%p3291_p3), [#allocation6], 4294967280 }
  0x49   : > { %209 = sfence }
  0x4a   : > { %v2523_v0 = vld [vmem:[%s200_s11 + $0x30] sm:$0xff]  ;;  %v2525_v1 = vld [vmem:[%s200_s11 + $0x38] sm:$0xff]  ;;  %v2527_v2 = vld [vmem:[%s200_s11 + $0x20] sm:$0xff]  ;;  %v2344_v16 = vmov 0.0   ;;  %vm2345_vm0 = vmmov 0   ;;  %vm267_vm1 = vcmask 7168  }
  0x4b   : > { %v259_v3 = vadd.f32 %v2525_v1, %v2523_v0  ;;  %v2531_v4 = vld [vmem:[%s200_s11 + $0x28] sm:$0xff]  ;;  %v247_v6 = vmax.f32 %v2523_v0, %v2525_v1  ;;  %v2539_v8 = vld [vmem:[%s200_s11 + $0x10] sm:$0xff]  ;;  %v2541_v9 = vld [vmem:[%s200_s11 + $0x18] sm:$0xff]  ;;  %2103 = vmatprep.subr.mxu0 %v2344_v16  ;;  %2111 = vmatprep.mubr.msk.f32.mxu0 %vm2345_vm0, %v2344_v16  ;;  %vm273_vm2 = vcmask 261120   ;;  %vm365_vm3 = vcmask 1041408   ;;  %s2346_s22 = smov 127  }
  0x4c   : > { %v256_v5 = vadd.f32 %v2531_v4, %v2527_v2  ;;  %v244_v7 = vmax.f32 %v2527_v2, %v2531_v4  ;;  %v253_v10 = vadd.f32 %v2541_v9, %v2539_v8  ;;  %v241_v11 = vmax.f32 %v2539_v8, %v2541_v9  ;;  %v2547_v12 = vld [vmem:[%s200_s11] sm:$0xff]  ;;  %v2549_v13 = vld [vmem:[%s200_s11 + $0x8] sm:$0xff]  ;;  %v272_v32 = vld [vmem:[%s3272_s1] sm:$0x3]  ;;  %s2349_s23 = smov 51   ;;  %s1982_s5 = sld [smem:[#allocation7 + $0x38]] }
  0x4d   : > { %260 = vadd.xlane.f32.xlu0 %v259_v3  ;;  %v250_v14 = vadd.f32 %v2549_v13, %v2547_v12  ;;  %v238_v15 = vmax.f32 %v2547_v12, %v2549_v13  ;;  %vm565_vm4 = vcmask 1043458   ;;  %vm567_vm5 = vcmask 832516   ;;  %v348_v34 = vld [vmem:[%s3273_s2] sm:$0xff]  ;;  %v349_v38 = vld [vmem:[%s3273_s2 + $0x8] sm:$0xff]  ;;  %v350_v39 = vld [vmem:[%s3273_s2 + $0x10] sm:$0xff]  ;;  %s1981_s10 = sld [smem:[#allocation7 + $0x7]] }
  0x4e   : > { %257 = vadd.xlane.f32.xlu1 %v256_v5  ;;  %vm566_vm6 = vmor %vm565_vm4, %vm365_vm3  ;;  %vm352_vm7 = vcmask 15360   ;;  %v351_v40 = vld [vmem:[%s3273_s2 + $0x18] sm:$0xff]  ;;  %v2347_v45 = vmov 0   ;;  %vm590_vm11 = vcmask 416768   ;;  %s1984_s11 = sld [smem:[#allocation7 + $0x3f]]  ;;  %s2350_s30 = smov 112  }
  0x4f   : > { %vm568_vm8 = vmor %vm567_vm5, %vm566_vm6  ;;  %2116 = vmatprep.mubr.msk.f32.mxu1 %vm352_vm7, %v348_v34  ;;  %2200 = vset.pattern.permute.xlu1 %v2347_v45  ;;  %s1983_s26 = sld [smem:[#allocation7 + $0xe]]  ;;  %s2351_s13 = smov 96   ;;  %vm675_vm13 = vcmask 916480   ;;  %vm696_vm14 = vcmask 785408   ;;  %vm717_vm15 = vcmask 654336   ;;  %vm738_vm0 = vcmask 523264  }
  0x50   : > { %569 = vst.msk [vmem:[#allocation2] sm:$0x3f] %vm568_vm8, %v2344_v16  ;;  %2201 = vset.pattern.permute.xlu0 %v2347_v45  ;;  %s1986_s29 = sld [smem:[#allocation7 + $0x46]]  ;;  %p3293_p0 = scmp.ne.s32.totalorder %s3283_s27, 0 }
  0x51   : > { %248 = vmax.xlane.f32.xlu0 %v247_v6  ;;  %s1985_s9 = sld [smem:[#allocation7 + $0x15]] }
  0x52   : > { %245 = vmax.xlane.f32.xlu1 %v244_v7  ;;  %s1988_s20 = sld [smem:[#allocation7 + $0x4d]] }
  0x53   : > { %s1987_s25 = sld [smem:[#allocation7 + $0x1c]] }
  0x54   : > { %s1996_s12 = sld [smem:[#allocation7 + $0x8]] }
  0x55   : > { %254 = vadd.xlane.f32.xlu0 %v253_v10  ;;  %s1997_s8 = sld [smem:[#allocation7 + $0x39]] }
  0x56   : > { %242 = vmax.xlane.f32.xlu1 %v241_v11  ;;  %s2012_s14 = sld [smem:[#allocation7 + $0x3a]] }
  0x57   : > { %s2757_s7 = sld [smem:[#allocation7 + $0x27]] }
  0x59   : > { %251 = vadd.xlane.f32.xlu0 %v250_v14 }
  0x5a   : > { %239 = vmax.xlane.f32.xlu1 %v238_v15 }
  0xd6   : > { %v261_v17 = vpop.xlane.xlu0 %260 }
  0xd7   : > { %v258_v18 = vpop.xlane.xlu1 %257  ;;  %v266_v19 = vmul.f32 0.00390625, %v261_v17 }
  0xd8   : > { %v265_v20 = vmul.f32 0.00390625, %v258_v18 }
  0xda   : > { %v249_v21 = vpop.xlane.xlu0 %248 }
  0xdb   : > { %v246_v22 = vpop.xlane.xlu1 %245  ;;  %v271_v23 = vsel %vm267_vm1, %v249_v21, %v266_v19 }
  0xdc   : > { %2104 = vmatpush3.msra.mxu0 %v271_v23  ;;  %v270_v24 = vsel %vm267_vm1, %v246_v22, %v265_v20 }
  0xdd   : > { %2105 = vmatprep.subr.mxu0 %v2344_v16 }
  0xde   : > { %2106 = vmatpush3.msra.mxu0 %v270_v24  ;;  %v255_v25 = vpop.xlane.xlu0 %254 }
  0xdf   : > { %v264_v26 = vmul.f32 0.00390625, %v255_v25  ;;  %v243_v27 = vpop.xlane.xlu1 %242  ;;  %2107 = vmatprep.subr.mxu0 %v2344_v16 }
  0xe1   : > { %v269_v28 = vsel %vm267_vm1, %v243_v27, %v264_v26 }
  0xe2   : > { %2108 = vmatpush3.msra.mxu0 %v269_v28  ;;  %v252_v29 = vpop.xlane.xlu0 %251 }
  0xe3   : > { %v263_v30 = vmul.f32 0.00390625, %v252_v29  ;;  %v240_v31 = vpop.xlane.xlu1 %239  ;;  %2109 = vmatprep.subr.mxu0 %v2344_v16 }
  0xe5   : > { %v268_v33 = vsel %vm267_vm1, %v240_v31, %v263_v30  ;;  %vm759_vm1 = vcmask 392192  }
  0xe6   : > { %2110 = vmatpush3.msra.mxu0 %v268_v33 }
  0xe7   : > { %2112 = vmatmul.mubr.msk.f32.vlgmr.msra.gmra.mxu0 %vm273_vm2, %v272_v32 }
 0x1a7   : > { %v343_v35 = vpop.f32.mrf.mxu0 }
 0x1a8   : > { %v347_v36 = vmax.f32 %v343_v35, 0.0 }
 0x1a9   : > { %v2113_v37 = vpop.f32.mrf.mxu0 }
 0x1aa   : > { %2114 = vmatprep.subr.msk.mxu1 %vm365_vm3, %v347_v36 }
 0x1ab   : > { %2115 = vmatpush3.msk.msra.mxu1 %vm365_vm3, %v347_v36  ;;  %v2348_v36 = vmov 1966171168   ;;  %vm1141_vm3 = vcmask 1031168  }
 0x1ac   : > { %2117 = vmatmul.mubr.msk.f32.vlgmr.msra.gmra.mxu1 %vm352_vm7, %v349_v38  ;;  %v574_v37 = vunpack.c.l.s4 %v2348_v36  ;;  %v576_v38 = vlaneseq  ;;  %v839_v36 = vstv %s1997_s8  ;;  %s2003_s8 = sld [smem:[#allocation7 + $0x4e]] }
 0x1ad   : > { %2119 = vmatprep.mubr.msk.f32.mxu1 %vm352_vm7, %v350_v39 }
 0x1ae   : > { %vm594_vm9 = vcmp.ge.s32.totalorder %v576_v38, 51  ;;  %vm595_vm10 = vcmp.lt.s32.totalorder %v576_v38, 307 }
 0x1af   : > { %vm596_vm12 = vmand %vm594_vm9, %vm595_vm10  ;;  %vm1477_vm10 = vcmask 1014784  }
 0x1b0   : > { %2120 = vmatmul.mubr.msk.f32.gmra.mxu1 %vm352_vm7, %v351_v40 }
 0x26c   : > { %v2118_v41 = vpop.f32.mrf.mxu1 }
 0x26d   : > { %460 = vrot.lane.b32.xlu1 %v2118_v41, %s2346_s22 }
 0x26e   : > { %v435_v42 = vpop.f32.mrf.mxu1 }
 0x26f   : > { %458 = vrot.lane.b32.xlu0 %v435_v42, %s2346_s22 }
 0x270   : > { %v2121_v43 = vpop.f32.mrf.mxu1 }
 0x272   : > { %v445_v44 = vpop.f32.mrf.mxu1 }
 0x273   : > { %462 = vrot.lane.b32.xlu1 %v445_v44, %s2346_s22 }
 0x277   : > { %464 = vrot.lane.b32.xlu1 %v2121_v43, %s2346_s22 }
 0x2df   : > { %v461_v46 = vpop.permute.xlu1 %460 }
 0x2e0   : > { %v471_v47 = vadd.f32 %v2118_v41, %v461_v46 }
 0x2e1   : > { %v459_v48 = vpop.permute.xlu0 %458 }
 0x2e2   : > { %v1977_v49 = vmul.f32 -1.442695, %v471_v47  ;;  %v470_v50 = vadd.f32 %v459_v48, %v435_v42  ;;  %v575_v47 = vunpack.c.0.s8 %v574_v37  ;;  %v2620_v48 = vshrl.u32 %v576_v38, 7 }
 0x2e4   : > { %2202 = vpow2.f32 %v1977_v49  ;;  %v1976_v51 = vmul.f32 -1.442695, %v470_v50 }
 0x2e5   : > { %v463_v52 = vpop.permute.xlu1 %462 }
 0x2e6   : > { %2204 = vpow2.f32 %v1976_v51  ;;  %v472_v53 = vadd.f32 %v463_v52, %v445_v44 }
 0x2e8   : > { %v1978_v54 = vmul.f32 -1.442695, %v472_v53 }
 0x2e9   : > { %v465_v55 = vpop.permute.xlu1 %464 }
 0x2ea   : > { %2206 = vpow2.f32 %v1978_v54  ;;  %v473_v56 = vadd.f32 %v2121_v43, %v465_v55 }
 0x2ec   : > { %v1979_v57 = vmul.f32 -1.442695, %v473_v56 }
 0x2ee   : > { %2208 = vpow2.f32 %v1979_v57  ;;  %v578_v57 = vsub.s32 %v575_v47, %v2620_v48 }
 0x2f1   : > { %v2203_v58 = vpop.eup %2202 }
 0x2f2   : > { %v487_v59 = vadd.f32 1.0, %v2203_v58 }
 0x2f3   : > { %v2205_v60 = vpop.eup %2204 }
 0x2f4   : > { %2210 = vrcp.f32 %v487_v59  ;;  %v486_v61 = vadd.f32 1.0, %v2205_v60 }
 0x2f6   : > { %2212 = vrcp.f32 %v486_v61 }
 0x2f7   : > { %v2207_v62 = vpop.eup %2206 }
 0x2f8   : > { %v488_v63 = vadd.f32 1.0, %v2207_v62 }
 0x2fa   : > { %2214 = vrcp.f32 %v488_v63 }
 0x2fb   : > { %v2209_v3 = vpop.eup %2208 }
 0x2fc   : > { %v489_v5 = vadd.f32 1.0, %v2209_v3 }
 0x2fe   : > { %2216 = vrcp.f32 %v489_v5 }
 0x301   : > { %v2211_v6 = vpop.eup %2210 }
 0x302   : > { %505 = vperm.xlu1 %2200, %v2211_v6  }
 0x303   : > { %v2213_v7 = vpop.eup %2212 }
 0x304   : > { %500 = vperm.xlu0 %2201, %v2213_v7  }
 0x307   : > { %v2215_v10 = vpop.eup %2214 }
 0x308   : > { %510 = vperm.xlu1 %2200, %v2215_v10  }
 0x30b   : > { %v2217_v11 = vpop.eup %2216 }
 0x30c   : > { %515 = vperm.xlu0 %2201, %v2217_v11  }
 0x37d   : > { %v506_v14 = vpop.permute.xlu1 %505 }
 0x37e   : > { %v2586_v19 = vmul.f32 %v506_v14, %v2539_v8  ;;  %v2589_v20 = vmul.f32 %v506_v14, %v2541_v9 }
 0x37f   : > { %v501_v15 = vpop.permute.xlu0 %500 }
 0x380   : > { %v2580_v16 = vmul.f32 %v501_v15, %v2547_v12  ;;  %v2583_v17 = vmul.f32 %v501_v15, %v2549_v13 }
 0x382   : > { %v544_v12 = vadd.f32 %v2586_v19, %v2580_v16  ;;  %v553_v13 = vadd.f32 %v2589_v20, %v2583_v17 }
 0x383   : > { %v511_v18 = vpop.permute.xlu1 %510 }
 0x384   : > { %v2592_v21 = vmul.f32 %v511_v18, %v2527_v2  ;;  %v2595_v22 = vmul.f32 %v511_v18, %v2531_v4 }
 0x386   : > { %v545_v24 = vadd.f32 %v544_v12, %v2592_v21  ;;  %v554_v8 = vadd.f32 %v553_v13, %v2595_v22  ;;  %v526_v4 = vmax.f32 %v2580_v16, %v2592_v21  ;;  %v535_v25 = vmax.f32 %v2583_v17, %v2595_v22 }
 0x387   : > { %v516_v23 = vpop.permute.xlu0 %515  ;;  %v679_v13 = vstv %s1982_s5  ;;  %s2352_s5 = smov 80  }
 0x388   : > { %v2604_v9 = vmul.f32 %v516_v23, %v2523_v0  ;;  %v2607_v2 = vmul.f32 %v516_v23, %v2525_v1  ;;  %v669_v23 = vstv %s1981_s10  ;;  %s2001_s10 = sld [smem:[#allocation7 + $0x47]] }
 0x38a   : > { %v527_v26 = vmax.f32 %v2586_v19, %v2604_v9  ;;  %v536_v27 = vmax.f32 %v2589_v20, %v2607_v2  ;;  %v546_v28 = vadd.f32 %v545_v24, %v2604_v9  ;;  %v555_v0 = vadd.f32 %v554_v8, %v2607_v2 }
 0x38c   : > { %v528_v29 = vmax.f32 %v526_v4, %v527_v26  ;;  %v537_v30 = vmax.f32 %v535_v25, %v536_v27  ;;  %v547_v1 = vrot.slane %v546_v28, 4  ;;  %v556_v31 = vrot.slane %v555_v0, 4 }
 0x38d   : > { %v700_v25 = vstv %s1984_s11  ;;  %v690_v26 = vstv %s1983_s26  ;;  %s1998_s11 = sld [smem:[#allocation7 + $0xf]]  ;;  %s2353_s26 = smov 64  }
 0x38e   : > { %v529_v32 = vrot.slane %v528_v29, 4  ;;  %v538_v33 = vrot.slane %v537_v30, 4  ;;  %v548_v34 = vadd.f32 %v547_v1, %v546_v28  ;;  %v557_v35 = vadd.f32 %v556_v31, %v555_v0 }
 0x38f   : > { %v721_v0 = vstv %s1986_s29  ;;  %v742_v31 = vstv %s1988_s20  ;;  %s2014_s29 = sld [smem:[#allocation7 + $0x41]] }
 0x390   : > { %v530_v39 = vmax.f32 %v528_v29, %v529_v32  ;;  %v539_v40 = vmax.f32 %v537_v30, %v538_v33  ;;  %v549_v41 = vrot.slane %v548_v34, 2  ;;  %v558_v42 = vrot.slane %v557_v35, 2  ;;  %s2000_s20 = sld [smem:[#allocation7 + $0x16]] }
 0x391   : > { %v711_v29 = vstv %s1985_s9  ;;  %v732_v32 = vstv %s1987_s25  ;;  %s2011_s9 = sld [smem:[#allocation7 + $0x9]] }
 0x392   : > { %v550_v43 = vadd.f32 %v549_v41, %v548_v34  ;;  %v559_v44 = vadd.f32 %v558_v42, %v557_v35  ;;  %v531_v45 = vrot.slane %v530_v39, 2  ;;  %v540_v46 = vrot.slane %v539_v40, 2  ;;  %s2027_s25 = sld [smem:[#allocation7 + $0x3b]] }
 0x393   : > { %v830_v35 = vstv %s1996_s12  ;;  %s2013_s12 = sld [smem:[#allocation7 + $0x10]] }
 0x394   : > { %v551_v49 = vrot.slane %v550_v43, 1  ;;  %v560_v50 = vrot.slane %v559_v44, 1  ;;  %v532_v51 = vmax.f32 %v530_v39, %v531_v45  ;;  %v541_v52 = vmax.f32 %v539_v40, %v540_v46 }
 0x395   : > { %v1008_v40 = vstv %s2012_s14  ;;  %v850_v45 = vstv %s1998_s11  ;;  %s2042_s14 = sld [smem:[#allocation7 + $0x3c]] }
 0x396   : > { %v552_v53 = vadd.f32 %v551_v49, %v550_v43  ;;  %v561_v54 = vadd.f32 %v560_v50, %v559_v44  ;;  %v533_v55 = vrot.slane %v532_v51, 1  ;;  %v542_v56 = vrot.slane %v541_v52, 1  ;;  %s2026_s11 = sld [smem:[#allocation7 + $0xa]] }
 0x397   : > { %v879_v44 = vstv %s2001_s10  ;;  %v1028_v49 = vstv %s2014_s29  ;;  %v999_v50 = vstv %s2011_s9  ;;  %s2029_s10 = sld [smem:[#allocation7 + $0x42]] }
 0x398   : > { %v563_v58 = vmul.f32 0.03125, %v552_v53  ;;  %v564_v59 = vmul.f32 0.03125, %v561_v54  ;;  %v534_v60 = vmax.f32 %v532_v51, %v533_v55  ;;  %v543_v61 = vmax.f32 %v541_v52, %v542_v56  ;;  %s2005_s29 = sld [smem:[#allocation7 + $0x55]] }
 0x399   : > { %v870_v53 = vstv %s2000_s20  ;;  %v1175_v54 = vstv %s2027_s25  ;;  %s2002_s9 = sld [smem:[#allocation7 + $0x1d]] }
 0x39a   : > { %v600_v62 = vcombine.low %v563_v58, %v564_v59  ;;  %v572_v63 = vcombine.low %v534_v60, %v543_v61  ;;  %v899_v58 = vstv %s2003_s8  ;;  %s2018_s20 = sld [smem:[#allocation7 + $0x4f]] }
 0x39b   : > { %v1344_v61 = vstv %s2042_s14  ;;  %s2015_s25 = sld [smem:[#allocation7 + $0x17]] }
 0x39c   : > { %v607_v3 = vrot.slane %v600_v62, %v578_v57  ;;  %v579_v5 = vrot.slane %v572_v63, %v578_v57  ;;  %s2041_s8 = sld [smem:[#allocation7 + $0xb]] }
 0x39d   : > { %s2028_s14 = sld [smem:[#allocation7 + $0x11]] }
 0x39e   : > { %v614_v6 = vrot.slane %v607_v3, %v578_v57  ;;  %v586_v7 = vrot.slane %v579_v5, %v578_v57  ;;  %v1019_v57 = vstv %s2013_s12  ;;  %v1195_v5 = vstv %s2029_s10  ;;  %s2044_s12 = sld [smem:[#allocation7 + $0x43]]  ;;  %s2354_s10 = smov 48  }
 0x3a0   : > { %615 = vrot.lane.b32.xlu0 %v614_v6, %s2349_s23  ;;  %587 = vrot.lane.b32.xlu1 %v586_v7, %s2349_s23  ;;  %s1999_s23 = sld [smem:[#allocation7 + $0x40]]  ;;  %v1166_v6 = vstv %s2026_s11 }
 0x3a1   : > { %s2004_s11 = sld [smem:[#allocation7 + $0x24]] }
 0x3a6   : > { %v859_v41 = vstv %s1999_s23  ;;  %s2016_s23 = sld [smem:[#allocation7 + $0x48]] }
 0x3ac   : > { %v1048_v62 = vstv %s2016_s23  ;;  %s2057_s23 = sld [smem:[#allocation7 + $0x3d]] }
 0x412   : > { %v616_v10 = vpop.permute.xlu0 %615  ;;  %v588_v11 = vpop.permute.xlu1 %587 }
 0x413   : > { %v617_v14 = vrot.slane %v616_v10, 7  ;;  %v589_v15 = vrot.slane %v588_v11, 7 }
 0x415   : > { %v618_v18 = vsel %vm590_vm11, %v617_v14, %v616_v10  ;;  %v591_v12 = vsel %vm590_vm11, %v589_v15, %v588_v11  ;;  %v919_v11 = vstv %s2005_s29  ;;  %v890_v14 = vstv %s2002_s9  ;;  %s2031_s29 = sld [smem:[#allocation7 + $0x49]] }
 0x416   : > { %621 = vst.msk [vmem:[#allocation2 + $0x1] ss:$2 sm:$0x7] %vm596_vm12, %v618_v18  ;;  %597 = vst.msk [vmem:[#allocation2] ss:$2 sm:$0x7] %vm596_vm12, %v591_v12  ;;  %v1068_v12 = vstv %s2018_s20 }
 0x417   : > { %s2017_s9 = sld [smem:[#allocation7 + $0x1e]]  ;;  %vm1308_vm11 = vcmask 1022976  }
 0x418   : > { %s2007_s20 = sld [smem:[#allocation7 + $0x5c]] }
 0x41d   : > { %v2625_v24 = vld [vmem:[#allocation2] sm:$0x3f] }
 0x41e   : > { %v680_v8 = vmul.f32 %v679_v13, %v2625_v24  ;;  %v670_v4 = vmul.f32 %v669_v23, %v2625_v24  ;;  %v701_v27 = vmul.f32 %v700_v25, %v2625_v24  ;;  %v691_v28 = vmul.f32 %v690_v26, %v2625_v24 }
 0x41f   : > { %v722_v30 = vmul.f32 %v721_v0, %v2625_v24  ;;  %v712_v1 = vmul.f32 %v711_v29, %v2625_v24  ;;  %v743_v33 = vmul.f32 %v742_v31, %v2625_v24  ;;  %v733_v34 = vmul.f32 %v732_v32, %v2625_v24 }
 0x420   : > { %682 = vrot.lane.b32.xlu0 %v680_v8, %s2350_s30  ;;  %672 = vrot.lane.b32.xlu1 %v670_v4, %s2350_s30  ;;  %v831_v37 = vmul.f32 %v830_v35, %v2625_v24  ;;  %v840_v39 = vmul.f32 %v839_v36, %v2625_v24  ;;  %v1009_v42 = vmul.f32 %v1008_v40, %v2625_v24  ;;  %v1039_v13 = vstv %s2015_s25  ;;  %s2043_s25 = sld [smem:[#allocation7 + $0x12]] }
 0x421   : > { %v860_v43 = vmul.f32 %v859_v41, %v2625_v24  ;;  %v880_v46 = vmul.f32 %v879_v44, %v2625_v24  ;;  %v851_v47 = vmul.f32 %v850_v45, %v2625_v24  ;;  %v1029_v51 = vmul.f32 %v1028_v49, %v2625_v24 }
 0x422   : > { %v1000_v52 = vmul.f32 %v999_v50, %v2625_v24  ;;  %v871_v55 = vmul.f32 %v870_v53, %v2625_v24  ;;  %v1176_v56 = vmul.f32 %v1175_v54, %v2625_v24  ;;  %v1020_v59 = vmul.f32 %v1019_v57, %v2625_v24 }
 0x423   : > { %v900_v60 = vmul.f32 %v899_v58, %v2625_v24  ;;  %v1345_v63 = vmul.f32 %v1344_v61, %v2625_v24  ;;  %v1049_v3 = vmul.f32 %v1048_v62, %v2625_v24  ;;  %v1196_v7 = vmul.f32 %v1195_v5, %v2625_v24 }
 0x424   : > { %703 = vrot.lane.b32.xlu0 %v701_v27, %s2351_s13  ;;  %693 = vrot.lane.b32.xlu1 %v691_v28, %s2351_s13  ;;  %v1167_v10 = vmul.f32 %v1166_v6, %v2625_v24  ;;  %v920_v15 = vmul.f32 %v919_v11, %v2625_v24  ;;  %v891_v18 = vmul.f32 %v890_v14, %v2625_v24  ;;  %v1364_v4 = vstv %s2044_s12  ;;  %s2020_s12 = sld [smem:[#allocation7 + $0x56]] }
 0x425   : > { %v1069_v23 = vmul.f32 %v1068_v12, %v2625_v24  ;;  %v1040_v8 = vmul.f32 %v1039_v13, %v2625_v24  ;;  %v1335_v25 = vstv %s2041_s8  ;;  %v1365_v26 = vmul.f32 %v1364_v4, %v2625_v24  ;;  %s2056_s8 = sld [smem:[#allocation7 + $0xc]] }
 0x426   : > { %v1336_v27 = vmul.f32 %v1335_v25, %v2625_v24  ;;  %v1186_v28 = vstv %s2028_s14  ;;  %v1513_v0 = vstv %s2057_s23  ;;  %v1215_v31 = vstv %s2031_s29  ;;  %s2046_s14 = sld [smem:[#allocation7 + $0x4a]]  ;;  %s2355_s29 = smov 32  }
 0x427   : > { %v1187_v29 = vmul.f32 %v1186_v28, %v2625_v24  ;;  %v939_v35 = vstv %s2007_s20  ;;  %s2072_s23 = sld [smem:[#allocation7 + $0x3e]] }
 0x428   : > { %724 = vrot.lane.b32.xlu0 %v722_v30, %s2352_s5  ;;  %714 = vrot.lane.b32.xlu1 %v712_v1, %s2352_s5  ;;  %v1514_v30 = vmul.f32 %v1513_v0, %v2625_v24  ;;  %v910_v1 = vstv %s2004_s11  ;;  %s2059_s11 = sld [smem:[#allocation7 + $0x44]] }
 0x429   : > { %v911_v32 = vmul.f32 %v910_v1, %v2625_v24  ;;  %s2030_s20 = sld [smem:[#allocation7 + $0x18]] }
 0x42a   : > { %v1088_v40 = vstv %s2020_s12  ;;  %s2006_s12 = sld [smem:[#allocation7 + $0x2b]] }
 0x42c   : > { %745 = vrot.lane.b32.xlu0 %v743_v33, %s2353_s26  ;;  %735 = vrot.lane.b32.xlu1 %v733_v34, %s2353_s26  ;;  %v1216_v33 = vmul.f32 %v1215_v31, %v2625_v24  ;;  %v1059_v34 = vstv %s2017_s9  ;;  %s2033_s9 = sld [smem:[#allocation7 + $0x50]]  ;;  %v1384_v44 = vstv %s2046_s14 }
 0x42d   : > { %v1060_v36 = vmul.f32 %v1059_v34, %v2625_v24  ;;  %s2022_s14 = sld [smem:[#allocation7 + $0x5d]] }
 0x42e   : > { %v1533_v49 = vstv %s2059_s11  ;;  %s2048_s11 = sld [smem:[#allocation7 + $0x51]] }
 0x42f   : > { %v1206_v53 = vstv %s2030_s20  ;;  %s2061_s20 = sld [smem:[#allocation7 + $0x4b]] }
 0x430   : > { %833 = vrot.lane.b32.xlu0 %v831_v37, %s2350_s30  ;;  %842 = vrot.lane.b32.xlu1 %v840_v39, %s2350_s30  ;;  %v940_v37 = vmul.f32 %v939_v35, %v2625_v24  ;;  %v1355_v39 = vstv %s2043_s25  ;;  %s2019_s25 = sld [smem:[#allocation7 + $0x25]]  ;;  %v930_v57 = vstv %s2006_s12 }
 0x431   : > { %v1356_v41 = vmul.f32 %v1355_v39, %v2625_v24  ;;  %s2074_s12 = sld [smem:[#allocation7 + $0x45]] }
 0x433   : > { %v1108_v61 = vstv %s2022_s14  ;;  %s2035_s14 = sld [smem:[#allocation7 + $0x57]] }
 0x434   : > { %1011 = vrot.lane.b32.xlu0 %v1009_v42, %s2350_s30  ;;  %862 = vrot.lane.b32.xlu1 %v860_v43, %s2351_s13  ;;  %v1089_v42 = vmul.f32 %v1088_v40, %v2625_v24  ;;  %v1504_v43 = vstv %s2056_s8  ;;  %s2045_s8 = sld [smem:[#allocation7 + $0x19]]  ;;  %v1404_v5 = vstv %s2048_s11 }
 0x435   : > { %v1505_v45 = vmul.f32 %v1504_v43, %v2625_v24  ;;  %v1553_v11 = vstv %s2061_s20  ;;  %s2047_s11 = sld [smem:[#allocation7 + $0x20]] }
 0x436   : > { %s2060_s20 = sld [smem:[#allocation7 + $0x1a]] }
 0x437   : > { %v1702_v12 = vstv %s2074_s12  ;;  %s2743_s12 = sld [smem:[#allocation7 + $0x31]] }
 0x438   : > { %882 = vrot.lane.b32.xlu0 %v880_v46, %s2352_s5  ;;  %853 = vrot.lane.b32.xlu1 %v851_v47, %s2351_s13  ;;  %v1385_v46 = vmul.f32 %v1384_v44, %v2625_v24  ;;  %v1682_v47 = vstv %s2072_s23  ;;  %s2058_s23 = sld [smem:[#allocation7 + $0x13]] }
 0x439   : > { %v1683_v50 = vmul.f32 %v1682_v47, %v2625_v24  ;;  %v1255_v4 = vstv %s2035_s14  ;;  %s2749_s14 = sld [smem:[#allocation7 + $0x5e]] }
 0x43b   : > { %v1395_v28 = vstv %s2047_s11  ;;  %s2755_s11 = sld [smem:[#allocation7 + $0x5f]] }
 0x43c   : > { %1031 = vrot.lane.b32.xlu0 %v1029_v51, %s2351_s13  ;;  %1002 = vrot.lane.b32.xlu1 %v1000_v52, %s2350_s30  ;;  %v1534_v51 = vmul.f32 %v1533_v49, %v2625_v24  ;;  %v1235_v52 = vstv %s2033_s9  ;;  %s2071_s9 = sld [smem:[#allocation7 + $0xd]]  ;;  %v1544_v1 = vstv %s2060_s20 }
 0x43d   : > { %v1236_v54 = vmul.f32 %v1235_v52, %v2625_v24  ;;  %v1545_v34 = vmul.f32 %v1544_v1, %v2625_v24  ;;  %s2773_s20 = sld [smem:[#allocation7 + $0x21]] }
 0x440   : > { %873 = vrot.lane.b32.xlu0 %v871_v55, %s2352_s5  ;;  %1178 = vrot.lane.b32.xlu1 %v1176_v56, %s2350_s30  ;;  %v1207_v55 = vmul.f32 %v1206_v53, %v2625_v24  ;;  %v1079_v56 = vstv %s2019_s25  ;;  %s2032_s25 = sld [smem:[#allocation7 + $0x1f]] }
 0x441   : > { %v1080_v58 = vmul.f32 %v1079_v56, %v2625_v24  ;;  %v1444_v52 = vstv %s2755_s11  ;;  %s2829_s11 = sld [smem:[#allocation7 + $0x2]] }
 0x444   : > { %1022 = vrot.lane.b32.xlu0 %v1020_v59, %s2351_s13  ;;  %902 = vrot.lane.b32.xlu1 %v900_v60, %s2353_s26  ;;  %v931_v59 = vmul.f32 %v930_v57, %v2625_v24  ;;  %v1375_v60 = vstv %s2045_s8  ;;  %s2021_s8 = sld [smem:[#allocation7 + $0x2c]] }
 0x445   : > { %v1376_v62 = vmul.f32 %v1375_v60, %v2625_v24 }
 0x448   : > { %1347 = vrot.lane.b32.xlu0 %v1345_v63, %s2350_s30  ;;  %1051 = vrot.lane.b32.xlu1 %v1049_v3, %s2352_s5  ;;  %v1109_v63 = vmul.f32 %v1108_v61, %v2625_v24  ;;  %v1524_v3 = vstv %s2058_s23  ;;  %s2050_s23 = sld [smem:[#allocation7 + $0x58]] }
 0x449   : > { %v1525_v6 = vmul.f32 %v1524_v3, %v2625_v24 }
 0x44c   : > { %1198 = vrot.lane.b32.xlu0 %v1196_v7, %s2351_s13  ;;  %1169 = vrot.lane.b32.xlu1 %v1167_v10, %s2350_s30  ;;  %v1405_v7 = vmul.f32 %v1404_v5, %v2625_v24  ;;  %v1673_v10 = vstv %s2071_s9  ;;  %s2063_s9 = sld [smem:[#allocation7 + $0x52]] }
 0x44d   : > { %v1674_v14 = vmul.f32 %v1673_v10, %v2625_v24 }
 0x450   : > { %922 = vrot.lane.b32.xlu0 %v920_v15, %s2354_s10  ;;  %893 = vrot.lane.b32.xlu1 %v891_v18, %s2353_s26  ;;  %v1554_v15 = vmul.f32 %v1553_v11, %v2625_v24  ;;  %v1226_v18 = vstv %s2032_s25  ;;  %s2737_s25 = sld [smem:[#allocation7 + $0x4c]] }
 0x451   : > { %v1227_v13 = vmul.f32 %v1226_v18, %v2625_v24 }
 0x454   : > { %1071 = vrot.lane.b32.xlu0 %v1069_v23, %s2353_s26  ;;  %1042 = vrot.lane.b32.xlu1 %v1040_v8, %s2352_s5  ;;  %v1703_v23 = vmul.f32 %v1702_v12, %v2625_v24  ;;  %v1099_v8 = vstv %s2021_s8  ;;  %s2745_s8 = sld [smem:[#allocation7]] }
 0x455   : > { %v1100_v25 = vmul.f32 %v1099_v8, %v2625_v24 }
 0x456   : > { %v1722_v35 = vstv %s2737_s25  ;;  %s2781_s25 = sld [smem:[#allocation7 + $0x1]] }
 0x457   : > { %v1723_v44 = vmul.f32 %v1722_v35, %v2625_v24 }
 0x458   : > { %1367 = vrot.lane.b32.xlu0 %v1365_v26, %s2351_s13  ;;  %1338 = vrot.lane.b32.xlu1 %v1336_v27, %s2350_s30  ;;  %v1256_v26 = vmul.f32 %v1255_v4, %v2625_v24  ;;  %v1424_v27 = vstv %s2050_s23  ;;  %s2751_s23 = sld [smem:[#allocation7 + $0x26]] }
 0x459   : > { %v1425_v0 = vmul.f32 %v1424_v27, %v2625_v24 }
 0x45c   : > { %1189 = vrot.lane.b32.xlu0 %v1187_v29, %s2351_s13  ;;  %1516 = vrot.lane.b32.xlu1 %v1514_v30, %s2350_s30  ;;  %v1396_v29 = vmul.f32 %v1395_v28, %v2625_v24  ;;  %v1573_v30 = vstv %s2063_s9  ;;  %s2769_s9 = sld [smem:[#allocation7 + $0x59]] }
 0x460   : > { %913 = vrot.lane.b32.xlu0 %v911_v32, %s2354_s10  ;;  %1218 = vrot.lane.b32.xlu1 %v1216_v33, %s2352_s5  ;;  %v1574_v33 = vmul.f32 %v1573_v30, %v2625_v24  ;;  %v822_v30 = vstv %s2781_s25  ;;  %s2847_s25 = sld [smem:[#allocation7 + $0x34]] }
 0x464   : > { %1062 = vrot.lane.b32.xlu0 %v1060_v36, %s2353_s26  ;;  %942 = vrot.lane.b32.xlu1 %v940_v37, %s2355_s29  ;;  %v663_v37 = vstv %s2743_s12  ;;  %s2799_s12 = sld [smem:[#allocation7 + $0x2e]] }
 0x468   : > { %1358 = vrot.lane.b32.xlu0 %v1356_v41, %s2351_s13  ;;  %1091 = vrot.lane.b32.xlu1 %v1089_v42, %s2354_s10  ;;  %v660_v41 = vstv %s2745_s8  ;;  %s2803_s8 = sld [smem:[#allocation7 + $0x2d]] }
 0x46c   : > { %1507 = vrot.lane.b32.xlu0 %v1505_v45, %s2350_s30  ;;  %1387 = vrot.lane.b32.xlu1 %v1385_v46, %s2352_s5  ;;  %v657_v46 = vld [vmem:[#allocation2] sm:$0xf] }
 0x46d   : > { %v664_v56 = vmul.f32 %v663_v37, %v657_v46  ;;  %v661_v57 = vmul.f32 %v660_v41, %v657_v46 }
 0x470   : > { %1685 = vrot.lane.b32.xlu0 %v1683_v50, %s2350_s30  ;;  %1536 = vrot.lane.b32.xlu1 %v1534_v51, %s2351_s13  ;;  %v1275_v50 = vstv %s2749_s14  ;;  %v1246_v51 = vstv %s2751_s23  ;;  %s2818_s14 = sld [smem:[#allocation7 + $0x60]] }
 0x471   : > { %v1276_v60 = vmul.f32 %v1275_v50, %v2625_v24  ;;  %v1247_v61 = vmul.f32 %v1246_v51, %v2625_v24  ;;  %s2822_s23 = sld [smem:[#allocation7 + $0x28]]  ;;  %v1435_v50 = vstv %s2799_s12  ;;  %v1266_v51 = vstv %s2803_s8 }
 0x472   : > { %s2878_s12 = sld [smem:[#allocation7 + $0x35]] }
 0x473   : > { %s2886_s8 = sld [smem:[#allocation7 + $0x23]] }
 0x474   : > { %1238 = vrot.lane.b32.xlu0 %v1236_v54, %s2353_s26  ;;  %1209 = vrot.lane.b32.xlu1 %v1207_v55, %s2352_s5  ;;  %v1415_v55 = vstv %s2757_s7  ;;  %s2795_s7 = sld [smem:[#allocation7 + $0x33]] }
 0x478   : > { %1082 = vrot.lane.b32.xlu0 %v1080_v58, %s2354_s10  ;;  %933 = vrot.lane.b32.xlu1 %v931_v59, %s2355_s29 }
 0x47c   : > { %1378 = vrot.lane.b32.xlu0 %v1376_v62, %s2352_s5  ;;  %1111 = vrot.lane.b32.xlu1 %v1109_v63, %s2355_s29 }
 0x480   : > { %1527 = vrot.lane.b32.xlu0 %v1525_v6, %s2351_s13  ;;  %1407 = vrot.lane.b32.xlu1 %v1405_v7, %s2353_s26 }
 0x484   : > { %1676 = vrot.lane.b32.xlu0 %v1674_v14, %s2350_s30  ;;  %1556 = vrot.lane.b32.xlu1 %v1554_v15, %s2352_s5  ;;  %s2739_s30 = sld [smem:[#allocation7 + $0x14]] }
 0x488   : > { %1229 = vrot.lane.b32.xlu0 %v1227_v13, %s2353_s26  ;;  %1705 = vrot.lane.b32.xlu1 %v1703_v23, %s2351_s13  ;;  %v1445_v13 = vmul.f32 %v1444_v52, %v2625_v24  ;;  %v1416_v23 = vmul.f32 %v1415_v55, %v2625_v24 }
 0x48a   : > { %v1693_v36 = vstv %s2739_s30  ;;  %s2785_s30 = sld [smem:[#allocation7 + $0x53]] }
 0x48b   : > { %v1694_v45 = vmul.f32 %v1693_v36, %v2625_v24 }
 0x48c   : > { %1102 = vrot.lane.b32.xlu0 %v1100_v25, %s2355_s29  ;;  %1258 = vrot.lane.b32.xlu1 %v1256_v26, %s2354_s10  ;;  %v1593_v25 = vstv %s2769_s9  ;;  %v1564_v26 = vstv %s2773_s20  ;;  %s2837_s9 = sld [smem:[#allocation7 + $0x5a]] }
 0x48d   : > { %v1565_v35 = vmul.f32 %v1564_v26, %v2625_v24  ;;  %s2841_s20 = sld [smem:[#allocation7 + $0x22]] }
 0x490   : > { %1427 = vrot.lane.b32.xlu0 %v1425_v0, %s2354_s10  ;;  %1398 = vrot.lane.b32.xlu1 %v1396_v29, %s2353_s26  ;;  %v1742_v37 = vstv %s2785_s30  ;;  %s2855_s30 = sld [smem:[#allocation7 + $0x29]] }
 0x491   : > { %v1743_v46 = vmul.f32 %v1742_v37, %v2625_v24 }
 0x492   : > { %v683_v31 = vpop.permute.xlu0 %682  ;;  %v673_v32 = vpop.permute.xlu1 %672 }
 0x493   : > { %v684_v39 = vrot.slane %v683_v31, 2  ;;  %v674_v40 = vrot.slane %v673_v32, 2 }
 0x494   : > { %1576 = vrot.lane.b32.xlu0 %v1574_v33, %s2353_s26  ;;  %1547 = vrot.lane.b32.xlu1 %v1545_v34, %s2352_s5  ;;  %v1594_v34 = vmul.f32 %v1593_v25, %v2625_v24 }
 0x495   : > { %v685_v53 = vsel %vm675_vm13, %v683_v31, %v684_v39  ;;  %v676_v54 = vsel %vm675_vm13, %v673_v32, %v674_v40  ;;  %v823_v40 = vmul.f32 %v822_v30, %v2625_v24 }
 0x496   : > { %v704_v42 = vpop.permute.xlu0 %703  ;;  %v694_v43 = vpop.permute.xlu1 %693  ;;  %v687_v6 = vadd.f32 %v685_v53, %v664_v56  ;;  %v678_v7 = vadd.f32 %v676_v54, %v661_v57  ;;  %v1436_v57 = vmul.f32 %v1435_v50, %v2625_v24 }
 0x497   : > { %v705_v47 = vrot.slane %v704_v42, 2  ;;  %v695_v49 = vrot.slane %v694_v43, 2 }
 0x498   : > { %1725 = vrot.lane.b32.xlu0 %v1723_v44, %s2352_s5  ;;  %1696 = vrot.lane.b32.xlu1 %v1694_v45, %s2351_s13  ;;  %s2789_s13 = sld [smem:[#allocation7 + $0x1b]] }
 0x499   : > { %v706_v62 = vsel %vm696_vm14, %v704_v42, %v705_v47  ;;  %v697_v63 = vsel %vm696_vm14, %v694_v43, %v695_v49  ;;  %v994_v42 = vstv %s2795_s7  ;;  %s2870_s7 = sld [smem:[#allocation7 + $0x61]] }
 0x49a   : > { %v725_v58 = vpop.permute.xlu0 %724  ;;  %v715_v59 = vpop.permute.xlu1 %714  ;;  %v708_v14 = vadd.f32 %v706_v62, %v687_v6  ;;  %v699_v15 = vadd.f32 %v697_v63, %v678_v7  ;;  %v995_v52 = vmul.f32 %v994_v42, %v2625_v24 }
 0x49b   : > { %v726_v3 = vrot.slane %v725_v58, 2  ;;  %v716_v5 = vrot.slane %v715_v59, 2 }
 0x49c   : > { %1278 = vrot.lane.b32.xlu0 %v1276_v60, %s2355_s29  ;;  %1249 = vrot.lane.b32.xlu1 %v1247_v61, %s2354_s10  ;;  %v1584_v60 = vstv %s2822_s23  ;;  %v991_v61 = vstv %s2829_s11  ;;  %s2896_s23 = sld [smem:[#allocation7 + $0x3]] }
 0x49d   : > { %v727_v10 = vsel %vm717_vm15, %v725_v58, %v726_v3  ;;  %v718_v11 = vsel %vm717_vm15, %v715_v59, %v716_v5  ;;  %v1267_v58 = vmul.f32 %v1266_v51, %v2625_v24  ;;  %v1613_v59 = vstv %s2818_s14  ;;  %s2890_s14 = sld [smem:[#allocation7 + $0x54]] }
 0x49e   : > { %v746_v18 = vpop.permute.xlu0 %745  ;;  %v736_v12 = vpop.permute.xlu1 %735  ;;  %v729_v27 = vadd.f32 %v727_v10, %v708_v14  ;;  %v720_v28 = vadd.f32 %v718_v11, %v699_v15  ;;  %v1713_v39 = vstv %s2789_s13  ;;  %v1614_v3 = vmul.f32 %v1613_v59, %v2625_v24  ;;  %s2866_s13 = sld [smem:[#allocation7 + $0x30]] }
 0x49f   : > { %v747_v8 = vrot.slane %v746_v18, 2  ;;  %v737_v4 = vrot.slane %v736_v12, 2  ;;  %v1714_v47 = vmul.f32 %v1713_v39, %v2625_v24  ;;  %v1585_v5 = vmul.f32 %v1584_v60, %v2625_v24  ;;  %s2902_s11 = sld [smem:[#allocation7 + $0x2a]] }
 0x4a0   : > { %1447 = vrot.lane.b32.xlu0 %v1445_v13, %s2355_s29  ;;  %1418 = vrot.lane.b32.xlu1 %v1416_v23, %s2354_s10  ;;  %v1762_v10 = vstv %s2837_s9  ;;  %v1733_v11 = vstv %s2841_s20  ;;  %v992_v14 = vmul.f32 %v991_v61, %v2625_v24  ;;  %s2039_s9 = sld [smem:[#allocation7 + $0x4]] }
 0x4a1   : > { %v748_v0 = vsel %vm738_vm0, %v746_v18, %v747_v8  ;;  %v739_v29 = vsel %vm738_vm0, %v736_v12, %v737_v4  ;;  %v1161_v12 = vstv %s2847_s25  ;;  %v1763_v25 = vmul.f32 %v1762_v10, %v2625_v24  ;;  %s2054_s20 = sld [smem:[#allocation7 + $0x5]] }
 0x4a2   : > { %v2810_v1 = vadd.f32 %v748_v0, %v729_v27  ;;  %v2812_v31 = vadd.f32 %v739_v29, %v720_v28  ;;  %v834_v32 = vpop.permute.xlu0 %833  ;;  %v2814_v33 = vpop.permute.xlu1 %842  ;;  %v1734_v26 = vmul.f32 %v1733_v11, %v2625_v24  ;;  %v1753_v28 = vstv %s2855_s30  ;;  %s2963_s25 = sld [smem:[#allocation7 + $0x37]] }
 0x4a3   : > { %v835_v36 = vrot.slane %v834_v32, 2  ;;  %v1162_v29 = vmul.f32 %v1161_v12, %v2625_v24  ;;  %v1158_v59 = vstv %s2896_s23  ;;  %s2069_s30 = sld [smem:[#allocation7 + $0x6]] }
 0x4a4   : > { %1596 = vrot.lane.b32.xlu0 %v1594_v34, %s2354_s10  ;;  %1567 = vrot.lane.b32.xlu1 %v1565_v35, %s2353_s26  ;;  %v1159_v11 = vmul.f32 %v1158_v59, %v2625_v24 }
 0x4a5   : > { %v836_v41 = vsel %vm675_vm13, %v834_v32, %v835_v36  ;;  %v1754_v36 = vmul.f32 %v1753_v28, %v2625_v24 }
 0x4a6   : > { %v2831_v43 = vadd.f32 %v836_v41, %v823_v40  ;;  %v1012_v44 = vpop.permute.xlu0 %1011  ;;  %v2833_v45 = vpop.permute.xlu1 %862  ;;  %v1773_v40 = vstv %s2866_s13  ;;  %v1782_v41 = vstv %s2870_s7  ;;  %s2358_s13 = smov 124   ;;  %s2359_s7 = smov 123  }
 0x4a7   : > { %v1013_v49 = vrot.slane %v1012_v44, 2  ;;  %v1774_v50 = vmul.f32 %v1773_v40, %v2625_v24  ;;  %v1783_v51 = vmul.f32 %v1782_v41, %v2625_v24 }
 0x4a8   : > { %1745 = vrot.lane.b32.xlu0 %v1743_v46, %s2353_s26  ;;  %1716 = vrot.lane.b32.xlu1 %v1714_v47, %s2352_s5  ;;  %s2859_s5 = sld [smem:[#allocation7 + $0x2f]] }
 0x4a9   : > { %v1014_v53 = vsel %vm675_vm13, %v1012_v44, %v1013_v49  ;;  %v1330_v44 = vstv %s2878_s12  ;;  %s2360_s12 = smov 122  }
 0x4aa   : > { %v1016_v54 = vadd.f32 %v1014_v53, %v995_v52  ;;  %v2849_v55 = vpop.permute.xlu0 %882  ;;  %v2851_v56 = vpop.permute.xlu1 %853  ;;  %v753_v53 = vstv %s2886_s8  ;;  %s2092_s8 = sshll.u32 %s2410_s19, 10 }
 0x4ac   : > { %1438 = vrot.lane.b32.xlu0 %v1436_v57, %s2355_s29  ;;  %1269 = vrot.lane.b32.xlu1 %v1267_v58, %s2355_s29  ;;  %v1331_v57 = vmul.f32 %v1330_v44, %v2625_v24 }
 0x4ae   : > { %v1032_v62 = vpop.permute.xlu0 %1031  ;;  %v1003_v63 = vpop.permute.xlu1 %1002  ;;  %v1604_v0 = vstv %s2859_s5  ;;  %s2357_s5 = smov 125  }
 0x4af   : > { %v1033_v6 = vrot.slane %v1032_v62, 2  ;;  %v1004_v7 = vrot.slane %v1003_v63, 2  ;;  %v1605_v37 = vmul.f32 %v1604_v0, %v2625_v24  ;;  %v1327_v0 = vstv %s2039_s9  ;;  %s3222_s9 = scalar_lea.hbm %s3275_s4, %s2092_s8 }
 0x4b0   : > { %1616 = vrot.lane.b32.xlu0 %v1614_v3, %s2355_s29  ;;  %1587 = vrot.lane.b32.xlu1 %v1585_v5, %s2354_s10 }
 0x4b1   : > { %v1034_v15 = vsel %vm696_vm14, %v1032_v62, %v1033_v6  ;;  %v1005_v18 = vsel %vm675_vm13, %v1003_v63, %v1004_v7  ;;  %v754_v63 = vmul.f32 %v753_v53, %v2625_v24  ;;  %v774_v7 = vstv %s2902_s11 }
 0x4b2   : > { %v2880_v13 = vadd.f32 %v1034_v15, %v1016_v54  ;;  %v1007_v23 = vadd.f32 %v1005_v18, %v992_v14  ;;  %v2882_v8 = vpop.permute.xlu0 %873  ;;  %v1179_v4 = vpop.permute.xlu1 %1178  ;;  %v763_v54 = vstv %s2890_s14  ;;  %s3292_s14 = sshll.u32 %s2509_s6, 6 }
 0x4b3   : > { %v1180_v27 = vrot.slane %v1179_v4, 2  ;;  %v764_v3 = vmul.f32 %v763_v54, %v2625_v24  ;;  %s229_s23 = scalar_lea.vmem [#allocation8], %s3292_s14 }
 0x4b4   : > { %1765 = vrot.lane.b32.xlu0 %v1763_v25, %s2354_s10  ;;  %1736 = vrot.lane.b32.xlu1 %v1734_v26, %s2353_s26  ;;  %s2906_s26 = sld [smem:[#allocation7 + $0x5b]]  ;;  %v775_v25 = vmul.f32 %v774_v7, %v2625_v24  ;;  %s1874_s11 = sshll.u32 %s229_s23, 4  ;;  %s3224_s11 = int_to_ptr.vmem [resolvable:$true] %s1874_s11 }
 0x4b5   : > { %v1181_v30 = vsel %vm675_vm13, %v1179_v4, %v1180_v27 }
 0x4b6   : > { %v1183_v32 = vadd.f32 %v1181_v30, %v1162_v29  ;;  %v1023_v34 = vpop.permute.xlu0 %1022  ;;  %v2898_v35 = vpop.permute.xlu1 %902 }
 0x4b7   : > { %v1024_v39 = vrot.slane %v1023_v34, 2 }
 0x4b8   : > { %1756 = vrot.lane.b32.xlu0 %v1754_v36, %s2354_s10  ;;  %1607 = vrot.lane.b32.xlu1 %v1605_v37, %s2355_s29  ;;  %v1328_v36 = vmul.f32 %v1327_v0, %v2625_v24 }
 0x4b9   : > { %v1025_v42 = vsel %vm696_vm14, %v1023_v34, %v1024_v39 }
 0x4ba   : > { %v2912_v46 = vadd.f32 %v1025_v42, %v1007_v23  ;;  %v1348_v47 = vpop.permute.xlu0 %1347  ;;  %v2914_v49 = vpop.permute.xlu1 %1051  ;;  %v783_v10 = vstv %s2906_s26 }
 0x4bb   : > { %v1349_v52 = vrot.slane %v1348_v47, 2  ;;  %v784_v26 = vmul.f32 %v783_v10, %v2625_v24 }
 0x4bc   : > { %1776 = vrot.lane.b32.xlu0 %v1774_v50, %s2355_s29  ;;  %1785 = vrot.lane.b32.xlu1 %v1783_v51, %s2355_s29 }
 0x4bd   : > { %v1350_v58 = vsel %vm675_vm13, %v1348_v47, %v1349_v52 }
 0x4be   : > { %v1352_v60 = vadd.f32 %v1350_v58, %v1331_v57  ;;  %v1199_v61 = vpop.permute.xlu0 %1198  ;;  %v1170_v62 = vpop.permute.xlu1 %1169 }
 0x4bf   : > { %v1200_v5 = vrot.slane %v1199_v61, 2  ;;  %v1171_v6 = vrot.slane %v1170_v62, 2 }
 0x4c0   : > { %756 = vrot.lane.b32.xlu0 %v754_v63, %s2354_s10  ;;  %766 = vrot.lane.b32.xlu1 %v764_v3, %s2354_s10  ;;  %s2055_s10 = sld [smem:[#allocation7 + $0x36]] }
 0x4c1   : > { %v1201_v14 = vsel %vm696_vm14, %v1199_v61, %v1200_v5  ;;  %v1172_v15 = vsel %vm675_vm13, %v1170_v62, %v1171_v6  ;;  %v844_v6 = vrot.slane %v2814_v33, 2 }
 0x4c2   : > { %v1203_v18 = vadd.f32 %v1201_v14, %v1183_v32  ;;  %v1174_v12 = vadd.f32 %v1172_v15, %v1159_v11  ;;  %v2934_v23 = vpop.permute.xlu0 %922  ;;  %v2936_v4 = vpop.permute.xlu1 %893  ;;  %v864_v14 = vrot.slane %v2833_v45, 2 }
 0x4c4   : > { %777 = vrot.lane.b32.xlu0 %v775_v25, %s2355_s29  ;;  %786 = vrot.lane.b32.xlu1 %v784_v26, %s2355_s29  ;;  %s1995_s29 = sld [smem:[#allocation7 + $0x32]]  ;;  %v1496_v26 = vstv %s2054_s20  ;;  %s2361_s20 = smov [#allocation8]  }
 0x4c6   : > { %v2942_v27 = vpop.permute.xlu0 %1071  ;;  %v2944_v28 = vpop.permute.xlu1 %1042  ;;  %v1499_v40 = vstv %s2055_s10  ;;  %s1861_s10 = scalar_lea.sflag [#allocation5], %s2509_s6 }
 0x4c7   : > { %v1500_v52 = vmul.f32 %v1499_v40, %v2625_v24  ;;  %v875_v40 = vrot.slane %v2882_v8, 2 }
 0x4ca   : > { %v1368_v29 = vpop.permute.xlu0 %1367  ;;  %v1339_v30 = vpop.permute.xlu1 %1338  ;;  %v825_v11 = vstv %s1995_s29  ;;  %s2270_s29 = scalar_lea.vmem %s3224_s11, 1024 }
 0x4cb   : > { %v1369_v32 = vrot.slane %v1368_v29, 2  ;;  %v1340_v34 = vrot.slane %v1339_v30, 2  ;;  %v826_v0 = vmul.f32 %v825_v11, %v2625_v24  ;;  %v876_v11 = vsel %vm717_vm15, %v2882_v8, %v875_v40  ;;  %p2271_p12 = scmp.ne.s32.totalorder %s3224_s11, %s2270_s29 }
 0x4cd   : > { %v1370_v37 = vsel %vm696_vm14, %v1368_v29, %v1369_v32  ;;  %v1341_v39 = vsel %vm675_vm13, %v1339_v30, %v1340_v34  ;;  %v855_v29 = vrot.slane %v2851_v56, 2  ;;  %v904_v30 = vrot.slane %v2898_v35, 2  ;;  %p2272_p2 = pnand %p2271_p12, %p3293_p0 }
 0x4ce   : > { %v2949_v41 = vadd.f32 %v1370_v37, %v1352_v60  ;;  %v1343_v42 = vadd.f32 %v1341_v39, %v1328_v36  ;;  %v1190_v44 = vpop.permute.xlu0 %1189  ;;  %v1517_v47 = vpop.permute.xlu1 %1516  ;;  %v865_v37 = vsel %vm696_vm14, %v2833_v45, %v864_v14  ;;  %v2998_v14 = vld [vmem:[#allocation2] sm:$0x3f] }
 0x4cf   : > { %v1191_v50 = vrot.slane %v1190_v44, 2  ;;  %v1518_v51 = vrot.slane %v1517_v47, 2  ;;  %v905_v45 = vsel %vm738_vm0, %v2898_v35, %v904_v30  ;;  %p2273_p7 = pneg %p2272_p2 }
 0x4d1   : > { %v1192_v53 = vsel %vm696_vm14, %v1190_v44, %v1191_v50  ;;  %v1519_v54 = vsel %vm675_vm13, %v1517_v47, %v1518_v51  ;;  %v1497_v44 = vmul.f32 %v1496_v26, %v2625_v24  ;;  %v1668_v47 = vstv %s2963_s25  ;;  %s2274_s25 = sshll.u32 %s2361_s20, 4  ;;  %s2275_s25 = int_to_ptr.vmem [resolvable:$false] %s2274_s25 }
 0x4d2   : > { %v2954_v57 = vadd.f32 %v1192_v53, %v1174_v12  ;;  %v1521_v58 = vadd.f32 %v1519_v54, %v1500_v52  ;;  %v2956_v59 = vpop.permute.xlu0 %913  ;;  %v1219_v61 = vpop.permute.xlu1 %1218  ;;  %v845_v12 = vsel %vm675_vm13, %v2814_v33, %v844_v6  ;;  %v856_v53 = vsel %vm696_vm14, %v2851_v56, %v855_v29  ;;  %p2277_p8 = scmp.lt.s32.totalorder %s3224_s11, %s2275_s25 }
 0x4d3   : > { %v1220_v60 = vrot.slane %v1219_v61, 2  ;;  %v847_v39 = vadd.f32 %v845_v12, %v826_v0  ;;  %v1669_v56 = vmul.f32 %v2998_v14, %v1668_v47 }
 0x4d5   : > { %v1221_v62 = vsel %vm717_vm15, %v1219_v61, %v1220_v60  ;;  %v867_v52 = vadd.f32 %v865_v37, %v847_v39  ;;  %v895_v60 = vrot.slane %v2936_v4, 2 }
 0x4d6   : > { %v2959_v63 = vadd.f32 %v1221_v62, %v1203_v18  ;;  %v2961_v3 = vpop.permute.xlu0 %1062  ;;  %v943_v5 = vpop.permute.xlu1 %942  ;;  %v884_v18 = vrot.slane %v2849_v55, 2 }
 0x4d7   : > { %v944_v62 = vrot.slane %v943_v5, 2 }
 0x4d8   : > { %v885_v50 = vsel %vm717_vm15, %v2849_v55, %v884_v18 }
 0x4da   : > { %v1359_v7 = vpop.permute.xlu0 %1358  ;;  %v2966_v10 = vpop.permute.xlu1 %1091 }
 0x4db   : > { %v1360_v15 = vrot.slane %v1359_v7, 2 }
 0x4dd   : > { %v1361_v25 = vsel %vm696_vm14, %v1359_v7, %v1360_v15  ;;  %v887_v7 = vadd.f32 %v885_v50, %v867_v52  ;;  %v915_v15 = vrot.slane %v2956_v59, 2 }
 0x4de   : > { %v2976_v32 = vadd.f32 %v1361_v25, %v1343_v42  ;;  %v1508_v34 = vpop.permute.xlu0 %1507  ;;  %v2978_v36 = vpop.permute.xlu1 %1387  ;;  %v924_v42 = vrot.slane %v2934_v23, 2  ;;  %v858_v25 = vadd.f32 %v856_v53, %v2831_v43 }
 0x4df   : > { %v1509_v33 = vrot.slane %v1508_v34, 2  ;;  %v907_v26 = vadd.f32 %v905_v45, %v887_v7  ;;  %v916_v39 = vsel %vm759_vm1, %v2956_v59, %v915_v15  ;;  %v1073_v7 = vrot.slane %v2942_v27, 2 }
 0x4e0   : > { %v925_v35 = vsel %vm759_vm1, %v2934_v23, %v924_v42  ;;  %v896_v23 = vsel %vm738_vm0, %v2936_v4, %v895_v60  ;;  %v878_v37 = vadd.f32 %v876_v11, %v858_v25  ;;  %v3025_v4 = vsub.s32 2, %v2620_v48 }
 0x4e1   : > { %v1510_v51 = vsel %vm675_vm13, %v1508_v34, %v1509_v33  ;;  %v945_v34 = vsel %vm273_vm2, %v943_v5, %v944_v62  ;;  %v927_v33 = vadd.f32 %v925_v35, %v907_v26  ;;  %v1093_v35 = vrot.slane %v2966_v10, 2 }
 0x4e2   : > { %v2993_v54 = vadd.f32 %v1510_v51, %v1497_v44  ;;  %v1686_v61 = vpop.permute.xlu0 %1685  ;;  %v1537_v24 = vpop.permute.xlu1 %1536  ;;  %v898_v43 = vadd.f32 %v896_v23, %v878_v37  ;;  %v3022_v51 = vsub.s32 0, %v2620_v48  ;;  %v1064_v25 = vrot.slane %v2961_v3, 2 }
 0x4e3   : > { %v1687_v55 = vrot.slane %v1686_v61, 2  ;;  %v1538_v6 = vrot.slane %v1537_v24, 2  ;;  %v947_v40 = vadd.f32 %v945_v34, %v927_v33  ;;  %v1094_v34 = vsel %vm759_vm1, %v2966_v10, %v1093_v35 }
 0x4e4   : > { %v918_v50 = vadd.f32 %v916_v39, %v898_v43 }
 0x4e5   : > { %v1688_v12 = vsel %vm675_vm13, %v1686_v61, %v1687_v55  ;;  %v1539_v18 = vsel %vm696_vm14, %v1537_v24, %v1538_v6  ;;  %v2008_v5 = vrot.slane %v947_v40, 9  ;;  %v1053_v61 = vrot.slane %v2914_v49, 2 }
 0x4e6   : > { %v3007_v0 = vadd.f32 %v1688_v12, %v1669_v56  ;;  %v3009_v29 = vadd.f32 %v1539_v18, %v1521_v58  ;;  %v3011_v8 = vpop.permute.xlu0 %1238  ;;  %v3013_v30 = vpop.permute.xlu1 %1209  ;;  %v3037_v6 = vsub.s32 4, %v2620_v48  ;;  %v1044_v56 = vrot.slane %v2944_v28, 2 }
 0x4e7   : > { %v1054_v11 = vsel %vm717_vm15, %v2914_v49, %v1053_v61  ;;  %v1074_v18 = vsel %vm738_vm0, %v2942_v27, %v1073_v7  ;;  %v1065_v27 = vsel %vm738_vm0, %v2961_v3, %v1064_v25 }
 0x4e8   : > { %v1056_v23 = vadd.f32 %v1054_v11, %v2880_v13  ;;  %v1045_v49 = vsel %vm717_vm15, %v2944_v28, %v1044_v56 }
 0x4e9   : > { %v1047_v13 = vadd.f32 %v1045_v49, %v2912_v46  ;;  %v1211_v49 = vrot.slane %v3013_v30, 2 }
 0x4ea   : > { %v1083_v44 = vpop.permute.xlu0 %1082  ;;  %v934_v47 = vpop.permute.xlu1 %933  ;;  %v1076_v33 = vadd.f32 %v1074_v18, %v1056_v23  ;;  %v1240_v23 = vrot.slane %v3011_v8, 2 }
 0x4eb   : > { %v935_v58 = vrot.slane %v934_v47, 2  ;;  %v1084_v37 = vrot.slane %v1083_v44, 2  ;;  %v1067_v28 = vadd.f32 %v1065_v27, %v1047_v13 }
 0x4ed   : > { %v936_v42 = vsel %vm273_vm2, %v934_v47, %v935_v58  ;;  %v1096_v47 = vadd.f32 %v1094_v34, %v1076_v33  ;;  %v1085_v58 = vsel %vm759_vm1, %v1083_v44, %v1084_v37  ;;  %v1665_v34 = vstv %s2069_s30 }
 0x4ee   : > { %v938_v52 = vadd.f32 %v936_v42, %v918_v50  ;;  %v3027_v53 = vpop.permute.xlu0 %1378  ;;  %v1112_v45 = vpop.permute.xlu1 %1111 }
 0x4ef   : > { %v1113_v26 = vrot.slane %v1112_v45, 2  ;;  %v1380_v37 = vrot.slane %v3027_v53, 2 }
 0x4f0   : > { %v952_v59 = vadd.f32 %v2008_v5, %v938_v52  ;;  %v1087_v52 = vadd.f32 %v1085_v58, %v1067_v28  ;;  %v3090_v58 = vmul.f32 %v2998_v14, %v1665_v34  ;;  %v1241_v28 = vsel %vm738_vm0, %v3011_v8, %v1240_v23 }
 0x4f1   : > { %v1114_v40 = vsel %vm273_vm2, %v1112_v45, %v1113_v26  ;;  %v1389_v26 = vrot.slane %v2978_v36, 2 }
 0x4f2   : > { %v3030_v24 = vpop.permute.xlu0 %1527  ;;  %v3032_v60 = vpop.permute.xlu1 %1407  ;;  %v961_v62 = vrot.slane %v952_v59, %v3025_v4  ;;  %v957_v55 = vrot.slane %v952_v59, %v3022_v51  ;;  %v965_v48 = vrot.slane %v952_v59, %v3037_v6  ;;  %v1116_v50 = vadd.f32 %v1114_v40, %v1096_v47 }
 0x4f3   : > { %v1409_v33 = vrot.slane %v3032_v60, 2  ;;  %v1390_v13 = vsel %vm717_vm15, %v2978_v36, %v1389_v26  ;;  %v1529_v47 = vrot.slane %v3030_v24, 2 }
 0x4f4   : > { %968 = vrot.lane.b32.xlu0 %v961_v62, %s2346_s22  ;;  %966 = vrot.lane.b32.xlu1 %v957_v55, %s2346_s22  ;;  %v2023_v61 = vrot.slane %v1116_v50, 9  ;;  %v1212_v50 = vsel %vm717_vm15, %v3013_v30, %v1211_v49 }
 0x4f5   : > { %v1410_v36 = vsel %vm738_vm0, %v3032_v60, %v1409_v33 }
 0x4f6   : > { %v3046_v15 = vpop.permute.xlu0 %1676  ;;  %v3048_v12 = vpop.permute.xlu1 %1556 }
 0x4f7   : > { %v1678_v60 = vrot.slane %v3046_v15, 2 }
 0x4f8   : > { %970 = vrot.lane.b32.xlu1 %v965_v48, %s2346_s22  ;;  %s2356_s22 = smov 126  }
 0x4fa   : > { %v3060_v39 = vpop.permute.xlu0 %1229  ;;  %v3062_v43 = vpop.permute.xlu1 %1705 }
 0x4fb   : > { %v1231_v8 = vrot.slane %v3060_v39, 2 }
 0x4fe   : > { %v1103_v42 = vpop.permute.xlu0 %1102  ;;  %v1259_v10 = vpop.permute.xlu1 %1258 }
 0x4ff   : > { %v1104_v5 = vrot.slane %v1103_v42, 2 }
 0x501   : > { %v1105_v59 = vsel %vm273_vm2, %v1103_v42, %v1104_v5  ;;  %v1260_v42 = vrot.slane %v1259_v10, 2 }
 0x502   : > { %v1107_v62 = vadd.f32 %v1105_v59, %v1087_v52  ;;  %v1428_v55 = vpop.permute.xlu0 %1427  ;;  %v1399_v7 = vpop.permute.xlu1 %1398  ;;  %v1392_v52 = vadd.f32 %v1390_v13, %v2949_v41  ;;  %v1381_v59 = vsel %vm717_vm15, %v3027_v53, %v1380_v37  ;;  %v1214_v41 = vadd.f32 %v1212_v50, %v2954_v57 }
 0x503   : > { %v1429_v5 = vrot.slane %v1428_v55, 2  ;;  %v1530_v53 = vsel %vm696_vm14, %v3030_v24, %v1529_v47  ;;  %v1383_v34 = vadd.f32 %v1381_v59, %v2976_v32  ;;  %v1232_v24 = vsel %vm738_vm0, %v3060_v39, %v1231_v8 }
 0x504   : > { %v1121_v3 = vadd.f32 %v2023_v61, %v1107_v62  ;;  %v1558_v61 = vrot.slane %v3048_v12, 2  ;;  %v1412_v37 = vadd.f32 %v1410_v36, %v1392_v52  ;;  %v1532_v32 = vadd.f32 %v1530_v53, %v2993_v54 }
 0x505   : > { %v1430_v26 = vsel %vm759_vm1, %v1428_v55, %v1429_v5 }
 0x506   : > { %v3070_v11 = vpop.permute.xlu0 %1576  ;;  %v3072_v45 = vpop.permute.xlu1 %1547  ;;  %v1130_v46 = vrot.slane %v1121_v3, %v3025_v4  ;;  %v1126_v44 = vrot.slane %v1121_v3, %v3022_v51  ;;  %v1134_v48 = vrot.slane %v1121_v3, %v3037_v6  ;;  %v1400_v3 = vrot.slane %v1399_v7, 2 }
 0x507   : > { %v1559_v33 = vsel %vm717_vm15, %v3048_v12, %v1558_v61  ;;  %v1432_v50 = vadd.f32 %v1430_v26, %v1412_v37  ;;  %v1578_v12 = vrot.slane %v3070_v11, 2  ;;  %v1549_v8 = vrot.slane %v3072_v45, 2 }
 0x508   : > { %1137 = vrot.lane.b32.xlu1 %v1130_v46, %s2356_s22  ;;  %1135 = vrot.lane.b32.xlu0 %v1126_v44, %s2356_s22  ;;  %v1243_v44 = vadd.f32 %v1241_v28, %v2959_v63  ;;  %v1707_v63 = vrot.slane %v3062_v43, 2  ;;  %v1561_v5 = vadd.f32 %v1559_v33, %v3009_v29 }
 0x509   : > { %v1579_v29 = vsel %vm738_vm0, %v3070_v11, %v1578_v12 }
 0x50a   : > { %v3076_v56 = vpop.permute.xlu0 %1725  ;;  %v3078_v35 = vpop.permute.xlu1 %1696  ;;  %v1708_v54 = vsel %vm696_vm14, %v3062_v43, %v1707_v63  ;;  %v1581_v63 = vadd.f32 %v1579_v29, %v1561_v5 }
 0x50b   : > { %v1710_v11 = vadd.f32 %v1708_v54, %v3007_v0  ;;  %v1698_v37 = vrot.slane %v3078_v35, 2 }
 0x50c   : > { %1139 = vrot.lane.b32.xlu0 %v1134_v48, %s2356_s22  ;;  %v1261_v48 = vsel %vm759_vm1, %v1259_v10, %v1260_v42  ;;  %v1401_v10 = vsel %vm738_vm0, %v1399_v7, %v1400_v3  ;;  %v1679_v42 = vsel %vm675_vm13, %v3046_v15, %v1678_v60  ;;  %v1234_v7 = vadd.f32 %v1232_v24, %v1214_v41  ;;  %s2276_s22 = scalar_lea.vmem %s2275_s25, 2048 }
 0x50d   : > { %v1263_v28 = vadd.f32 %v1261_v48, %v1243_v44  ;;  %v1403_v59 = vadd.f32 %v1401_v10, %v1383_v34  ;;  %v1727_v15 = vrot.slane %v3076_v56, 2  ;;  %v1550_v34 = vsel %vm717_vm15, %v3072_v45, %v1549_v8  ;;  %p2278_p9 = scmp.lt.s32.totalorder %s2276_s22, %s2270_s29 }
 0x50e   : > { %v1279_v18 = vpop.permute.xlu0 %1278  ;;  %v1250_v25 = vpop.permute.xlu1 %1249  ;;  %v1552_v12 = vadd.f32 %v1550_v34, %v1532_v32  ;;  %vm1646_vm13 = vcmask 1006592  }
 0x50f   : > { %v1280_v30 = vrot.slane %v1279_v18, 2  ;;  %v1251_v23 = vrot.slane %v1250_v25, 2  ;;  %v1728_v24 = vsel %vm717_vm15, %v3076_v56, %v1727_v15  ;;  %p2279_p10 = por %p2278_p9, %p2277_p8 }
 0x511   : > { %v1281_v55 = vsel %vm273_vm2, %v1279_v18, %v1280_v30  ;;  %v1252_v52 = vsel %vm759_vm1, %v1250_v25, %v1251_v23  ;;  %p2280_p1 = pnand %p2279_p10, %p2273_p7 }
 0x512   : > { %v1448_v27 = vpop.permute.xlu0 %1447  ;;  %v1419_v40 = vpop.permute.xlu1 %1418  ;;  %v1283_v18 = vadd.f32 %v1281_v55, %v1263_v28  ;;  %v1254_v25 = vadd.f32 %v1252_v52, %v1234_v7  ;;  %v1681_v7 = vadd.f32 %v1679_v42, %v3090_v58 }
 0x513   : > { %v1449_v46 = vrot.slane %v1448_v27, 2  ;;  %v1420_v49 = vrot.slane %v1419_v40, 2 }
 0x514   : > { %v2038_v43 = vrot.slane %v1283_v18, 9 }
 0x515   : > { %v1450_v47 = vsel %vm273_vm2, %v1448_v27, %v1449_v46  ;;  %v1421_v39 = vsel %vm759_vm1, %v1419_v40, %v1420_v49 }
 0x516   : > { %v3102_v14 = vpop.permute.xlu0 %1596  ;;  %v3104_v62 = vpop.permute.xlu1 %1567  ;;  %v1452_v36 = vadd.f32 %v1450_v47, %v1432_v50  ;;  %v1423_v40 = vadd.f32 %v1421_v39, %v1403_v59 }
 0x517   : > { %v1598_v46 = vrot.slane %v3102_v14, 2  ;;  %v1569_v44 = vrot.slane %v3104_v62, 2 }
 0x518   : > { %v2053_v60 = vrot.slane %v1452_v36, 9 }
 0x519   : > { %v1599_v47 = vsel %vm759_vm1, %v3102_v14, %v1598_v46  ;;  %v1570_v28 = vsel %vm738_vm0, %v3104_v62, %v1569_v44  ;;  %v1699_v14 = vsel %vm696_vm14, %v3078_v35, %v1698_v37  ;;  %v1730_v62 = vadd.f32 %v1728_v24, %v1710_v11 }
 0x51a   : > { %v3118_v57 = vpop.permute.xlu0 %1745  ;;  %v3120_v13 = vpop.permute.xlu1 %1716  ;;  %v1601_v18 = vadd.f32 %v1599_v47, %v1581_v63  ;;  %v1572_v36 = vadd.f32 %v1570_v28, %v1552_v12  ;;  %v1701_v29 = vadd.f32 %v1699_v14, %v1681_v7 }
 0x51b   : > { %v1747_v0 = vrot.slane %v3118_v57, 2  ;;  %v1718_v45 = vrot.slane %v3120_v13, 2 }
 0x51d   : > { %v1748_v32 = vsel %vm738_vm0, %v3118_v57, %v1747_v0  ;;  %v1719_v58 = vsel %vm717_vm15, %v3120_v13, %v1718_v45 }
 0x51e   : > { %v1439_v27 = vpop.permute.xlu0 %1438  ;;  %v1270_v61 = vpop.permute.xlu1 %1269  ;;  %v1721_v57 = vadd.f32 %v1719_v58, %v1701_v29 }
 0x51f   : > { %v1440_v3 = vrot.slane %v1439_v27, 2  ;;  %v1271_v30 = vrot.slane %v1270_v61, 2 }
 0x521   : > { %v1441_v41 = vsel %vm273_vm2, %v1439_v27, %v1440_v3  ;;  %v1272_v53 = vsel %vm273_vm2, %v1270_v61, %v1271_v30 }
 0x522   : > { %v1443_v48 = vadd.f32 %v1441_v41, %v1423_v40  ;;  %v1274_v26 = vadd.f32 %v1272_v53, %v1254_v25  ;;  %v1617_v23 = vpop.permute.xlu0 %1616  ;;  %v1588_v49 = vpop.permute.xlu1 %1587  ;;  %v1750_v40 = vadd.f32 %v1748_v32, %v1730_v62 }
 0x523   : > { %v1618_v33 = vrot.slane %v1617_v23, 2  ;;  %v1589_v50 = vrot.slane %v1588_v49, 2 }
 0x524   : > { %v1457_v10 = vadd.f32 %v2053_v60, %v1443_v48  ;;  %v1288_v55 = vadd.f32 %v2038_v43, %v1274_v26 }
 0x525   : > { %v1619_v59 = vsel %vm273_vm2, %v1617_v23, %v1618_v33  ;;  %v1590_v27 = vsel %vm759_vm1, %v1588_v49, %v1589_v50 }
 0x526   : > { %v1766_v52 = vpop.permute.xlu0 %1765  ;;  %v1737_v39 = vpop.permute.xlu1 %1736  ;;  %v1297_v5 = vrot.slane %v1288_v55, %v3025_v4  ;;  %v1293_v56 = vrot.slane %v1288_v55, %v3022_v51  ;;  %v1621_v42 = vadd.f32 %v1619_v59, %v1601_v18  ;;  %v1462_v3 = vrot.slane %v1457_v10, %v3022_v51 }
 0x527   : > { %v1767_v61 = vrot.slane %v1766_v52, 2  ;;  %v1738_v54 = vrot.slane %v1737_v39, 2  ;;  %v1301_v30 = vrot.slane %v1288_v55, %v3037_v6  ;;  %v1592_v46 = vadd.f32 %v1590_v27, %v1572_v36 }
 0x528   : > { %1304 = vrot.lane.b32.xlu0 %v1297_v5, %s2357_s5  ;;  %1302 = vrot.lane.b32.xlu1 %v1293_v56, %s2357_s5  ;;  %v2068_v53 = vrot.slane %v1621_v42, 9  ;;  %v1470_v26 = vrot.slane %v1457_v10, %v3037_v6  ;;  %v1466_v23 = vrot.slane %v1457_v10, %v3025_v4 }
 0x529   : > { %v1768_v44 = vsel %vm759_vm1, %v1766_v52, %v1767_v61  ;;  %v1739_v13 = vsel %vm738_vm0, %v1737_v39, %v1738_v54 }
 0x52a   : > { %v1757_v35 = vpop.permute.xlu0 %1756  ;;  %v1608_v8 = vpop.permute.xlu1 %1607  ;;  %v1770_v37 = vadd.f32 %v1768_v44, %v1750_v40  ;;  %v1741_v33 = vadd.f32 %v1739_v13, %v1721_v57 }
 0x52b   : > { %v1758_v15 = vrot.slane %v1757_v35, 2  ;;  %v1609_v25 = vrot.slane %v1608_v8, 2 }
 0x52c   : > { %1471 = vrot.lane.b32.xlu0 %v1462_v3, %s2358_s13  ;;  %1306 = vrot.lane.b32.xlu1 %v1301_v30, %s2357_s5 }
 0x52d   : > { %v1610_v41 = vsel %vm273_vm2, %v1608_v8, %v1609_v25  ;;  %v1759_v49 = vsel %vm759_vm1, %v1757_v35, %v1758_v15 }
 0x52e   : > { %v1612_v43 = vadd.f32 %v1610_v41, %v1592_v46  ;;  %v1777_v60 = vpop.permute.xlu0 %1776  ;;  %v1786_v48 = vpop.permute.xlu1 %1785  ;;  %v1761_v47 = vadd.f32 %v1759_v49, %v1741_v33  ;;  %v623_v46 = vand.u32 127, %v576_v38 }
 0x52f   : > { %v1778_v11 = vrot.slane %v1777_v60, 2  ;;  %v1787_v34 = vrot.slane %v1786_v48, 2 }
 0x530   : > { %v1626_v63 = vadd.f32 %v2068_v53, %v1612_v43  ;;  %1475 = vrot.lane.b32.xlu0 %v1470_v26, %s2358_s13  ;;  %1473 = vrot.lane.b32.xlu1 %v1466_v23, %s2358_s13  ;;  %v624_v44 = vadd.s32 128, %v623_v46  ;;  %v629_v41 = vand.u32 15, %v623_v46 }
 0x531   : > { %v1779_v24 = vsel %vm273_vm2, %v1777_v60, %v1778_v11  ;;  %v1788_v55 = vsel %vm273_vm2, %v1786_v48, %v1787_v34 }
 0x532   : > { %v1790_v28 = vadd.f32 %v1788_v55, %v1770_v37  ;;  %v757_v0 = vpop.permute.xlu0 %756  ;;  %v767_v50 = vpop.permute.xlu1 %766  ;;  %v1635_v12 = vrot.slane %v1626_v63, %v3025_v4  ;;  %v1631_v10 = vrot.slane %v1626_v63, %v3022_v51  ;;  %v1781_v39 = vadd.f32 %v1779_v24, %v1761_v47 }
 0x533   : > { %v758_v45 = vrot.slane %v757_v0, 2  ;;  %v768_v52 = vrot.slane %v767_v50, 2  ;;  %v1639_v62 = vrot.slane %v1626_v63, %v3037_v6  ;;  %v636_v53 = vand.u32 15, %v624_v44 }
 0x534   : > { %v2083_v5 = vrot.slane %v1790_v28, 9  ;;  %1642 = vrot.lane.b32.xlu0 %v1635_v12, %s2359_s7  ;;  %1640 = vrot.lane.b32.xlu1 %v1631_v10, %s2359_s7  ;;  %v649_v48 = vadd.s32 4294967293, %v629_v41  ;;  %v812_v26 = vadd.s32 4294967294, %v629_v41  ;;  %v981_v49 = vadd.s32 4294967295, %v629_v41 }
 0x535   : > { %v769_v56 = vsel %vm759_vm1, %v767_v50, %v768_v52  ;;  %v760_v18 = vsel %vm759_vm1, %v757_v0, %v758_v45  ;;  %v650_v23 = vadd.s32 4294967293, %v636_v53  ;;  %v982_v37 = vadd.s32 4294967295, %v636_v53 }
 0x536   : > { %v1795_v7 = vadd.f32 %v2083_v5, %v1781_v39  ;;  %v778_v14 = vpop.permute.xlu0 %777  ;;  %v787_v59 = vpop.permute.xlu1 %786  ;;  %v771_v27 = vadd.f32 %v769_v56, %v2810_v1  ;;  %v762_v42 = vadd.f32 %v760_v18, %v2812_v31  ;;  %vm651_vm4 = vcmp.ge.s32.totalorder %v649_v48, 0 }
 0x537   : > { %v779_v36 = vrot.slane %v778_v14, 2  ;;  %v788_v32 = vrot.slane %v787_v59, 2  ;;  %vm814_vm5 = vcmp.ge.s32.totalorder %v812_v26, 0  ;;  %v1317_v33 = vadd.s32 1, %v629_v41 }
 0x538   : > { %1644 = vrot.lane.b32.xlu1 %v1639_v62, %s2359_s7  ;;  %v1800_v61 = vrot.slane %v1795_v7, %v3022_v51  ;;  %v1804_v8 = vrot.slane %v1795_v7, %v3025_v4  ;;  %v1808_v29 = vrot.slane %v1795_v7, %v3037_v6  ;;  %v813_v6 = vadd.s32 4294967294, %v636_v53 }
 0x539   : > { %v780_v54 = vsel %vm273_vm2, %v778_v14, %v779_v36  ;;  %v789_v58 = vsel %vm273_vm2, %v787_v59, %v788_v32  ;;  %vm972_vm2 = vcmask 1039360   ;;  %vm652_vm6 = vcmp.ge.s32.totalorder %v650_v23, 0 }
 0x53a   : > { %v791_v35 = vadd.f32 %v789_v58, %v771_v27  ;;  %1809 = vrot.lane.b32.xlu0 %v1800_v61, %s2360_s12  ;;  %v782_v3 = vadd.f32 %v780_v54, %v762_v42  ;;  %vm815_vm7 = vcmp.ge.s32.totalorder %v813_v6, 0  ;;  %vm983_vm8 = vcmp.ge.s32.totalorder %v981_v49, 0 }
 0x53b   : > { %v1318_v0 = vadd.s32 1, %v636_v53  ;;  %v1486_v50 = vadd.s32 2, %v629_v41  ;;  %vm984_vm9 = vcmp.ge.s32.totalorder %v982_v37, 0  ;;  %vm1321_vm12 = vcmp.lt.s32.totalorder %v1317_v33, 16 }
 0x53c   : > { %v1993_v30 = vrot.slane %v791_v35, 9  ;;  %1811 = vrot.lane.b32.xlu1 %v1804_v8, %s2360_s12  ;;  %v1487_v14 = vadd.s32 2, %v636_v53  ;;  %v1655_v32 = vadd.s32 3, %v629_v41  ;;  %vm1815_vm1 = vcmask 998400  }
 0x53d   : > { %vm1322_vm14 = vcmp.lt.s32.totalorder %v1318_v0, 16  ;;  %vm1490_vm15 = vcmp.lt.s32.totalorder %v1486_v50, 16 }
 0x53e   : > { %v796_v1 = vadd.f32 %v1993_v30, %v782_v3  ;;  %1813 = vrot.lane.b32.xlu0 %v1808_v29, %s2360_s12  ;;  %vm1491_vm0 = vcmp.lt.s32.totalorder %v1487_v14, 16 }
 0x540   : > { %v801_v63 = vrot.slane %v796_v1, %v3022_v51  ;;  %v805_v10 = vrot.slane %v796_v1, %v3025_v4  ;;  %v1656_v1 = vadd.s32 3, %v636_v53 }
 0x542   : > { %v808_v52 = vsel %vm651_vm4, %v801_v63, 0.0  ;;  %v809_v62 = vsel %vm652_vm6, %v805_v10, 0.0 }
 0x566   : > { %v969_v15 = vpop.permute.xlu0 %968  ;;  %v967_v25 = vpop.permute.xlu1 %966 }
 0x567   : > { %v973_v38 = vsel %vm972_vm2, %v967_v25, %v969_v15 }
 0x568   : > { %v977_v12 = vsel %vm814_vm5, %v973_v38, 0.0 }
 0x569   : > { %v979_v59 = vadd.f32 %v977_v12, %v808_v52 }
 0x56a   : > { %v971_v57 = vpop.permute.xlu1 %970 }
 0x56b   : > { %v974_v47 = vsel %vm972_vm2, %v969_v15, %v971_v57  ;;  %vm1659_vm2 = vcmp.lt.s32.totalorder %v1655_v32, 16 }
 0x56c   : > { %v978_v39 = vsel %vm815_vm7, %v974_v47, 0.0 }
 0x56d   : > { %v980_v27 = vadd.f32 %v978_v39, %v809_v62 }
 0x57a   : > { %v1136_v40 = vpop.permute.xlu0 %1135  ;;  %v1138_v31 = vpop.permute.xlu1 %1137 }
 0x57b   : > { %v1142_v28 = vsel %vm1141_vm3, %v1136_v40, %v1138_v31 }
 0x57c   : > { %v1146_v5 = vsel %vm983_vm8, %v1142_v28, 0.0 }
 0x57d   : > { %v1148_v61 = vadd.f32 %v1146_v5, %v979_v59 }
 0x57e   : > { %v1140_v13 = vpop.permute.xlu0 %1139 }
 0x57f   : > { %v1143_v45 = vsel %vm1141_vm3, %v1138_v31, %v1140_v13  ;;  %vm1660_vm3 = vcmp.lt.s32.totalorder %v1656_v1, 16 }
 0x580   : > { %v1147_v18 = vsel %vm984_vm9, %v1143_v45, 0.0 }
 0x581   : > { %v1149_v3 = vadd.f32 %v1147_v18, %v980_v27 }
 0x59a   : > { %v1305_v43 = vpop.permute.xlu0 %1304  ;;  %v1303_v60 = vpop.permute.xlu1 %1302 }
 0x59b   : > { %v1309_v36 = vsel %vm1308_vm11, %v1303_v60, %v1305_v43 }
 0x59c   : > { %v1315_v30 = vadd.f32 %v1309_v36, %v1148_v61 }
 0x59e   : > { %v1472_v11 = vpop.permute.xlu0 %1471  ;;  %v1307_v34 = vpop.permute.xlu1 %1306 }
 0x59f   : > { %v1310_v42 = vsel %vm1308_vm11, %v1305_v43, %v1307_v34 }
 0x5a0   : > { %v1316_v46 = vadd.f32 %v1310_v42, %v1149_v3 }
 0x5a2   : > { %v1476_v24 = vpop.permute.xlu0 %1475  ;;  %v1474_v55 = vpop.permute.xlu1 %1473 }
 0x5a3   : > { %v1478_v4 = vsel %vm1477_vm10, %v1472_v11, %v1474_v55  ;;  %v1479_v54 = vsel %vm1477_vm10, %v1474_v55, %v1476_v24 }
 0x5a4   : > { %v1482_v35 = vsel %vm1321_vm12, %v1478_v4, 0.0  ;;  %v1483_v15 = vsel %vm1322_vm14, %v1479_v54, 0.0 }
 0x5a5   : > { %v1484_v57 = vadd.f32 %v1482_v35, %v1315_v30  ;;  %v1485_v13 = vadd.f32 %v1483_v15, %v1316_v46 }
 0x5a6   : > { %v1643_v56 = vpop.permute.xlu0 %1642  ;;  %v1641_v7 = vpop.permute.xlu1 %1640 }
 0x5a7   : > { %v1647_v58 = vsel %vm1646_vm13, %v1641_v7, %v1643_v56 }
 0x5a8   : > { %v1651_v25 = vsel %vm1490_vm15, %v1647_v58, 0.0 }
 0x5a9   : > { %v1653_v41 = vadd.f32 %v1651_v25, %v1484_v57 }
 0x5aa   : > { %v1645_v8 = vpop.permute.xlu1 %1644 }
 0x5ab   : > { %v1648_v29 = vsel %vm1646_vm13, %v1643_v56, %v1645_v8 }
 0x5ac   : > { %v1810_v40 = vpop.permute.xlu0 %1809  ;;  %v1652_v44 = vsel %vm1491_vm0, %v1648_v29, 0.0 }
 0x5ad   : > { %v1654_v26 = vadd.f32 %v1652_v44, %v1485_v13 }
 0x5ae   : > { %v1812_v31 = vpop.permute.xlu1 %1811 }
 0x5af   : > { %v1816_v43 = vsel %vm1815_vm1, %v1810_v40, %v1812_v31 }
 0x5b0   : > { %v1820_v60 = vsel %vm1659_vm2, %v1816_v43, 0.0  ;;  %v1814_v48 = vpop.permute.xlu0 %1813 }
 0x5b1   : > { %v1822_v23 = vadd.f32 %v1820_v60, %v1653_v41  ;;  %v1817_v53 = vsel %vm1815_vm1, %v1812_v31, %v1814_v48 }
 0x5b2   : > { %v1821_v6 = vsel %vm1660_vm3, %v1817_v53, 0.0 }
 0x5b3   : > { %v2084_v49 = vmul.f32 -1.442695, %v1822_v23  ;;  %v1823_v11 = vadd.f32 %v1821_v6, %v1654_v26 }
 0x5b5   : > { %2218 = vpow2.f32 %v2084_v49  ;;  %v2085_v34 = vmul.f32 -1.442695, %v1823_v11 }
 0x5b7   : > { %2220 = vpow2.f32 %v2085_v34 }
 0x5c2   : > { %v2219_v37 = vpop.eup %2218 }
 0x5c3   : > { %v1830_v38 = vadd.f32 1.0, %v2219_v37 }
 0x5c4   : > { %v2221_v33 = vpop.eup %2220 }
 0x5c5   : > { %2222 = vrcp.f32 %v1830_v38  ;;  %v1831_v63 = vadd.f32 1.0, %v2221_v33 }
 0x5c7   : > { %2224 = vrcp.f32 %v1831_v63 }
 0x5d2   : > { %v2223_v24 = vpop.eup %2222 }
 0x5d3   : > { %v1839_v55 = vrot.slane %v2223_v24, %v3022_v51 }
 0x5d4   : > { %v2225_v47 = vpop.eup %2224 }
 0x5d5   : > { %v1844_v28 = vmul.f32 %v1839_v55, %v2580_v16  ;;  %v1846_v0 = vmul.f32 %v1839_v55, %v2586_v19  ;;  %v1848_v50 = vmul.f32 %v1839_v55, %v2592_v21  ;;  %v1850_v12 = vmul.f32 %v1839_v55, %v2604_v9 }
 0x5d6   : > { %v1843_v10 = vrot.slane %v2225_v47, %v3022_v51 }
 0x5d7   : > { %1852 = vst [vmem:[%s229_s23] sm:$0xff] %v1844_v28  ;;  %1854 = vst [vmem:[%s229_s23 + $0x10] sm:$0xff] %v1846_v0 }
 0x5d8   : > { %1856 = vst [vmem:[%s229_s23 + $0x20] sm:$0xff] %v1848_v50  ;;  %1858 = vst [vmem:[%s229_s23 + $0x30] sm:$0xff] %v1850_v12  ;;  %v1845_v16 = vmul.f32 %v1843_v10, %v2583_v17  ;;  %v1847_v19 = vmul.f32 %v1843_v10, %v2589_v20  ;;  %v1849_v21 = vmul.f32 %v1843_v10, %v2595_v22 }
 0x5d9   : > { %v1851_v9 = vmul.f32 %v1843_v10, %v2607_v2 }
 0x5da   : > { %1853 = vst [vmem:[%s229_s23 + $0x8] sm:$0xff] %v1845_v16  ;;  %1855 = vst [vmem:[%s229_s23 + $0x18] sm:$0xff] %v1847_v19 }
 0x5db   : > { %1857 = vst [vmem:[%s229_s23 + $0x28] sm:$0xff] %v1849_v21  ;;  %1859 = vst [vmem:[%s229_s23 + $0x38] sm:$0xff] %v1851_v9 }
 0x5dc   : > { %2283 = shalt.err (!%p2280_p1)
}
 0x5dd   : > { %s2284_s30 = scalar_lea.hbm %s3222_s9, 1024  ;;  %s2288_s7 = scalar_lea.hbm %s3275_s4, 2048 }
 0x5de   : > { %p2285_p4 = scmp.ne.s32.totalorder %s3222_s9, %s2284_s30  ;;  %p2289_p6 = scmp.lt.s32.totalorder %s3222_s9, %s3275_s4 }
 0x5df   : > { %p2290_p13 = scmp.lt.s32.totalorder %s2288_s7, %s2284_s30 }
 0x5e0   : > { %p2286_p11 = pnand %p2285_p4, %p3293_p0 }
 0x5e1   : > { %p2291_p3 = por %p2290_p13, %p2289_p6 }
 0x5e2   : > { %p2287_p5 = pneg %p2286_p11 }
 0x5e4   : > { %p2292_p12 = pnand %p2291_p3, %p2287_p5 }
 0x5e6   : > { %2295 = shalt.err (!%p2292_p12)
}
 0x5e7   : > { %s2362_s14 = smov 256   ;;  %s2363_s23 = smov 16  }
 0x5e8   : > { %2128 = dma.vmem_to_hbm [thread:$0]  (%p3293_p0), %s3224_s11, 1024, %s3222_s9, %s1861_s10, %s2362_s14, %s2362_s14, %s2363_s23  }
 0x5e9 PF: > { %s1889_s19 = sand.u32 1, %s2326_s15   ;;  %p3294_p2 = scmp.ne.s32.totalorder %s3284_s28, 0 }
 0x5ea   : > { %p3295_p7 = scmp.ge.s32.totalorder %s2338_s18, 2  ;;  %s1890_s26 = scalar_lea.sflag [#allocation5], %s1889_s19 }
 0x5ec   : > { %p2139_p8 = pnand %p3295_p7, %p3294_p2 }
 0x5ee   : > { %p2140_p9 = pneg %p2139_p8 }
 0x5f0   : > { %2321 = dma.done.wait (%p2140_p9), %s1890_s26, 1024  }
 0x5f1   : > { %2323 = vsyncadd (%p2140_p9), %s1890_s26, 4294966272  ;;  %p18_p10 = scmp.ge.s32.totalorder %s2414_s21, 4   ;;  %s3296_s15 = smov %s2330_s16 }
 0x5f2   : > { %s3297_s16 = smov %s2334_s17  ;;  %s3298_s17 = smov %s2426_s24 }
 0x5f3   : > { %s3299_s18 = smov %s2414_s21  ;;  %20 = sbr.rel (!%p18_p10) target bundleno = 6 (0x6), region = 87 }
 0x5f8   :  { %1895 = vsyncpa [#allocation4], 1 }
 0x5f9   :  { %1897 = vsyncpa [#allocation4 + $0x1], 1 }
 0x5fa   :  { %1898 = vsyncpa [#allocation5], 1 }
 0x5fb   :  { %1900 = vsyncpa [#allocation5 + $0x1], 1 }
 0x5fc   :  { %1901 = vsyncpa [#allocation6], 1 }
 0x5fd   :  { %1903 = vsyncpa [#allocation6 + $0x1], 1 }

</bundles_post_ra>
